<compile_context>
chip_gen: v7x
topology: tpu7x:2x2x1
jax: 0.10.0
libtpu: 0.0.40
codegen_flags: <defaults>
</compile_context>

<pallas_src>
import jax
import jax.numpy as jnp
from jax.experimental import pallas as pl
from jax.experimental.pallas import tpu as pltpu

F_IN = 1433          # fixed by GCNConv(1433, hidden_channels)
F_IN_PAD = 1536      # next multiple of 128
HIDDEN = 32
HID_PAD = 128        # lane-aligned hidden width
F_OUT = 7            # fixed by GCNConv(hidden_channels, 7)
OUT_PAD = 128        # lane-dense output stores

TM = 256             # node-row tile (bigger slabs amortize per-grid-step overhead)
VMEM_LIMIT = 48 * 1024 * 1024   # explicit cap; v5e default scope is only 16 MiB


def _round_up(x, m):
    return (x + m - 1) // m * m


# --------------------------------------------------------------------------- #
# Kernels (each row tile = one grid step, single fused dot chain, f32 MXU acc)
# --------------------------------------------------------------------------- #
def xw1_kernel(x_ref, w1_ref, o_ref):
    """XW1[i] = X[i, :] @ W1  (W1 fully resident, full F_IN contraction per tile)."""
    o_ref[...] = jnp.dot(x_ref[...], w1_ref[...],
                         preferred_element_type=jnp.float32).astype(o_ref.dtype)


def agg1_kernel(a_ref, xw_ref, b1_ref, w2_ref, o_ref):
    """HW2[i] = relu(A[i, :] @ XW1 + b1) @ W2   (dropout = identity, inference)."""
    h = jnp.dot(a_ref[...], xw_ref[...], preferred_element_type=jnp.float32)
    h = jnp.maximum(h + b1_ref[...], 0.0)
    o_ref[...] = jnp.dot(h.astype(jnp.bfloat16), w2_ref[...],
                         preferred_element_type=jnp.float32).astype(o_ref.dtype)


def agg2_kernel(a_ref, hw_ref, b2_ref, o_ref):
    """out[i] = log_softmax(A[i, :] @ HW2 + b2) over the 7 real classes (f32)."""
    logits = jnp.dot(a_ref[...], hw_ref[...],
                     preferred_element_type=jnp.float32) + b2_ref[...]
    # mask padded class lanes so they don't perturb the softmax (f32 epilogue only)
    lane = jax.lax.broadcasted_iota(jnp.int32, logits.shape, 1)
    logits = jnp.where(lane < F_OUT, logits, -1e30)
    m = jnp.max(logits, axis=-1, keepdims=True)
    z = logits - m
    lse = jnp.log(jnp.sum(jnp.exp(z), axis=-1, keepdims=True))
    o_ref[...] = z - lse


def _compiler_params():
    return pltpu.CompilerParams(dimension_semantics=("parallel",),
                                vmem_limit_bytes=VMEM_LIMIT)


# --------------------------------------------------------------------------- #
# Graph / parameter preprocessing (hoisted out of the pallas hot path; cacheable)
# --------------------------------------------------------------------------- #
def build_norm_adj(edge_index, num_nodes, num_nodes_pad):
    """Dense D^-1/2 (A + I) D^-1/2, zero-padded to [num_nodes_pad]^2 (f32)."""
    src = edge_index[0]
    dst = edge_index[1]
    loop = jnp.arange(num_nodes, dtype=edge_index.dtype)
    src = jnp.concatenate([src, loop])
    dst = jnp.concatenate([dst, loop])
    # message flow source -> target:  out[dst] += norm * x[src]  =>  A[dst, src] += 1
    adj = jnp.zeros((num_nodes_pad, num_nodes_pad), jnp.float32).at[dst, src].add(1.0)
    deg = jnp.sum(adj, axis=1)
    d_inv_sqrt = jnp.where(deg > 0, 1.0 / jnp.sqrt(deg), 0.0)
    return d_inv_sqrt[:, None] * adj * d_inv_sqrt[None, :]


def preprocess(x, edge_index, params):
    """One-time: build/pad/cast all operands (do NOT redo this per forward call).

    NOTE: A_hat is streamed in bf16 (passes 1e-1 tolerance vs f32 reference);
    keep it f32 (2x streaming bytes) if tighter accuracy is needed.
    """
    n = x.shape[0]
    n_pad = _round_up(max(n, TM), TM)
    w1, b1, w2, b2 = params

    a_hat = build_norm_adj(edge_index, n, n_pad).astype(jnp.bfloat16)
    x_p = jnp.zeros((n_pad, F_IN_PAD), jnp.bfloat16).at[:n, :F_IN].set(
        x.astype(jnp.bfloat16))
    w1_p = jnp.zeros((F_IN_PAD, HID_PAD), jnp.bfloat16).at[:F_IN, :HIDDEN].set(
        w1.astype(jnp.bfloat16))
    b1_p = jnp.zeros((1, HID_PAD), jnp.float32).at[0, :HIDDEN].set(b1)
    w2_p = jnp.zeros((HID_PAD, OUT_PAD), jnp.bfloat16).at[:HIDDEN, :F_OUT].set(
        w2.astype(jnp.bfloat16))
    b2_p = jnp.zeros((1, OUT_PAD), jnp.float32).at[0, :F_OUT].set(b2)
    return a_hat, x_p, w1_p, b1_p, w2_p, b2_p


# --------------------------------------------------------------------------- #
# Forward pass: three 1-D grid-tiled pallas_calls
# --------------------------------------------------------------------------- #
@jax.jit
def gcn_forward_padded(a_hat, x_p, w1_p, b1_p, w2_p, b2_p):
    n_pad = a_hat.shape[0]
    n_tiles = n_pad // TM

    # --- pass 1: XW1 = X @ W1  (W1 resident, X row slabs streamed once) ------
    xw1 = pl.pallas_call(
        xw1_kernel,
        out_shape=jax.ShapeDtypeStruct((n_pad, HID_PAD), jnp.bfloat16),
        grid_spec=pltpu.PrefetchScalarGridSpec(
            num_scalar_prefetch=0,
            grid=(n_tiles,),
            in_specs=[
                pl.BlockSpec((TM, F_IN_PAD), lambda i: (i, 0)),
                pl.BlockSpec((F_IN_PAD, HID_PAD), lambda i: (0, 0)),
            ],
            out_specs=pl.BlockSpec((TM, HID_PAD), lambda i: (i, 0)),
        ),
        compiler_params=_compiler_params(),
    )(x_p, w1_p)

    # --- pass 2: HW2 = relu(A @ XW1 + b1) @ W2  (XW1 resident, A slabs stream)
    hw2 = pl.pallas_call(
        agg1_kernel,
        out_shape=jax.ShapeDtypeStruct((n_pad, OUT_PAD), jnp.bfloat16),
        grid_spec=pltpu.PrefetchScalarGridSpec(
            num_scalar_prefetch=0,
            grid=(n_tiles,),
            in_specs=[
                pl.BlockSpec((TM, n_pad), lambda i: (i, 0)),
                pl.BlockSpec((n_pad, HID_PAD), lambda i: (0, 0)),
                pl.BlockSpec((1, HID_PAD), lambda i: (0, 0)),
                pl.BlockSpec((HID_PAD, OUT_PAD), lambda i: (0, 0)),
            ],
            out_specs=pl.BlockSpec((TM, OUT_PAD), lambda i: (i, 0)),
        ),
        compiler_params=_compiler_params(),
    )(a_hat, xw1, b1_p, w2_p)

    # --- pass 3: out = log_softmax(A @ HW2 + b2)  (HW2 resident) -------------
    out_pad = pl.pallas_call(
        agg2_kernel,
        out_shape=jax.ShapeDtypeStruct((n_pad, OUT_PAD), jnp.float32),
        grid_spec=pltpu.PrefetchScalarGridSpec(
            num_scalar_prefetch=0,
            grid=(n_tiles,),
            in_specs=[
                pl.BlockSpec((TM, n_pad), lambda i: (i, 0)),
                pl.BlockSpec((n_pad, OUT_PAD), lambda i: (0, 0)),
                pl.BlockSpec((1, OUT_PAD), lambda i: (0, 0)),
            ],
            out_specs=pl.BlockSpec((TM, OUT_PAD), lambda i: (i, 0)),
        ),
        compiler_params=_compiler_params(),
    )(a_hat, hw2, b2_p)

    return out_pad


def gcn_forward(x, edge_index, params):
    n = x.shape[0]
    operands = preprocess(x, edge_index, params)   # cache this in real use
    out_pad = gcn_forward_padded(*operands)
    return out_pad[:n, :F_OUT]


# --------------------------------------------------------------------------- #
# Pure-JAX reference + demo
# --------------------------------------------------------------------------- #
def gcn_reference(x, edge_index, params):
    """Pure-JAX f32 reference (inference-mode dropout)."""
    n = x.shape[0]
    a = build_norm_adj(edge_index, n, n)
    w1, b1, w2, b2 = params
    h = jnp.maximum(a @ (x @ w1) + b1[None, :], 0.0)
    logits = a @ (h @ w2) + b2[None, :]
    return jax.nn.log_softmax(logits, axis=-1)


def init_params(key):
    k1, k2 = jax.random.split(key)
    # Glorot-style deterministic init (matches GCNConv parameter shapes).
    w1 = jax.random.normal(k1, (F_IN, HIDDEN), jnp.float32) * (2.0 / (F_IN + HIDDEN)) ** 0.5
    b1 = jnp.zeros((HIDDEN,), jnp.float32)
    w2 = jax.random.normal(k2, (HIDDEN, F_OUT), jnp.float32) * (2.0 / (HIDDEN + F_OUT)) ** 0.5
    b2 = jnp.zeros((F_OUT,), jnp.float32)
    return (w1, b1, w2, b2)


if __name__ == "__main__":
    key = jax.random.PRNGKey(0)
    k_param, k_x, k_edge = jax.random.split(key, 3)

    N = 200   # number of nodes (small synthetic graph; pads to 256 -> 1 row tile)
    E = 800   # number of directed edges

    params = init_params(k_param)
    x = jax.random.normal(k_x, (N, F_IN), jnp.float32)
    edge_index = jax.random.randint(k_edge, (2, E), 0, N, dtype=jnp.int32)

    out = jax.block_until_ready(gcn_forward(x, edge_index, params))
    ref = jax.block_until_ready(gcn_reference(x, edge_index, params))

    assert out.shape == (N, F_OUT)
    assert bool(jnp.all(jnp.isfinite(out)))
    # rows of log_softmax must exponentiate-sum to 1
    assert jnp.allclose(jnp.sum(jnp.exp(out), axis=-1), 1.0, atol=1e-3)
    # bf16 streaming vs f32 reference
    assert jnp.allclose(out, ref, atol=1e-1), float(jnp.max(jnp.abs(out - ref)))
    print("KERNEL_OK")
</pallas_src>

<mosaic_0001>
module attributes {stable_mosaic.version = 11 : i64} {
  func.func @agg2_kernel(%arg0: i32, %arg1: memref<256x256xbf16, #tpu.memory_space<vmem>>, %arg2: memref<256x128xbf16, #tpu.memory_space<vmem>>, %arg3: memref<1x128xf32, #tpu.memory_space<vmem>>, %arg4: memref<256x128xf32, #tpu.memory_space<vmem>>) attributes {dimension_semantics = [#tpu.dimension_semantics<parallel>], iteration_bounds = array<i64: 1>, scalar_prefetch = 0 : i64, scratch_operands = 0 : i64, tpu.core_type = #tpu.core_type<tc>, window_params = [{transform_indices = @transform_0, window_bounds = array<i64: 256, 256>}, {pipeline_mode = #tpu.pipeline_mode<synchronous>, transform_indices = @transform_1, window_bounds = array<i64: 256, 128>}, {pipeline_mode = #tpu.pipeline_mode<synchronous>, transform_indices = @transform_2, window_bounds = array<i64: 1, 128>}, {transform_indices = @transform_3, window_bounds = array<i64: 256, 128>}]} {
    %c0 = arith.constant 0 : index
    %c0_0 = arith.constant 0 : index
    %0 = vector.load %arg1[%c0, %c0_0] : memref<256x256xbf16, #tpu.memory_space<vmem>>, vector<256x256xbf16>
    %c0_1 = arith.constant 0 : index
    %c0_2 = arith.constant 0 : index
    %1 = vector.load %arg2[%c0_1, %c0_2] : memref<256x128xbf16, #tpu.memory_space<vmem>>, vector<256x128xbf16>
    %cst = arith.constant dense<0.000000e+00> : vector<256x128xf32>
    %2 = tpu.matmul %0, %1, %cst {dimension_numbers = #tpu.dot_dimension_numbers<[1], [0], [0], [1], [0, 0, 1, 1], [], []>} : vector<256x256xbf16>, vector<256x128xbf16>, vector<256x128xf32> -> vector<256x128xf32>
    %c0_3 = arith.constant 0 : index
    %c0_4 = arith.constant 0 : index
    %3 = vector.load %arg3[%c0_3, %c0_4] : memref<1x128xf32, #tpu.memory_space<vmem>>, vector<1x128xf32>
    %4 = vector.broadcast %3 : vector<1x128xf32> to vector<256x128xf32>
    %5 = arith.addf %2, %4 : vector<256x128xf32>
    %6 = tpu.iota {dimensions = array<i32: 1>} : vector<256x128xi32>
    %c7_i32 = arith.constant 7 : i32
    %7 = vector.broadcast %c7_i32 : i32 to vector<256x128xi32>
    %8 = arith.cmpi slt, %6, %7 : vector<256x128xi32>
    %cst_5 = arith.constant -1.000000e+30 : f32
    %9 = vector.broadcast %cst_5 : f32 to vector<256x128xf32>
    %10 = arith.select %8, %5, %9 : vector<256x128xi1>, vector<256x128xf32>
    %cst_6 = arith.constant dense<0xFF800000> : vector<256xf32>
    %11 = vector.multi_reduction <maximumf>, %10, %cst_6 [1] : vector<256x128xf32> to vector<256xf32>
    %12 = vector.shape_cast %11 : vector<256xf32> to vector<256x1xf32>
    %13 = vector.broadcast %12 : vector<256x1xf32> to vector<256x128xf32>
    %14 = arith.subf %10, %13 : vector<256x128xf32>
    %15 = math.exp %14 : vector<256x128xf32>
    %cst_7 = arith.constant dense<0.000000e+00> : vector<256xf32>
    %16 = vector.multi_reduction <add>, %15, %cst_7 [1] : vector<256x128xf32> to vector<256xf32>
    %17 = vector.shape_cast %16 : vector<256xf32> to vector<256x1xf32>
    %18 = math.log %17 : vector<256x1xf32>
    %19 = vector.broadcast %18 : vector<256x1xf32> to vector<256x128xf32>
    %20 = arith.subf %14, %19 : vector<256x128xf32>
    %c0_8 = arith.constant 0 : index
    %c0_9 = arith.constant 0 : index
    %21 = vector.load %arg4[%c0_8, %c0_9] : memref<256x128xf32, #tpu.memory_space<vmem>>, vector<256x128xf32>
    tpu.vector_store %arg4[%c0_8, %c0_9], %20 {strides = array<i32>} : memref<256x128xf32, #tpu.memory_space<vmem>>, vector<256x128xf32>,
    return
  }
  func.func @transform_0(%arg0: i32) -> (i32, i32) {
    %c0_i32 = arith.constant 0 : i32
    %c0_i32_0 = arith.constant 0 : i32
    return %arg0, %c0_i32 : i32, i32
  }
  func.func @transform_1(%arg0: i32) -> (i32, i32) {
    %c0_i32 = arith.constant 0 : i32
    %c0_i32_0 = arith.constant 0 : i32
    %c0_i32_1 = arith.constant 0 : i32
    return %c0_i32, %c0_i32_0 : i32, i32
  }
  func.func @transform_2(%arg0: i32) -> (i32, i32) {
    %c0_i32 = arith.constant 0 : i32
    %c0_i32_0 = arith.constant 0 : i32
    %c0_i32_1 = arith.constant 0 : i32
    return %c0_i32, %c0_i32_0 : i32, i32
  }
  func.func @transform_3(%arg0: i32) -> (i32, i32) {
    %c0_i32 = arith.constant 0 : i32
    %c0_i32_0 = arith.constant 0 : i32
    return %arg0, %c0_i32 : i32, i32
  }
}

module attributes {stable_mosaic.version = 11 : i64} {
  func.func @xw1_kernel(%arg0: i32, %arg1: memref<256x1536xbf16, #tpu.memory_space<vmem>>, %arg2: memref<1536x128xbf16, #tpu.memory_space<vmem>>, %arg3: memref<256x128xbf16, #tpu.memory_space<vmem>>) attributes {dimension_semantics = [#tpu.dimension_semantics<parallel>], iteration_bounds = array<i64: 1>, scalar_prefetch = 0 : i64, scratch_operands = 0 : i64, tpu.core_type = #tpu.core_type<tc>, window_params = [{transform_indices = @transform_0, window_bounds = array<i64: 256, 1536>}, {pipeline_mode = #tpu.pipeline_mode<synchronous>, transform_indices = @transform_1, window_bounds = array<i64: 1536, 128>}, {transform_indices = @transform_2, window_bounds = array<i64: 256, 128>}]} {
    %c0 = arith.constant 0 : index
    %c0_0 = arith.constant 0 : index
    %0 = vector.load %arg1[%c0, %c0_0] : memref<256x1536xbf16, #tpu.memory_space<vmem>>, vector<256x1536xbf16>
    %c0_1 = arith.constant 0 : index
    %c0_2 = arith.constant 0 : index
    %1 = vector.load %arg2[%c0_1, %c0_2] : memref<1536x128xbf16, #tpu.memory_space<vmem>>, vector<1536x128xbf16>
    %cst = arith.constant dense<0.000000e+00> : vector<256x128xf32>
    %2 = tpu.matmul %0, %1, %cst {dimension_numbers = #tpu.dot_dimension_numbers<[1], [0], [0], [1], [0, 0, 1, 1], [], []>} : vector<256x1536xbf16>, vector<1536x128xbf16>, vector<256x128xf32> -> vector<256x128xf32>
    %3 = arith.truncf %2 : vector<256x128xf32> to vector<256x128xbf16>
    %c0_3 = arith.constant 0 : index
    %c0_4 = arith.constant 0 : index
    %4 = vector.load %arg3[%c0_3, %c0_4] : memref<256x128xbf16, #tpu.memory_space<vmem>>, vector<256x128xbf16>
    tpu.vector_store %arg3[%c0_3, %c0_4], %3 {strides = array<i32>} : memref<256x128xbf16, #tpu.memory_space<vmem>>, vector<256x128xbf16>,
    return
  }
  func.func @transform_0(%arg0: i32) -> (i32, i32) {
    %c0_i32 = arith.constant 0 : i32
    %c0_i32_0 = arith.constant 0 : i32
    return %arg0, %c0_i32 : i32, i32
  }
  func.func @transform_1(%arg0: i32) -> (i32, i32) {
    %c0_i32 = arith.constant 0 : i32
    %c0_i32_0 = arith.constant 0 : i32
    %c0_i32_1 = arith.constant 0 : i32
    return %c0_i32, %c0_i32_0 : i32, i32
  }
  func.func @transform_2(%arg0: i32) -> (i32, i32) {
    %c0_i32 = arith.constant 0 : i32
    %c0_i32_0 = arith.constant 0 : i32
    return %arg0, %c0_i32 : i32, i32
  }
}

module attributes {stable_mosaic.version = 11 : i64} {
  func.func @agg1_kernel(%arg0: i32, %arg1: memref<256x256xbf16, #tpu.memory_space<vmem>>, %arg2: memref<256x128xbf16, #tpu.memory_space<vmem>>, %arg3: memref<1x128xf32, #tpu.memory_space<vmem>>, %arg4: memref<128x128xbf16, #tpu.memory_space<vmem>>, %arg5: memref<256x128xbf16, #tpu.memory_space<vmem>>) attributes {dimension_semantics = [#tpu.dimension_semantics<parallel>], iteration_bounds = array<i64: 1>, scalar_prefetch = 0 : i64, scratch_operands = 0 : i64, tpu.core_type = #tpu.core_type<tc>, window_params = [{transform_indices = @transform_0, window_bounds = array<i64: 256, 256>}, {pipeline_mode = #tpu.pipeline_mode<synchronous>, transform_indices = @transform_1, window_bounds = array<i64: 256, 128>}, {pipeline_mode = #tpu.pipeline_mode<synchronous>, transform_indices = @transform_2, window_bounds = array<i64: 1, 128>}, {pipeline_mode = #tpu.pipeline_mode<synchronous>, transform_indices = @transform_3, window_bounds = array<i64: 128, 128>}, {transform_indices = @transform_4, window_bounds = array<i64: 256, 128>}]} {
    %c0 = arith.constant 0 : index
    %c0_0 = arith.constant 0 : index
    %0 = vector.load %arg1[%c0, %c0_0] : memref<256x256xbf16, #tpu.memory_space<vmem>>, vector<256x256xbf16>
    %c0_1 = arith.constant 0 : index
    %c0_2 = arith.constant 0 : index
    %1 = vector.load %arg2[%c0_1, %c0_2] : memref<256x128xbf16, #tpu.memory_space<vmem>>, vector<256x128xbf16>
    %cst = arith.constant dense<0.000000e+00> : vector<256x128xf32>
    %2 = tpu.matmul %0, %1, %cst {dimension_numbers = #tpu.dot_dimension_numbers<[1], [0], [0], [1], [0, 0, 1, 1], [], []>} : vector<256x256xbf16>, vector<256x128xbf16>, vector<256x128xf32> -> vector<256x128xf32>
    %c0_3 = arith.constant 0 : index
    %c0_4 = arith.constant 0 : index
    %3 = vector.load %arg3[%c0_3, %c0_4] : memref<1x128xf32, #tpu.memory_space<vmem>>, vector<1x128xf32>
    %4 = vector.broadcast %3 : vector<1x128xf32> to vector<256x128xf32>
    %5 = arith.addf %2, %4 : vector<256x128xf32>
    %cst_5 = arith.constant 0.000000e+00 : f32
    %6 = vector.broadcast %cst_5 : f32 to vector<256x128xf32>
    %7 = arith.maximumf %5, %6 : vector<256x128xf32>
    %8 = arith.truncf %7 : vector<256x128xf32> to vector<256x128xbf16>
    %c0_6 = arith.constant 0 : index
    %c0_7 = arith.constant 0 : index
    %9 = vector.load %arg4[%c0_6, %c0_7] : memref<128x128xbf16, #tpu.memory_space<vmem>>, vector<128x128xbf16>
    %cst_8 = arith.constant dense<0.000000e+00> : vector<256x128xf32>
    %10 = tpu.matmul %8, %9, %cst_8 {dimension_numbers = #tpu.dot_dimension_numbers<[1], [0], [0], [1], [0, 0, 1, 1], [], []>} : vector<256x128xbf16>, vector<128x128xbf16>, vector<256x128xf32> -> vector<256x128xf32>
    %11 = arith.truncf %10 : vector<256x128xf32> to vector<256x128xbf16>
    %c0_9 = arith.constant 0 : index
    %c0_10 = arith.constant 0 : index
    %12 = vector.load %arg5[%c0_9, %c0_10] : memref<256x128xbf16, #tpu.memory_space<vmem>>, vector<256x128xbf16>
    tpu.vector_store %arg5[%c0_9, %c0_10], %11 {strides = array<i32>} : memref<256x128xbf16, #tpu.memory_space<vmem>>, vector<256x128xbf16>,
    return
  }
  func.func @transform_0(%arg0: i32) -> (i32, i32) {
    %c0_i32 = arith.constant 0 : i32
    %c0_i32_0 = arith.constant 0 : i32
    return %arg0, %c0_i32 : i32, i32
  }
  func.func @transform_1(%arg0: i32) -> (i32, i32) {
    %c0_i32 = arith.constant 0 : i32
    %c0_i32_0 = arith.constant 0 : i32
    %c0_i32_1 = arith.constant 0 : i32
    return %c0_i32, %c0_i32_0 : i32, i32
  }
  func.func @transform_2(%arg0: i32) -> (i32, i32) {
    %c0_i32 = arith.constant 0 : i32
    %c0_i32_0 = arith.constant 0 : i32
    %c0_i32_1 = arith.constant 0 : i32
    return %c0_i32, %c0_i32_0 : i32, i32
  }
  func.func @transform_3(%arg0: i32) -> (i32, i32) {
    %c0_i32 = arith.constant 0 : i32
    %c0_i32_0 = arith.constant 0 : i32
    %c0_i32_1 = arith.constant 0 : i32
    return %c0_i32, %c0_i32_0 : i32, i32
  }
  func.func @transform_4(%arg0: i32) -> (i32, i32) {
    %c0_i32 = arith.constant 0 : i32
    %c0_i32_0 = arith.constant 0 : i32
    return %arg0, %c0_i32 : i32, i32
  }
}

</mosaic_0001>

<bundles_post_ra>
// kernel: gcn_forward_padded.4
= control target key start
LH: loop header
LB: loop body
LE: loop exit
PB: predicated region body
PF: predicated region fallthrough
CT: control target
= control target key end

     0   :  { %s1721_s1 = inlined_call_operand.vmem [shape: bf16[256,128], index: 1, kind: input, shape index: {}]   ;;  %s1722_s0 = inlined_call_operand.vmem [shape: bf16[256,256], index: 0, kind: input, shape index: {}]   ;;  %s1723_s3 = inlined_call_operand.vmem [shape: bf16[128,128], index: 3, kind: input, shape index: {}]   ;;  %s1724_s2 = inlined_call_operand.vmem [shape: f32[1,128], index: 2, kind: input, shape index: {}]   ;;  %s1725_s4 = inlined_call_operand.vmem [shape: bf16[256,128], index: 4, kind: output, shape index: {}]  }
   0x1   :  { %v1359_v0 = vld [vmem:[%s1721_s1 + $0x40] sm:$0xff]   ;;  %v1361_v2 = vld [vmem:[%s1721_s1 + $0x48] sm:$0xff]   ;;  %v1363_v4 = vld [vmem:[%s1721_s1 + $0x50] sm:$0xff]  }
   0x2   :  { %v1360_v1 = vld [vmem:[%s1721_s1] sm:$0xff]   ;;  %1159 = vmatprep.subr.bf16.mxu0 %v1359_v0  ;;  %1343 = vmatprep.subr.bf16.mxu1 %v1359_v0  ;;  %v1362_v3 = vld [vmem:[%s1721_s1 + $0x8] sm:$0xff]   ;;  %v1364_v5 = vld [vmem:[%s1721_s1 + $0x10] sm:$0xff]  }
   0x3   :  { %1160 = vmatpush3.bf16.msra.mxu0 %v1360_v1  ;;  %1351 = vmatpush3.bf16.msra.mxu1 %v1360_v1  ;;  %v1365_v6 = vld [vmem:[%s1721_s1 + $0x58] sm:$0xff]   ;;  %v1367_v8 = vld [vmem:[%s1721_s1 + $0x60] sm:$0xff]   ;;  %v1369_v10 = vld [vmem:[%s1721_s1 + $0x68] sm:$0xff]  }
   0x4   :  { %1161 = vmatprep.subr.bf16.mxu0 %v1361_v2  ;;  %1344 = vmatprep.subr.bf16.mxu1 %v1361_v2  ;;  %v1366_v7 = vld [vmem:[%s1721_s1 + $0x18] sm:$0xff]   ;;  %v1368_v9 = vld [vmem:[%s1721_s1 + $0x20] sm:$0xff]   ;;  %v1370_v12 = vld [vmem:[%s1721_s1 + $0x28] sm:$0xff]  }
   0x5   :  { %v1377_v11 = vld [vmem:[%s1722_s0 + $0x4] ss:$8 sps:$4 sm:$0xff]   ;;  %v1371_v13 = vld [vmem:[%s1721_s1 + $0x70] sm:$0xff]   ;;  %v1373_v15 = vld [vmem:[%s1721_s1 + $0x78] sm:$0xff]  }
   0x6   :  { %377 = vmatprep.mubr.bf16.mxu0 %v1377_v11  ;;  %v1372_v14 = vld [vmem:[%s1721_s1 + $0x30] sm:$0xff]   ;;  %v1374_v16 = vld [vmem:[%s1721_s1 + $0x38] sm:$0xff]   ;;  %v1375_v17 = vld [vmem:[%s1722_s0] ss:$8 sps:$4 sm:$0xff]  }
   0x7   :  { %1162 = vmatpush3.bf16.msra.mxu0 %v1362_v3  ;;  %1352 = vmatpush3.bf16.msra.mxu1 %v1362_v3  ;;  %v1407_v18 = vld [vmem:[%s1722_s0 + $0xc4] ss:$8 sps:$4 sm:$0xff]   ;;  %v1378_v19 = vld [vmem:[%s1722_s0 + $0x14] ss:$8 sps:$4 sm:$0xff]   ;;  %v1405_v20 = vld [vmem:[%s1722_s0 + $0xc0] ss:$8 sps:$4 sm:$0xff]  }
   0x8   :  { %1163 = vmatprep.subr.bf16.mxu0 %v1363_v4  ;;  %1345 = vmatprep.subr.bf16.mxu1 %v1363_v4  ;;  %v1411_v21 = vld [vmem:[%s1722_s0 + $0xd4] ss:$8 sps:$4 sm:$0xff]   ;;  %v1380_v22 = vld [vmem:[%s1722_s0 + $0x10] ss:$8 sps:$4 sm:$0xff]   ;;  %v1381_v23 = vld [vmem:[%s1722_s0 + $0x24] ss:$8 sps:$4 sm:$0xff]  }
   0x9   :  { %473 = vmatprep.mubr.bf16.mxu1 %v1407_v18  ;;  %v1413_v24 = vld [vmem:[%s1722_s0 + $0xd0] ss:$8 sps:$4 sm:$0xff]   ;;  %v1417_v25 = vld [vmem:[%s1722_s0 + $0xe4] ss:$8 sps:$4 sm:$0xff]   ;;  %v1383_v29 = vld [vmem:[%s1722_s0 + $0x20] ss:$8 sps:$4 sm:$0xff]  }
   0xa   :  { %v1423_v26 = vld [vmem:[%s1723_s3] sm:$0xff]   ;;  %v1424_v27 = vld [vmem:[%s1723_s3 + $0x8] sm:$0xff]   ;;  %v1425_v28 = vld [vmem:[%s1723_s3 + $0x10] sm:$0xff]  }
   0xb   :  { %1164 = vmatpush3.bf16.msra.mxu0 %v1364_v5  ;;  %1353 = vmatpush3.bf16.msra.mxu1 %v1364_v5  ;;  %v1384_v30 = vld [vmem:[%s1722_s0 + $0x34] ss:$8 sps:$4 sm:$0xff]   ;;  %v1419_v31 = vld [vmem:[%s1722_s0 + $0xe0] ss:$8 sps:$4 sm:$0xff]   ;;  %v1386_v33 = vld [vmem:[%s1722_s0 + $0x30] ss:$8 sps:$4 sm:$0xff]  }
   0xc   :  { %1165 = vmatprep.subr.bf16.mxu0 %v1365_v6  ;;  %1346 = vmatprep.subr.bf16.mxu1 %v1365_v6  ;;  %v1420_v32 = vld [vmem:[%s1722_s0 + $0xf4] ss:$8 sps:$4 sm:$0xff]   ;;  %v1387_v34 = vld [vmem:[%s1722_s0 + $0x44] ss:$8 sps:$4 sm:$0xff]   ;;  %v1422_v35 = vld [vmem:[%s1722_s0 + $0xf0] ss:$8 sps:$4 sm:$0xff]  }
   0xd   :  { %v1389_v36 = vld [vmem:[%s1722_s0 + $0x40] ss:$8 sps:$4 sm:$0xff]   ;;  %v1390_v37 = vld [vmem:[%s1722_s0 + $0x54] ss:$8 sps:$4 sm:$0xff]   ;;  %v1392_v38 = vld [vmem:[%s1722_s0 + $0x50] ss:$8 sps:$4 sm:$0xff]  }
   0xe   :  { %v1393_v39 = vld [vmem:[%s1722_s0 + $0x64] ss:$8 sps:$4 sm:$0xff]   ;;  %v1395_v40 = vld [vmem:[%s1722_s0 + $0x60] ss:$8 sps:$4 sm:$0xff]   ;;  %v1396_v41 = vld [vmem:[%s1722_s0 + $0x74] ss:$8 sps:$4 sm:$0xff]  }
   0xf   :  { %1166 = vmatpush3.bf16.msra.mxu0 %v1366_v7  ;;  %1354 = vmatpush3.bf16.msra.mxu1 %v1366_v7  ;;  %v1398_v42 = vld [vmem:[%s1722_s0 + $0x70] ss:$8 sps:$4 sm:$0xff]   ;;  %v1399_v43 = vld [vmem:[%s1722_s0 + $0x84] ss:$8 sps:$4 sm:$0xff]   ;;  %v1401_v44 = vld [vmem:[%s1722_s0 + $0x80] ss:$8 sps:$4 sm:$0xff]  }
  0x10   :  { %1167 = vmatprep.subr.bf16.mxu0 %v1367_v8  ;;  %1347 = vmatprep.subr.bf16.mxu1 %v1367_v8  ;;  %v1402_v45 = vld [vmem:[%s1722_s0 + $0x94] ss:$8 sps:$4 sm:$0xff]   ;;  %v1404_v46 = vld [vmem:[%s1722_s0 + $0x90] ss:$8 sps:$4 sm:$0xff]   ;;  %v1408_v47 = vld [vmem:[%s1722_s0 + $0xa4] ss:$8 sps:$4 sm:$0xff]  }
  0x11   :  { %v1410_v48 = vld [vmem:[%s1722_s0 + $0xa0] ss:$8 sps:$4 sm:$0xff]   ;;  %v1414_v49 = vld [vmem:[%s1722_s0 + $0xb4] ss:$8 sps:$4 sm:$0xff]   ;;  %v1416_v51 = vld [vmem:[%s1722_s0 + $0xb0] ss:$8 sps:$4 sm:$0xff]  }
  0x12   :  { %v1426_v50 = vld [vmem:[%s1723_s3 + $0x18] sm:$0xff]   ;;  %v1427_v52 = vld [vmem:[%s1723_s3 + $0x20] sm:$0xff]   ;;  %v1428_v53 = vld [vmem:[%s1723_s3 + $0x28] sm:$0xff]  }
  0x13   :  { %1168 = vmatpush3.bf16.msra.mxu0 %v1368_v9  ;;  %1355 = vmatpush3.bf16.msra.mxu1 %v1368_v9  ;;  %v1429_v54 = vld [vmem:[%s1723_s3 + $0x30] sm:$0xff]   ;;  %v1430_v55 = vld [vmem:[%s1723_s3 + $0x38] sm:$0xff]   ;;  %v1627_v57 = vld [vmem:[%s1724_s2] ss:$0 sm:$0xff] }
  0x14   :  { %1169 = vmatprep.subr.bf16.mxu0 %v1369_v10  ;;  %1348 = vmatprep.subr.bf16.mxu1 %v1369_v10 }
  0x17   :  { %1170 = vmatpush3.bf16.msra.mxu0 %v1370_v12  ;;  %1356 = vmatpush3.bf16.msra.mxu1 %v1370_v12 }
  0x18   :  { %1171 = vmatprep.subr.bf16.mxu0 %v1371_v13  ;;  %1349 = vmatprep.subr.bf16.mxu1 %v1371_v13 }
  0x1b   :  { %1172 = vmatpush3.bf16.msra.mxu0 %v1372_v14  ;;  %1357 = vmatpush3.bf16.msra.mxu1 %v1372_v14 }
  0x1c   :  { %1173 = vmatprep.subr.bf16.mxu0 %v1373_v15  ;;  %1350 = vmatprep.subr.bf16.mxu1 %v1373_v15 }
  0x1f   :  { %1174 = vmatpush3.bf16.msra.mxu0 %v1374_v16  ;;  %1358 = vmatpush3.bf16.msra.mxu1 %v1374_v16 }
  0x20   :  { %1295 = vmatprep.subr.bf16.mxu1 %v1423_v26 }
  0x22   :  { %378 = vmatmul.mubr.bf16.vlgmr.msra.gmra.mrb[0].mxu0 %v1375_v17  ;;  %474 = vmatmul.mubr.bf16.vlgmr.msra.gmra.mrb[0].mxu1 %v1405_v20 }
  0x23   :  { %385 = vmatprep.mubr.bf16.mxu0 %v1378_v19  ;;  %481 = vmatprep.mubr.bf16.mxu1 %v1411_v21 }
  0x24   :  { %1296 = vmatpush3.bf16.msra.mxu1 %v1423_v26 }
  0x25   :  { %1297 = vmatprep.subr.bf16.mxu1 %v1424_v27 }
  0x28   :  { %1298 = vmatpush3.bf16.msra.mxu1 %v1424_v27 }
  0x29   :  { %1299 = vmatprep.subr.bf16.mxu1 %v1425_v28 }
  0x2a   :  { %386 = vmatmul.mubr.bf16.gmra.mrb[4].mxu0 %v1380_v22  ;;  %482 = vmatmul.mubr.bf16.gmra.mrb[4].mxu1 %v1413_v24 }
  0x2b   :  { %393 = vmatprep.mubr.bf16.mxu0 %v1381_v23  ;;  %489 = vmatprep.mubr.bf16.mxu1 %v1417_v25 }
  0x2c   :  { %1300 = vmatpush3.bf16.msra.mxu1 %v1425_v28 }
  0x2d   :  { %1301 = vmatprep.subr.bf16.mxu1 %v1426_v50 }
  0x30   :  { %1302 = vmatpush3.bf16.msra.mxu1 %v1426_v50 }
  0x31   :  { %1303 = vmatprep.subr.bf16.mxu1 %v1427_v52 }
  0x32   :  { %394 = vmatmul.mubr.bf16.gmra.mrb[8].mxu0 %v1383_v29  ;;  %490 = vmatmul.mubr.bf16.gmra.mrb[8].mxu1 %v1419_v31 }
  0x33   :  { %401 = vmatprep.mubr.bf16.mxu0 %v1384_v30  ;;  %497 = vmatprep.mubr.bf16.mxu1 %v1420_v32 }
  0x34   :  { %1304 = vmatpush3.bf16.msra.mxu1 %v1427_v52 }
  0x35   :  { %1305 = vmatprep.subr.bf16.mxu1 %v1428_v53 }
  0x38   :  { %1306 = vmatpush3.bf16.msra.mxu1 %v1428_v53 }
  0x39   :  { %1307 = vmatprep.subr.bf16.mxu1 %v1429_v54 }
  0x3a   :  { %402 = vmatmul.mubr.bf16.gmra.mrb[12].mxu0 %v1386_v33  ;;  %498 = vmatmul.mubr.bf16.gmra.mrb[12].mxu1 %v1422_v35 }
  0x3b   :  { %409 = vmatprep.mubr.bf16.mxu0 %v1387_v34 }
  0x3c   :  { %1308 = vmatpush3.bf16.msra.mxu1 %v1429_v54 }
  0x3d   :  { %1309 = vmatprep.subr.bf16.mxu1 %v1430_v55 }
  0x40   :  { %1310 = vmatpush3.bf16.msra.mxu1 %v1430_v55 }
  0x42   :  { %410 = vmatmul.mubr.bf16.gmra.mrb[16].mxu0 %v1389_v36 }
  0x43   :  { %417 = vmatprep.mubr.bf16.mxu0 %v1390_v37 }
  0x4a   :  { %418 = vmatmul.mubr.bf16.gmra.mrb[20].mxu0 %v1392_v38 }
  0x4b   :  { %425 = vmatprep.mubr.bf16.mxu0 %v1393_v39 }
  0x52   :  { %426 = vmatmul.mubr.bf16.gmra.mrb[24].mxu0 %v1395_v40 }
  0x53   :  { %433 = vmatprep.mubr.bf16.mxu0 %v1396_v41 }
  0x5a   :  { %434 = vmatmul.mubr.bf16.gmra.mrb[28].mxu0 %v1398_v42 }
  0x5b   :  { %441 = vmatprep.mubr.bf16.mxu0 %v1399_v43 }
  0x62   :  { %442 = vmatmul.mubr.bf16.gmra.mrb[32].mxu0 %v1401_v44 }
  0x63   :  { %449 = vmatprep.mubr.bf16.mxu0 %v1402_v45 }
  0x6a   :  { %450 = vmatmul.mubr.bf16.gmra.mrb[36].mxu0 %v1404_v46 }
  0x6b   :  { %457 = vmatprep.mubr.bf16.mxu0 %v1408_v47 }
  0x72   :  { %458 = vmatmul.mubr.bf16.gmra.mrb[40].mxu0 %v1410_v48 }
  0x73   :  { %465 = vmatprep.mubr.bf16.mxu0 %v1414_v49 }
  0x7a   :  { %466 = vmatmul.mubr.bf16.gmra.mrb[44].mxu0 %v1416_v51 }
  0xf5   :  { %v1175_v56 = vpop.f32.mrb[0].mxu0  ;;  %v1247_v59 = vpop.f32.mrb[0].mxu1 }
  0xf6   :  { %v1176_v58 = vpop.f32.mrb[1].mxu0  ;;  %v1248_v62 = vpop.f32.mrb[1].mxu1 }
  0xf7   :  { %v1177_v60 = vadd.f32 %v1176_v58, %v1175_v56  ;;  %v1178_v61 = vpop.f32.mrb[2].mxu0  ;;  %v1249_v0 = vadd.f32 %v1248_v62, %v1247_v59  ;;  %v1250_v1 = vpop.f32.mrb[2].mxu1 }
  0xf8   :  { %v1179_v63 = vpop.f32.mrb[3].mxu0  ;;  %v1251_v4 = vpop.f32.mrb[3].mxu1 }
  0xf9   :  { %v380_v2 = vadd.f32 %v1177_v60, %v1627_v57  ;;  %v1180_v3 = vadd.f32 %v1179_v63, %v1178_v61  ;;  %v476_v5 = vadd.f32 %v1249_v0, %v1627_v57  ;;  %v1252_v6 = vadd.f32 %v1251_v4, %v1250_v1 }
  0xfb   :  { %v383_v7 = vadd.f32 %v1180_v3, %v1627_v57  ;;  %v530_v8 = vmax.f32 %v476_v5, 0.0  ;;  %v479_v9 = vadd.f32 %v1252_v6, %v1627_v57  ;;  %v506_v10 = vmax.f32 %v380_v2, 0.0 }
  0xfd   :  { %v507_v11 = vmax.f32 %v383_v7, 0.0  ;;  %v1181_v12 = vpop.f32.mrb[4].mxu0  ;;  %v531_v14 = vmax.f32 %v479_v9, 0.0  ;;  %v1253_v15 = vpop.f32.mrb[4].mxu1 }
  0xfe   :  { %v1182_v13 = vpop.f32.mrb[5].mxu0  ;;  %v1254_v19 = vpop.f32.mrb[5].mxu1 }
  0xff   :  { %v1183_v16 = vadd.f32 %v1182_v13, %v1181_v12  ;;  %v1184_v17 = vpop.f32.mrb[6].mxu0  ;;  %v538_v18 = vpack.c.bf16 %v507_v11, %v506_v10  ;;  %v1255_v21 = vadd.f32 %v1254_v19, %v1253_v15  ;;  %v1256_v22 = vpop.f32.mrb[6].mxu1  ;;  %v1633_v23 = vpack.c.bf16 %v531_v14, %v530_v8 }
 0x100   :  { %v1185_v20 = vpop.f32.mrb[7].mxu0  ;;  %v1257_v26 = vpop.f32.mrb[7].mxu1 }
 0x101   :  { %v388_v24 = vadd.f32 %v1183_v16, %v1627_v57  ;;  %v1186_v25 = vadd.f32 %v1185_v20, %v1184_v17  ;;  %1311 = vmatprep.mubr.bf16.mxu1 %v538_v18  ;;  %v484_v27 = vadd.f32 %v1255_v21, %v1627_v57  ;;  %v1258_v28 = vadd.f32 %v1257_v26, %v1256_v22 }
 0x103   :  { %v391_v29 = vadd.f32 %v1186_v25, %v1627_v57  ;;  %v532_v30 = vmax.f32 %v484_v27, 0.0  ;;  %v487_v31 = vadd.f32 %v1258_v28, %v1627_v57  ;;  %v508_v32 = vmax.f32 %v388_v24, 0.0 }
 0x105   :  { %v509_v33 = vmax.f32 %v391_v29, 0.0  ;;  %v1187_v34 = vpop.f32.mrb[8].mxu0  ;;  %v533_v36 = vmax.f32 %v487_v31, 0.0  ;;  %v1259_v37 = vpop.f32.mrb[8].mxu1 }
 0x106   :  { %v1188_v35 = vpop.f32.mrb[9].mxu0  ;;  %v1260_v41 = vpop.f32.mrb[9].mxu1 }
 0x107   :  { %v539_v38 = vpack.c.bf16 %v509_v33, %v508_v32  ;;  %v1189_v39 = vadd.f32 %v1188_v35, %v1187_v34  ;;  %v1190_v40 = vpop.f32.mrb[10].mxu0  ;;  %v1261_v43 = vadd.f32 %v1260_v41, %v1259_v37  ;;  %v1262_v44 = vpop.f32.mrb[10].mxu1  ;;  %v1639_v45 = vpack.c.bf16 %v533_v36, %v532_v30 }
 0x108   :  { %v1191_v42 = vpop.f32.mrb[11].mxu0  ;;  %v1263_v48 = vpop.f32.mrb[11].mxu1 }
 0x109   :  { %v396_v46 = vadd.f32 %v1189_v39, %v1627_v57  ;;  %v1192_v47 = vadd.f32 %v1191_v42, %v1190_v40  ;;  %1312 = vmatmul.mubr.bf16.vlgmr.msra.gmra.mrb[16].mxu1 %v539_v38  ;;  %v492_v49 = vadd.f32 %v1261_v43, %v1627_v57  ;;  %v1264_v50 = vadd.f32 %v1263_v48, %v1262_v44 }
 0x10b   :  { %v399_v51 = vadd.f32 %v1192_v47, %v1627_v57  ;;  %v534_v52 = vmax.f32 %v492_v49, 0.0  ;;  %v495_v53 = vadd.f32 %v1264_v50, %v1627_v57  ;;  %v510_v54 = vmax.f32 %v396_v46, 0.0 }
 0x10d   :  { %v511_v55 = vmax.f32 %v399_v51, 0.0  ;;  %v1193_v56 = vpop.f32.mrb[12].mxu0  ;;  %v535_v59 = vmax.f32 %v495_v53, 0.0  ;;  %v1265_v60 = vpop.f32.mrb[12].mxu1 }
 0x10e   :  { %v1194_v58 = vpop.f32.mrb[13].mxu0  ;;  %v1266_v0 = vpop.f32.mrb[13].mxu1 }
 0x10f   :  { %v1195_v61 = vadd.f32 %v1194_v58, %v1193_v56  ;;  %v1196_v62 = vpop.f32.mrb[14].mxu0  ;;  %v540_v63 = vpack.c.bf16 %v511_v55, %v510_v54  ;;  %v1267_v2 = vadd.f32 %v1266_v0, %v1265_v60  ;;  %v1268_v3 = vpop.f32.mrb[14].mxu1  ;;  %v1645_v4 = vpack.c.bf16 %v535_v59, %v534_v52 }
 0x110   :  { %v1197_v1 = vpop.f32.mrb[15].mxu0  ;;  %v1269_v7 = vpop.f32.mrb[15].mxu1 }
 0x111   :  { %v404_v5 = vadd.f32 %v1195_v61, %v1627_v57  ;;  %v1198_v6 = vadd.f32 %v1197_v1, %v1196_v62  ;;  %1315 = vmatprep.mubr.bf16.mxu1 %v540_v63  ;;  %v500_v8 = vadd.f32 %v1267_v2, %v1627_v57  ;;  %v1270_v9 = vadd.f32 %v1269_v7, %v1268_v3 }
 0x113   :  { %v407_v10 = vadd.f32 %v1198_v6, %v1627_v57  ;;  %v536_v11 = vmax.f32 %v500_v8, 0.0  ;;  %v503_v12 = vadd.f32 %v1270_v9, %v1627_v57  ;;  %v512_v13 = vmax.f32 %v404_v5, 0.0 }
 0x115   :  { %v513_v14 = vmax.f32 %v407_v10, 0.0  ;;  %v1199_v15 = vpop.f32.mrb[16].mxu0  ;;  %v537_v17 = vmax.f32 %v503_v12, 0.0 }
 0x116   :  { %v1200_v16 = vpop.f32.mrb[17].mxu0 }
 0x117   :  { %v1201_v18 = vadd.f32 %v1200_v16, %v1199_v15  ;;  %v1202_v19 = vpop.f32.mrb[18].mxu0  ;;  %v541_v20 = vpack.c.bf16 %v513_v14, %v512_v13  ;;  %v1651_v22 = vpack.c.bf16 %v537_v17, %v536_v11 }
 0x118   :  { %v1203_v21 = vpop.f32.mrb[19].mxu0 }
 0x119   :  { %v412_v24 = vadd.f32 %v1201_v18, %v1627_v57  ;;  %v1204_v25 = vadd.f32 %v1203_v21, %v1202_v19  ;;  %1316 = vmatmul.mubr.bf16.gmra.mrb[20].mxu1 %v541_v20 }
 0x11b   :  { %v415_v26 = vadd.f32 %v1204_v25, %v1627_v57  ;;  %v514_v27 = vmax.f32 %v412_v24, 0.0 }
 0x11d   :  { %v515_v28 = vmax.f32 %v415_v26, 0.0  ;;  %v1205_v29 = vpop.f32.mrb[20].mxu0 }
 0x11e   :  { %v1206_v30 = vpop.f32.mrb[21].mxu0 }
 0x11f   :  { %v1207_v31 = vadd.f32 %v1206_v30, %v1205_v29  ;;  %v1208_v32 = vpop.f32.mrb[22].mxu0  ;;  %v542_v33 = vpack.c.bf16 %v515_v28, %v514_v27 }
 0x120   :  { %v1209_v34 = vpop.f32.mrb[23].mxu0 }
 0x121   :  { %v420_v35 = vadd.f32 %v1207_v31, %v1627_v57  ;;  %v1210_v36 = vadd.f32 %v1209_v34, %v1208_v32  ;;  %1319 = vmatprep.mubr.bf16.mxu1 %v542_v33 }
 0x123   :  { %v423_v37 = vadd.f32 %v1210_v36, %v1627_v57  ;;  %v516_v38 = vmax.f32 %v420_v35, 0.0 }
 0x125   :  { %v517_v39 = vmax.f32 %v423_v37, 0.0  ;;  %v1211_v40 = vpop.f32.mrb[24].mxu0 }
 0x126   :  { %v1212_v41 = vpop.f32.mrb[25].mxu0 }
 0x127   :  { %v1213_v42 = vadd.f32 %v1212_v41, %v1211_v40  ;;  %v1214_v43 = vpop.f32.mrb[26].mxu0  ;;  %v543_v44 = vpack.c.bf16 %v517_v39, %v516_v38 }
 0x128   :  { %v1215_v46 = vpop.f32.mrb[27].mxu0 }
 0x129   :  { %v428_v47 = vadd.f32 %v1213_v42, %v1627_v57  ;;  %v1216_v48 = vadd.f32 %v1215_v46, %v1214_v43  ;;  %1320 = vmatmul.mubr.bf16.gmra.mrb[24].mxu1 %v543_v44 }
 0x12b   :  { %v431_v49 = vadd.f32 %v1216_v48, %v1627_v57  ;;  %v518_v50 = vmax.f32 %v428_v47, 0.0 }
 0x12d   :  { %v519_v51 = vmax.f32 %v431_v49, 0.0  ;;  %v1217_v52 = vpop.f32.mrb[28].mxu0 }
 0x12e   :  { %v1218_v53 = vpop.f32.mrb[29].mxu0 }
 0x12f   :  { %v1219_v54 = vadd.f32 %v1218_v53, %v1217_v52  ;;  %v1220_v55 = vpop.f32.mrb[30].mxu0  ;;  %v544_v56 = vpack.c.bf16 %v519_v51, %v518_v50 }
 0x130   :  { %v1221_v58 = vpop.f32.mrb[31].mxu0 }
 0x131   :  { %v436_v59 = vadd.f32 %v1219_v54, %v1627_v57  ;;  %v1222_v60 = vadd.f32 %v1221_v58, %v1220_v55  ;;  %1323 = vmatprep.mubr.bf16.mxu1 %v544_v56 }
 0x133   :  { %v439_v61 = vadd.f32 %v1222_v60, %v1627_v57  ;;  %v520_v62 = vmax.f32 %v436_v59, 0.0 }
 0x135   :  { %v521_v63 = vmax.f32 %v439_v61, 0.0  ;;  %v1223_v0 = vpop.f32.mrb[32].mxu0 }
 0x136   :  { %v1224_v1 = vpop.f32.mrb[33].mxu0 }
 0x137   :  { %v1225_v2 = vadd.f32 %v1224_v1, %v1223_v0  ;;  %v1226_v3 = vpop.f32.mrb[34].mxu0  ;;  %v545_v5 = vpack.c.bf16 %v521_v63, %v520_v62 }
 0x138   :  { %v1227_v6 = vpop.f32.mrb[35].mxu0 }
 0x139   :  { %v444_v7 = vadd.f32 %v1225_v2, %v1627_v57  ;;  %v1228_v8 = vadd.f32 %v1227_v6, %v1226_v3  ;;  %1324 = vmatmul.mubr.bf16.gmra.mrb[28].mxu1 %v545_v5 }
 0x13b   :  { %v447_v9 = vadd.f32 %v1228_v8, %v1627_v57  ;;  %v522_v10 = vmax.f32 %v444_v7, 0.0 }
 0x13d   :  { %v523_v11 = vmax.f32 %v447_v9, 0.0  ;;  %v1229_v12 = vpop.f32.mrb[36].mxu0 }
 0x13e   :  { %v1230_v13 = vpop.f32.mrb[37].mxu0 }
 0x13f   :  { %v1231_v14 = vadd.f32 %v1230_v13, %v1229_v12  ;;  %v1232_v15 = vpop.f32.mrb[38].mxu0  ;;  %v546_v16 = vpack.c.bf16 %v523_v11, %v522_v10 }
 0x140   :  { %v1233_v17 = vpop.f32.mrb[39].mxu0 }
 0x141   :  { %v452_v18 = vadd.f32 %v1231_v14, %v1627_v57  ;;  %v1234_v19 = vadd.f32 %v1233_v17, %v1232_v15  ;;  %1327 = vmatprep.mubr.bf16.mxu1 %v546_v16 }
 0x143   :  { %v455_v20 = vadd.f32 %v1234_v19, %v1627_v57  ;;  %v524_v21 = vmax.f32 %v452_v18, 0.0 }
 0x145   :  { %v525_v24 = vmax.f32 %v455_v20, 0.0  ;;  %v1235_v25 = vpop.f32.mrb[40].mxu0 }
 0x146   :  { %v1236_v26 = vpop.f32.mrb[41].mxu0 }
 0x147   :  { %v1237_v27 = vadd.f32 %v1236_v26, %v1235_v25  ;;  %v1238_v28 = vpop.f32.mrb[42].mxu0  ;;  %v547_v29 = vpack.c.bf16 %v525_v24, %v524_v21 }
 0x148   :  { %v1239_v30 = vpop.f32.mrb[43].mxu0 }
 0x149   :  { %v460_v31 = vadd.f32 %v1237_v27, %v1627_v57  ;;  %v1240_v32 = vadd.f32 %v1239_v30, %v1238_v28  ;;  %1328 = vmatmul.mubr.bf16.gmra.mrb[32].mxu1 %v547_v29 }
 0x14b   :  { %v463_v33 = vadd.f32 %v1240_v32, %v1627_v57  ;;  %v526_v34 = vmax.f32 %v460_v31, 0.0 }
 0x14d   :  { %v527_v35 = vmax.f32 %v463_v33, 0.0  ;;  %v1241_v36 = vpop.f32.mrb[44].mxu0 }
 0x14e   :  { %v1242_v37 = vpop.f32.mrb[45].mxu0 }
 0x14f   :  { %v1243_v38 = vadd.f32 %v1242_v37, %v1241_v36  ;;  %v1244_v39 = vpop.f32.mrb[46].mxu0  ;;  %v548_v40 = vpack.c.bf16 %v527_v35, %v526_v34 }
 0x150   :  { %v1245_v41 = vpop.f32.mrb[47].mxu0 }
 0x151   :  { %v468_v42 = vadd.f32 %v1243_v38, %v1627_v57  ;;  %v1246_v43 = vadd.f32 %v1245_v41, %v1244_v39  ;;  %1331 = vmatprep.mubr.bf16.mxu1 %v548_v40 }
 0x153   :  { %v471_v44 = vadd.f32 %v1246_v43, %v1627_v57  ;;  %v528_v46 = vmax.f32 %v468_v42, 0.0 }
 0x155   :  { %v529_v47 = vmax.f32 %v471_v44, 0.0 }
 0x157   :  { %v549_v48 = vpack.c.bf16 %v529_v47, %v528_v46 }
 0x159   :  { %1332 = vmatmul.mubr.bf16.gmra.mrb[36].mxu1 %v549_v48 }
 0x15a   :  { %1335 = vmatprep.mubr.bf16.mxu1 %v1633_v23 }
 0x161   :  { %1336 = vmatmul.mubr.bf16.gmra.mrb[40].mxu1 %v1639_v45 }
 0x162   :  { %1339 = vmatprep.mubr.bf16.mxu1 %v1645_v4 }
 0x169   :  { %1340 = vmatmul.mubr.bf16.gmra.mrb[44].mxu1 %v1651_v22 }
 0x1dc   :  { %v1313_v49 = vpop.f32.mrb[16].mxu1 }
 0x1dd   :  { %v652_v50 = vpop.f32.mrb[17].mxu1 }
 0x1de   :  { %v1314_v51 = vpop.f32.mrb[18].mxu1 }
 0x1df   :  { %v1072_v52 = vpack.c.bf16 %v1314_v51, %v1313_v49  ;;  %v655_v53 = vpop.f32.mrb[19].mxu1 }
 0x1e0   :  { %v1067_v54 = vpack.c.bf16 %v655_v53, %v652_v50 }
 0x1e1   :  { %1144 = vst [vmem:[%s1725_s4 + $0x8] sm:$0xff] %v1072_v52  }
 0x1e2   :  { %1068 = vst [vmem:[%s1725_s4] sm:$0xff] %v1067_v54  }
 0x1ec   :  { %v1317_v57 = vpop.f32.mrb[20].mxu1 }
 0x1ed   :  { %v668_v23 = vpop.f32.mrb[21].mxu1 }
 0x1ee   :  { %v1318_v45 = vpop.f32.mrb[22].mxu1 }
 0x1ef   :  { %v1082_v4 = vpack.c.bf16 %v1318_v45, %v1317_v57  ;;  %v671_v55 = vpop.f32.mrb[23].mxu1 }
 0x1f0   :  { %v1077_v22 = vpack.c.bf16 %v671_v55, %v668_v23 }
 0x1f1   :  { %1146 = vst [vmem:[%s1725_s4 + $0x18] sm:$0xff] %v1082_v4  }
 0x1f2   :  { %1145 = vst [vmem:[%s1725_s4 + $0x10] sm:$0xff] %v1077_v22  }
 0x1fc   :  { %v1321_v56 = vpop.f32.mrb[24].mxu1 }
 0x1fd   :  { %v684_v58 = vpop.f32.mrb[25].mxu1 }
 0x1fe   :  { %v1322_v59 = vpop.f32.mrb[26].mxu1 }
 0x1ff   :  { %v1092_v60 = vpack.c.bf16 %v1322_v59, %v1321_v56  ;;  %v687_v61 = vpop.f32.mrb[27].mxu1 }
 0x200   :  { %v1087_v62 = vpack.c.bf16 %v687_v61, %v684_v58 }
 0x201   :  { %1148 = vst [vmem:[%s1725_s4 + $0x28] sm:$0xff] %v1092_v60  }
 0x202   :  { %1147 = vst [vmem:[%s1725_s4 + $0x20] sm:$0xff] %v1087_v62  }
 0x20c   :  { %v1325_v63 = vpop.f32.mrb[28].mxu1 }
 0x20d   :  { %v700_v0 = vpop.f32.mrb[29].mxu1 }
 0x20e   :  { %v1326_v1 = vpop.f32.mrb[30].mxu1 }
 0x20f   :  { %v1102_v2 = vpack.c.bf16 %v1326_v1, %v1325_v63  ;;  %v703_v3 = vpop.f32.mrb[31].mxu1 }
 0x210   :  { %v1097_v5 = vpack.c.bf16 %v703_v3, %v700_v0 }
 0x211   :  { %1150 = vst [vmem:[%s1725_s4 + $0x38] sm:$0xff] %v1102_v2  }
 0x212   :  { %1149 = vst [vmem:[%s1725_s4 + $0x30] sm:$0xff] %v1097_v5  }
 0x21c   :  { %v1329_v6 = vpop.f32.mrb[32].mxu1 }
 0x21d   :  { %v716_v7 = vpop.f32.mrb[33].mxu1 }
 0x21e   :  { %v1330_v8 = vpop.f32.mrb[34].mxu1 }
 0x21f   :  { %v1112_v9 = vpack.c.bf16 %v1330_v8, %v1329_v6  ;;  %v719_v10 = vpop.f32.mrb[35].mxu1 }
 0x220   :  { %v1107_v11 = vpack.c.bf16 %v719_v10, %v716_v7 }
 0x221   :  { %1152 = vst [vmem:[%s1725_s4 + $0x48] sm:$0xff] %v1112_v9  }
 0x222   :  { %1151 = vst [vmem:[%s1725_s4 + $0x40] sm:$0xff] %v1107_v11  }
 0x22c   :  { %v1333_v12 = vpop.f32.mrb[36].mxu1 }
 0x22d   :  { %v732_v13 = vpop.f32.mrb[37].mxu1 }
 0x22e   :  { %v1334_v14 = vpop.f32.mrb[38].mxu1 }
 0x22f   :  { %v1122_v15 = vpack.c.bf16 %v1334_v14, %v1333_v12  ;;  %v735_v16 = vpop.f32.mrb[39].mxu1 }
 0x230   :  { %v1117_v17 = vpack.c.bf16 %v735_v16, %v732_v13 }
 0x231   :  { %1154 = vst [vmem:[%s1725_s4 + $0x58] sm:$0xff] %v1122_v15  }
 0x232   :  { %1153 = vst [vmem:[%s1725_s4 + $0x50] sm:$0xff] %v1117_v17  }
 0x234   :  { %v1337_v18 = vpop.f32.mrb[40].mxu1 }
 0x235   :  { %v748_v19 = vpop.f32.mrb[41].mxu1 }
 0x236   :  { %v1338_v20 = vpop.f32.mrb[42].mxu1 }
 0x237   :  { %v1132_v21 = vpack.c.bf16 %v1338_v20, %v1337_v18  ;;  %v751_v24 = vpop.f32.mrb[43].mxu1 }
 0x238   :  { %v1127_v25 = vpack.c.bf16 %v751_v24, %v748_v19 }
 0x239   :  { %1156 = vst [vmem:[%s1725_s4 + $0x68] sm:$0xff] %v1132_v21  }
 0x23a   :  { %1155 = vst [vmem:[%s1725_s4 + $0x60] sm:$0xff] %v1127_v25  }
 0x23c   :  { %v1341_v26 = vpop.f32.mrb[44].mxu1 }
 0x23d   :  { %v764_v27 = vpop.f32.mrb[45].mxu1 }
 0x23e   :  { %v1342_v28 = vpop.f32.mrb[46].mxu1 }
 0x23f   :  { %v1142_v29 = vpack.c.bf16 %v1342_v28, %v1341_v26  ;;  %v767_v30 = vpop.f32.mrb[47].mxu1 }
 0x240   :  { %v1137_v31 = vpack.c.bf16 %v767_v30, %v764_v27 }
 0x241   :  { %1158 = vst [vmem:[%s1725_s4 + $0x78] sm:$0xff] %v1142_v29  }
 0x242   :  { %1157 = vst [vmem:[%s1725_s4 + $0x70] sm:$0xff] %v1137_v31  }

// kernel: gcn_forward_padded.5
= control target key start
LH: loop header
LB: loop body
LE: loop exit
PB: predicated region body
PF: predicated region fallthrough
CT: control target
= control target key end

     0   :  { %s1842_s0 = inlined_call_operand.vmem [shape: bf16[256,256], index: 0, kind: input, shape index: {}]   ;;  %s1843_s1 = inlined_call_operand.vmem [shape: bf16[256,128], index: 1, kind: input, shape index: {}]   ;;  %s1844_s2 = inlined_call_operand.vmem [shape: f32[1,128], index: 2, kind: input, shape index: {}]   ;;  %s1845_s3 = inlined_call_operand.hbm [shape: f32[256,128], index: 3, kind: output, shape index: {}]  }
   0x1   :  { %v1087_v0 = vld [vmem:[%s1843_s1 + $0x40] sm:$0xff]   ;;  %v1089_v2 = vld [vmem:[%s1843_s1 + $0x48] sm:$0xff]   ;;  %v1091_v4 = vld [vmem:[%s1843_s1 + $0x50] sm:$0xff]  }
   0x2   :  { %v1088_v1 = vld [vmem:[%s1843_s1] sm:$0xff]   ;;  %956 = vmatprep.subr.bf16.mxu0 %v1087_v0  ;;  %1068 = vmatprep.subr.bf16.mxu1 %v1087_v0  ;;  %v1090_v3 = vld [vmem:[%s1843_s1 + $0x8] sm:$0xff]   ;;  %v1092_v5 = vld [vmem:[%s1843_s1 + $0x10] sm:$0xff]  }
   0x3   :  { %957 = vmatpush3.bf16.msra.mxu0 %v1088_v1  ;;  %1076 = vmatpush3.bf16.msra.mxu1 %v1088_v1  ;;  %v1093_v6 = vld [vmem:[%s1843_s1 + $0x58] sm:$0xff]   ;;  %v1095_v8 = vld [vmem:[%s1843_s1 + $0x60] sm:$0xff]   ;;  %v1097_v10 = vld [vmem:[%s1843_s1 + $0x68] sm:$0xff]  }
   0x4   :  { %958 = vmatprep.subr.bf16.mxu0 %v1089_v2  ;;  %1069 = vmatprep.subr.bf16.mxu1 %v1089_v2  ;;  %v1094_v7 = vld [vmem:[%s1843_s1 + $0x18] sm:$0xff]   ;;  %v1096_v9 = vld [vmem:[%s1843_s1 + $0x20] sm:$0xff]   ;;  %v1098_v13 = vld [vmem:[%s1843_s1 + $0x28] sm:$0xff]  }
   0x5   :  { %v1105_v11 = vld [vmem:[%s1842_s0 + $0x4] ss:$8 sps:$4 sm:$0xff]   ;;  %v1099_v14 = vld [vmem:[%s1843_s1 + $0x70] sm:$0xff]   ;;  %v1101_v16 = vld [vmem:[%s1843_s1 + $0x78] sm:$0xff]  }
   0x6   :  { %v1108_v12 = vld [vmem:[%s1842_s0 + $0x84] ss:$8 sps:$4 sm:$0xff]   ;;  %375 = vmatprep.mubr.bf16.mxu0 %v1105_v11  ;;  %v1100_v15 = vld [vmem:[%s1843_s1 + $0x30] sm:$0xff]   ;;  %v1102_v17 = vld [vmem:[%s1843_s1 + $0x38] sm:$0xff]  }
   0x7   :  { %959 = vmatpush3.bf16.msra.mxu0 %v1090_v3  ;;  %1077 = vmatpush3.bf16.msra.mxu1 %v1090_v3  ;;  %v1103_v18 = vld [vmem:[%s1842_s0] ss:$8 sps:$4 sm:$0xff]   ;;  %v1109_v20 = vld [vmem:[%s1842_s0 + $0x14] ss:$8 sps:$4 sm:$0xff]  }
   0x8   :  { %960 = vmatprep.subr.bf16.mxu0 %v1091_v4  ;;  %1070 = vmatprep.subr.bf16.mxu1 %v1091_v4  ;;  %v1106_v19 = vld [vmem:[%s1842_s0 + $0x80] ss:$8 sps:$4 sm:$0xff]   ;;  %v1112_v21 = vld [vmem:[%s1842_s0 + $0x94] ss:$8 sps:$4 sm:$0xff]  }
   0x9   :  { %439 = vmatprep.mubr.bf16.mxu1 %v1108_v12 }
   0xb   :  { %961 = vmatpush3.bf16.msra.mxu0 %v1092_v5  ;;  %1078 = vmatpush3.bf16.msra.mxu1 %v1092_v5 }
   0xc   :  { %962 = vmatprep.subr.bf16.mxu0 %v1093_v6  ;;  %1071 = vmatprep.subr.bf16.mxu1 %v1093_v6 }
   0xf   :  { %963 = vmatpush3.bf16.msra.mxu0 %v1094_v7  ;;  %1079 = vmatpush3.bf16.msra.mxu1 %v1094_v7 }
  0x10   :  { %964 = vmatprep.subr.bf16.mxu0 %v1095_v8  ;;  %1072 = vmatprep.subr.bf16.mxu1 %v1095_v8 }
  0x13   :  { %965 = vmatpush3.bf16.msra.mxu0 %v1096_v9  ;;  %1080 = vmatpush3.bf16.msra.mxu1 %v1096_v9 }
  0x14   :  { %966 = vmatprep.subr.bf16.mxu0 %v1097_v10  ;;  %1073 = vmatprep.subr.bf16.mxu1 %v1097_v10 }
  0x17   :  { %967 = vmatpush3.bf16.msra.mxu0 %v1098_v13  ;;  %1081 = vmatpush3.bf16.msra.mxu1 %v1098_v13 }
  0x18   :  { %968 = vmatprep.subr.bf16.mxu0 %v1099_v14  ;;  %1074 = vmatprep.subr.bf16.mxu1 %v1099_v14 }
  0x1b   :  { %969 = vmatpush3.bf16.msra.mxu0 %v1100_v15  ;;  %1082 = vmatpush3.bf16.msra.mxu1 %v1100_v15 }
  0x1c   :  { %970 = vmatprep.subr.bf16.mxu0 %v1101_v16  ;;  %1075 = vmatprep.subr.bf16.mxu1 %v1101_v16 }
  0x1f   :  { %971 = vmatpush3.bf16.msra.mxu0 %v1102_v17  ;;  %1083 = vmatpush3.bf16.msra.mxu1 %v1102_v17 }
  0x22   :  { %376 = vmatmul.mubr.bf16.vlgmr.msra.gmra.mrb[0].mxu0 %v1103_v18  ;;  %440 = vmatmul.mubr.bf16.vlgmr.msra.gmra.mrb[0].mxu1 %v1106_v19 }
  0x23   :  { %383 = vmatprep.mubr.bf16.mxu0 %v1109_v20  ;;  %447 = vmatprep.mubr.bf16.mxu1 %v1112_v21 }
  0x24   :  { %8 = vsyncpa [#allocation3], 0  ;;  %v1111_v22 = vld [vmem:[%s1842_s0 + $0x10] ss:$8 sps:$4 sm:$0xff]   ;;  %v1115_v24 = vld [vmem:[%s1842_s0 + $0x24] ss:$8 sps:$4 sm:$0xff]   ;;  %v504_v48 = vlaneseq }
  0x25   :  { %v1114_v23 = vld [vmem:[%s1842_s0 + $0x90] ss:$8 sps:$4 sm:$0xff]   ;;  %v1118_v25 = vld [vmem:[%s1842_s0 + $0xa4] ss:$8 sps:$4 sm:$0xff]   ;;  %v1117_v26 = vld [vmem:[%s1842_s0 + $0x20] ss:$8 sps:$4 sm:$0xff]  }
  0x26   :  { %v1120_v27 = vld [vmem:[%s1842_s0 + $0xa0] ss:$8 sps:$4 sm:$0xff]   ;;  %v1121_v28 = vld [vmem:[%s1842_s0 + $0x34] ss:$8 sps:$4 sm:$0xff]   ;;  %v1123_v30 = vld [vmem:[%s1842_s0 + $0x30] ss:$8 sps:$4 sm:$0xff]  }
  0x27   :  { %v1124_v29 = vld [vmem:[%s1842_s0 + $0xb4] ss:$8 sps:$4 sm:$0xff]   ;;  %v1126_v31 = vld [vmem:[%s1842_s0 + $0xb0] ss:$8 sps:$4 sm:$0xff]   ;;  %v1127_v32 = vld [vmem:[%s1842_s0 + $0x44] ss:$8 sps:$4 sm:$0xff]  }
  0x28   :  { %v1130_v33 = vld [vmem:[%s1842_s0 + $0xc4] ss:$8 sps:$4 sm:$0xff]   ;;  %v1129_v34 = vld [vmem:[%s1842_s0 + $0x40] ss:$8 sps:$4 sm:$0xff]   ;;  %v1133_v36 = vld [vmem:[%s1842_s0 + $0x54] ss:$8 sps:$4 sm:$0xff]  }
  0x29   :  { %v1132_v35 = vld [vmem:[%s1842_s0 + $0xc0] ss:$8 sps:$4 sm:$0xff]   ;;  %v1136_v37 = vld [vmem:[%s1842_s0 + $0xd4] ss:$8 sps:$4 sm:$0xff]   ;;  %v1135_v38 = vld [vmem:[%s1842_s0 + $0x50] ss:$8 sps:$4 sm:$0xff]  }
  0x2a   :  { %384 = vmatmul.mubr.bf16.gmra.mrb[4].mxu0 %v1111_v22  ;;  %448 = vmatmul.mubr.bf16.gmra.mrb[4].mxu1 %v1114_v23  ;;  %v1138_v39 = vld [vmem:[%s1842_s0 + $0xd0] ss:$8 sps:$4 sm:$0xff]   ;;  %v1139_v40 = vld [vmem:[%s1842_s0 + $0x64] ss:$8 sps:$4 sm:$0xff]   ;;  %v1141_v42 = vld [vmem:[%s1842_s0 + $0x60] ss:$8 sps:$4 sm:$0xff]  }
  0x2b   :  { %391 = vmatprep.mubr.bf16.mxu0 %v1115_v24  ;;  %455 = vmatprep.mubr.bf16.mxu1 %v1118_v25  ;;  %v1142_v41 = vld [vmem:[%s1842_s0 + $0xe4] ss:$8 sps:$4 sm:$0xff]   ;;  %v1144_v43 = vld [vmem:[%s1842_s0 + $0xe0] ss:$8 sps:$4 sm:$0xff]   ;;  %v1145_v44 = vld [vmem:[%s1842_s0 + $0x74] ss:$8 sps:$4 sm:$0xff]  }
  0x2c   :  { %v1148_v45 = vld [vmem:[%s1842_s0 + $0xf4] ss:$8 sps:$4 sm:$0xff]   ;;  %v1147_v46 = vld [vmem:[%s1842_s0 + $0x70] ss:$8 sps:$4 sm:$0xff]   ;;  %v1470_v49 = vand.u32 127, %v504_v48 }
  0x2d   :  { %v1150_v47 = vld [vmem:[%s1842_s0 + $0xf0] ss:$8 sps:$4 sm:$0xff]   ;;  %v1475_v54 = vld [vmem:[%s1844_s2] ss:$0 sm:$0xff]  ;;  %s1303_s0 = smov [#allocation2]  }
  0x2e   :  { %vm506_vm0 = vcmp.lt.s32.totalorder %v1470_v49, 7  ;;  %s896_s2 = sshll.u32 %s1303_s0, 4  ;;  %s897_s2 = int_to_ptr.vmem [resolvable:$true] %s896_s2 }
  0x2f   :  { %s1279_s27 = scalar_lea.vmem %s897_s2, 4096  ;;  %p1284_p1 = scmp.lt.s32.totalorder %s897_s2, %s897_s2 }
  0x30   :  { %p1280_p0 = scmp.ne.s32.totalorder %s897_s2, %s1279_s27  ;;  %p1285_p2 = scmp.lt.s32.totalorder %s1279_s27, %s1279_s27 }
  0x32   :  { %392 = vmatmul.mubr.bf16.gmra.mrb[8].mxu0 %v1117_v26  ;;  %456 = vmatmul.mubr.bf16.gmra.mrb[8].mxu1 %v1120_v27  ;;  %p1286_p3 = por %p1285_p2, %p1284_p1 }
  0x33   :  { %399 = vmatprep.mubr.bf16.mxu0 %v1121_v28  ;;  %463 = vmatprep.mubr.bf16.mxu1 %v1124_v29 }
  0x34   :  { %p1287_p4 = pnand %p1286_p3, %p1280_p0 }
  0x3a   :  { %400 = vmatmul.mubr.bf16.gmra.mrb[12].mxu0 %v1123_v30  ;;  %464 = vmatmul.mubr.bf16.gmra.mrb[12].mxu1 %v1126_v31 }
  0x3b   :  { %407 = vmatprep.mubr.bf16.mxu0 %v1127_v32  ;;  %471 = vmatprep.mubr.bf16.mxu1 %v1130_v33 }
  0x42   :  { %408 = vmatmul.mubr.bf16.gmra.mrb[16].mxu0 %v1129_v34  ;;  %472 = vmatmul.mubr.bf16.gmra.mrb[16].mxu1 %v1132_v35 }
  0x43   :  { %415 = vmatprep.mubr.bf16.mxu0 %v1133_v36  ;;  %479 = vmatprep.mubr.bf16.mxu1 %v1136_v37 }
  0x4a   :  { %416 = vmatmul.mubr.bf16.gmra.mrb[20].mxu0 %v1135_v38  ;;  %480 = vmatmul.mubr.bf16.gmra.mrb[20].mxu1 %v1138_v39 }
  0x4b   :  { %423 = vmatprep.mubr.bf16.mxu0 %v1139_v40  ;;  %487 = vmatprep.mubr.bf16.mxu1 %v1142_v41 }
  0x52   :  { %424 = vmatmul.mubr.bf16.gmra.mrb[24].mxu0 %v1141_v42  ;;  %488 = vmatmul.mubr.bf16.gmra.mrb[24].mxu1 %v1144_v43 }
  0x53   :  { %431 = vmatprep.mubr.bf16.mxu0 %v1145_v44  ;;  %495 = vmatprep.mubr.bf16.mxu1 %v1148_v45 }
  0x5a   :  { %432 = vmatmul.mubr.bf16.gmra.mrb[28].mxu0 %v1147_v46  ;;  %496 = vmatmul.mubr.bf16.gmra.mrb[28].mxu1 %v1150_v47 }
  0xf5   :  { %v972_v50 = vpop.f32.mrb[0].mxu0  ;;  %v1020_v51 = vpop.f32.mrb[0].mxu1 }
  0xf6   :  { %v973_v52 = vpop.f32.mrb[1].mxu0  ;;  %v1021_v53 = vpop.f32.mrb[1].mxu1 }
  0xf7   :  { %v974_v55 = vadd.f32 %v973_v52, %v972_v50  ;;  %v1022_v56 = vadd.f32 %v1021_v53, %v1020_v51  ;;  %v975_v57 = vpop.f32.mrb[2].mxu0  ;;  %v1023_v58 = vpop.f32.mrb[2].mxu1 }
  0xf8   :  { %v976_v59 = vpop.f32.mrb[3].mxu0  ;;  %v1024_v60 = vpop.f32.mrb[3].mxu1 }
  0xf9   :  { %v977_v61 = vadd.f32 %v976_v59, %v975_v57  ;;  %v1025_v62 = vadd.f32 %v1024_v60, %v1023_v58  ;;  %v378_v63 = vadd.f32 %v974_v55, %v1475_v54  ;;  %v442_v0 = vadd.f32 %v1022_v56, %v1475_v54 }
  0xfb   :  { %v1482_v1 = vsel %vm506_vm0, %v378_v63, -1e+30  ;;  %v445_v2 = vadd.f32 %v1025_v62, %v1475_v54  ;;  %v1492_v5 = vsel %vm506_vm0, %v442_v0, -1e+30  ;;  %v381_v12 = vadd.f32 %v977_v61, %v1475_v54 }
  0xfc   :  { %539 = vmax.xlane.f32.xlu0 %v1482_v1 }
  0xfd   :  { %v978_v3 = vpop.f32.mrb[4].mxu0  ;;  %v1488_v4 = vsel %vm506_vm0, %v445_v2, -1e+30  ;;  %v1026_v6 = vpop.f32.mrb[4].mxu1  ;;  %v1505_v21 = vsel %vm506_vm0, %v381_v12, -1e+30 }
  0xfe   :  { %573 = vmax.xlane.f32.xlu1 %v1488_v4  ;;  %v979_v7 = vpop.f32.mrb[5].mxu0  ;;  %v1027_v8 = vpop.f32.mrb[5].mxu1 }
  0xff   :  { %v980_v9 = vadd.f32 %v979_v7, %v978_v3  ;;  %v981_v10 = vpop.f32.mrb[6].mxu0  ;;  %v1028_v11 = vadd.f32 %v1027_v8, %v1026_v6  ;;  %v1029_v13 = vpop.f32.mrb[6].mxu1 }
 0x100   :  { %571 = vmax.xlane.f32.xlu0 %v1492_v5  ;;  %v982_v14 = vpop.f32.mrb[7].mxu0  ;;  %v1030_v15 = vpop.f32.mrb[7].mxu1 }
 0x101   :  { %v983_v16 = vadd.f32 %v982_v14, %v981_v10  ;;  %v386_v17 = vadd.f32 %v980_v9, %v1475_v54  ;;  %v1031_v18 = vadd.f32 %v1030_v15, %v1029_v13  ;;  %v450_v19 = vadd.f32 %v1028_v11, %v1475_v54 }
 0x103   :  { %v1501_v20 = vsel %vm506_vm0, %v386_v17, -1e+30  ;;  %v389_v22 = vadd.f32 %v983_v16, %v1475_v54  ;;  %v453_v23 = vadd.f32 %v1031_v18, %v1475_v54  ;;  %v1517_v26 = vsel %vm506_vm0, %v450_v19, -1e+30 }
 0x104   :  { %543 = vmax.xlane.f32.xlu1 %v1501_v20  ;;  %541 = vmax.xlane.f32.xlu0 %v1505_v21 }
 0x105   :  { %v984_v24 = vpop.f32.mrb[8].mxu0  ;;  %v1513_v25 = vsel %vm506_vm0, %v389_v22, -1e+30  ;;  %v1032_v27 = vpop.f32.mrb[8].mxu1  ;;  %v1523_v35 = vsel %vm506_vm0, %v453_v23, -1e+30 }
 0x106   :  { %v985_v28 = vpop.f32.mrb[9].mxu0  ;;  %v1033_v29 = vpop.f32.mrb[9].mxu1 }
 0x107   :  { %v986_v30 = vadd.f32 %v985_v28, %v984_v24  ;;  %v987_v31 = vpop.f32.mrb[10].mxu0  ;;  %v1034_v32 = vadd.f32 %v1033_v29, %v1032_v27  ;;  %v1035_v33 = vpop.f32.mrb[10].mxu1 }
 0x108   :  { %545 = vmax.xlane.f32.xlu1 %v1513_v25  ;;  %575 = vmax.xlane.f32.xlu0 %v1517_v26  ;;  %v988_v34 = vpop.f32.mrb[11].mxu0  ;;  %v1036_v36 = vpop.f32.mrb[11].mxu1 }
 0x109   :  { %v989_v37 = vadd.f32 %v988_v34, %v987_v31  ;;  %v394_v38 = vadd.f32 %v986_v30, %v1475_v54  ;;  %v1037_v39 = vadd.f32 %v1036_v36, %v1035_v33  ;;  %v458_v40 = vadd.f32 %v1034_v32, %v1475_v54 }
 0x10b   :  { %v1529_v41 = vsel %vm506_vm0, %v394_v38, -1e+30  ;;  %v397_v42 = vadd.f32 %v989_v37, %v1475_v54  ;;  %v461_v43 = vadd.f32 %v1037_v39, %v1475_v54  ;;  %v1541_v46 = vsel %vm506_vm0, %v458_v40, -1e+30 }
 0x10c   :  { %577 = vmax.xlane.f32.xlu1 %v1523_v35  ;;  %547 = vmax.xlane.f32.xlu0 %v1529_v41 }
 0x10d   :  { %v990_v44 = vpop.f32.mrb[12].mxu0  ;;  %v1537_v45 = vsel %vm506_vm0, %v397_v42, -1e+30  ;;  %v1038_v47 = vpop.f32.mrb[12].mxu1  ;;  %v1547_v57 = vsel %vm506_vm0, %v461_v43, -1e+30 }
 0x10e   :  { %v991_v48 = vpop.f32.mrb[13].mxu0  ;;  %v1039_v50 = vpop.f32.mrb[13].mxu1 }
 0x10f   :  { %v992_v51 = vadd.f32 %v991_v48, %v990_v44  ;;  %v993_v52 = vpop.f32.mrb[14].mxu0  ;;  %v1040_v53 = vadd.f32 %v1039_v50, %v1038_v47  ;;  %v1041_v55 = vpop.f32.mrb[14].mxu1 }
 0x110   :  { %549 = vmax.xlane.f32.xlu1 %v1537_v45  ;;  %579 = vmax.xlane.f32.xlu0 %v1541_v46  ;;  %v994_v56 = vpop.f32.mrb[15].mxu0  ;;  %v1042_v58 = vpop.f32.mrb[15].mxu1 }
 0x111   :  { %v995_v59 = vadd.f32 %v994_v56, %v993_v52  ;;  %v402_v60 = vadd.f32 %v992_v51, %v1475_v54  ;;  %v1043_v61 = vadd.f32 %v1042_v58, %v1041_v55  ;;  %v466_v62 = vadd.f32 %v1040_v53, %v1475_v54 }
 0x113   :  { %v1553_v63 = vsel %vm506_vm0, %v402_v60, -1e+30  ;;  %v405_v0 = vadd.f32 %v995_v59, %v1475_v54  ;;  %v469_v2 = vadd.f32 %v1043_v61, %v1475_v54  ;;  %v1565_v7 = vsel %vm506_vm0, %v466_v62, -1e+30 }
 0x114   :  { %581 = vmax.xlane.f32.xlu1 %v1547_v57  ;;  %551 = vmax.xlane.f32.xlu0 %v1553_v63 }
 0x115   :  { %v996_v3 = vpop.f32.mrb[16].mxu0  ;;  %v1561_v6 = vsel %vm506_vm0, %v405_v0, -1e+30  ;;  %v1044_v8 = vpop.f32.mrb[16].mxu1  ;;  %v1571_v16 = vsel %vm506_vm0, %v469_v2, -1e+30 }
 0x116   :  { %v997_v9 = vpop.f32.mrb[17].mxu0  ;;  %v1045_v10 = vpop.f32.mrb[17].mxu1 }
 0x117   :  { %v998_v11 = vadd.f32 %v997_v9, %v996_v3  ;;  %v999_v12 = vpop.f32.mrb[18].mxu0  ;;  %v1046_v13 = vadd.f32 %v1045_v10, %v1044_v8  ;;  %v1047_v14 = vpop.f32.mrb[18].mxu1 }
 0x118   :  { %553 = vmax.xlane.f32.xlu1 %v1561_v6  ;;  %583 = vmax.xlane.f32.xlu0 %v1565_v7  ;;  %v1000_v15 = vpop.f32.mrb[19].mxu0  ;;  %v1048_v17 = vpop.f32.mrb[19].mxu1 }
 0x119   :  { %v1001_v18 = vadd.f32 %v1000_v15, %v999_v12  ;;  %v410_v19 = vadd.f32 %v998_v11, %v1475_v54  ;;  %v1049_v22 = vadd.f32 %v1048_v17, %v1047_v14  ;;  %v474_v23 = vadd.f32 %v1046_v13, %v1475_v54 }
 0x11b   :  { %v1577_v24 = vsel %vm506_vm0, %v410_v19, -1e+30  ;;  %v413_v27 = vadd.f32 %v1001_v18, %v1475_v54  ;;  %v477_v28 = vadd.f32 %v1049_v22, %v1475_v54  ;;  %v1589_v31 = vsel %vm506_vm0, %v474_v23, -1e+30 }
 0x11c   :  { %585 = vmax.xlane.f32.xlu1 %v1571_v16  ;;  %555 = vmax.xlane.f32.xlu0 %v1577_v24 }
 0x11d   :  { %v1002_v29 = vpop.f32.mrb[20].mxu0  ;;  %v1585_v30 = vsel %vm506_vm0, %v413_v27, -1e+30  ;;  %v1050_v32 = vpop.f32.mrb[20].mxu1  ;;  %v1595_v42 = vsel %vm506_vm0, %v477_v28, -1e+30 }
 0x11e   :  { %v1003_v33 = vpop.f32.mrb[21].mxu0  ;;  %v1051_v34 = vpop.f32.mrb[21].mxu1 }
 0x11f   :  { %v1004_v36 = vadd.f32 %v1003_v33, %v1002_v29  ;;  %v1005_v37 = vpop.f32.mrb[22].mxu0  ;;  %v1052_v38 = vadd.f32 %v1051_v34, %v1050_v32  ;;  %v1053_v39 = vpop.f32.mrb[22].mxu1 }
 0x120   :  { %557 = vmax.xlane.f32.xlu1 %v1585_v30  ;;  %587 = vmax.xlane.f32.xlu0 %v1589_v31  ;;  %v1006_v40 = vpop.f32.mrb[23].mxu0  ;;  %v1054_v43 = vpop.f32.mrb[23].mxu1 }
 0x121   :  { %v1007_v44 = vadd.f32 %v1006_v40, %v1005_v37  ;;  %v418_v47 = vadd.f32 %v1004_v36, %v1475_v54  ;;  %v1055_v48 = vadd.f32 %v1054_v43, %v1053_v39  ;;  %v482_v50 = vadd.f32 %v1052_v38, %v1475_v54 }
 0x123   :  { %v1601_v51 = vsel %vm506_vm0, %v418_v47, -1e+30  ;;  %v421_v52 = vadd.f32 %v1007_v44, %v1475_v54  ;;  %v485_v53 = vadd.f32 %v1055_v48, %v1475_v54  ;;  %v1613_v58 = vsel %vm506_vm0, %v482_v50, -1e+30 }
 0x124   :  { %589 = vmax.xlane.f32.xlu1 %v1595_v42  ;;  %559 = vmax.xlane.f32.xlu0 %v1601_v51 }
 0x125   :  { %v1008_v55 = vpop.f32.mrb[24].mxu0  ;;  %v1609_v56 = vsel %vm506_vm0, %v421_v52, -1e+30  ;;  %v1056_v59 = vpop.f32.mrb[24].mxu1  ;;  %v1619_v9 = vsel %vm506_vm0, %v485_v53, -1e+30 }
 0x126   :  { %v1009_v60 = vpop.f32.mrb[25].mxu0  ;;  %v1057_v61 = vpop.f32.mrb[25].mxu1 }
 0x127   :  { %v1010_v62 = vadd.f32 %v1009_v60, %v1008_v55  ;;  %v1011_v0 = vpop.f32.mrb[26].mxu0  ;;  %v1058_v2 = vadd.f32 %v1057_v61, %v1056_v59  ;;  %v1059_v3 = vpop.f32.mrb[26].mxu1 }
 0x128   :  { %561 = vmax.xlane.f32.xlu1 %v1609_v56  ;;  %591 = vmax.xlane.f32.xlu0 %v1613_v58  ;;  %v1012_v8 = vpop.f32.mrb[27].mxu0  ;;  %v1060_v10 = vpop.f32.mrb[27].mxu1 }
 0x129   :  { %v1013_v11 = vadd.f32 %v1012_v8, %v1011_v0  ;;  %v426_v12 = vadd.f32 %v1010_v62, %v1475_v54  ;;  %v1061_v13 = vadd.f32 %v1060_v10, %v1059_v3  ;;  %v490_v14 = vadd.f32 %v1058_v2, %v1475_v54 }
 0x12b   :  { %v1625_v15 = vsel %vm506_vm0, %v426_v12, -1e+30  ;;  %v429_v17 = vadd.f32 %v1013_v11, %v1475_v54  ;;  %v493_v18 = vadd.f32 %v1061_v13, %v1475_v54  ;;  %v1637_v23 = vsel %vm506_vm0, %v490_v14, -1e+30 }
 0x12c   :  { %593 = vmax.xlane.f32.xlu1 %v1619_v9  ;;  %563 = vmax.xlane.f32.xlu0 %v1625_v15 }
 0x12d   :  { %v1014_v19 = vpop.f32.mrb[28].mxu0  ;;  %v1633_v22 = vsel %vm506_vm0, %v429_v17, -1e+30  ;;  %v1062_v27 = vpop.f32.mrb[28].mxu1  ;;  %v1643_v38 = vsel %vm506_vm0, %v493_v18, -1e+30 }
 0x12e   :  { %v1015_v28 = vpop.f32.mrb[29].mxu0  ;;  %v1063_v29 = vpop.f32.mrb[29].mxu1 }
 0x12f   :  { %v1016_v32 = vadd.f32 %v1015_v28, %v1014_v19  ;;  %v1017_v33 = vpop.f32.mrb[30].mxu0  ;;  %v1064_v34 = vadd.f32 %v1063_v29, %v1062_v27  ;;  %v1065_v36 = vpop.f32.mrb[30].mxu1 }
 0x130   :  { %565 = vmax.xlane.f32.xlu1 %v1633_v22  ;;  %595 = vmax.xlane.f32.xlu0 %v1637_v23  ;;  %v1018_v37 = vpop.f32.mrb[31].mxu0  ;;  %v1066_v39 = vpop.f32.mrb[31].mxu1 }
 0x131   :  { %v1019_v40 = vadd.f32 %v1018_v37, %v1017_v33  ;;  %v434_v43 = vadd.f32 %v1016_v32, %v1475_v54  ;;  %v1067_v44 = vadd.f32 %v1066_v39, %v1065_v36  ;;  %v498_v47 = vadd.f32 %v1064_v34, %v1475_v54 }
 0x133   :  { %v1649_v48 = vsel %vm506_vm0, %v434_v43, -1e+30  ;;  %v437_v50 = vadd.f32 %v1019_v40, %v1475_v54  ;;  %v501_v52 = vadd.f32 %v1067_v44, %v1475_v54  ;;  %v1661_v55 = vsel %vm506_vm0, %v498_v47, -1e+30 }
 0x134   :  { %597 = vmax.xlane.f32.xlu1 %v1643_v38  ;;  %567 = vmax.xlane.f32.xlu0 %v1649_v48 }
 0x135   :  { %v1657_v53 = vsel %vm506_vm0, %v437_v50, -1e+30  ;;  %v1665_v59 = vsel %vm506_vm0, %v501_v52, -1e+30 }
 0x138   :  { %569 = vmax.xlane.f32.xlu1 %v1657_v53  ;;  %599 = vmax.xlane.f32.xlu0 %v1661_v55 }
 0x13c   :  { %601 = vmax.xlane.f32.xlu1 %v1665_v59 }
 0x189   :  { %v540_v54 = vpop.xlane.xlu0 %539 }
 0x18a   :  { %v1671_v60 = vsub.f32 %v1482_v1, %v540_v54 }
 0x18b   :  { %v574_v62 = vpop.xlane.xlu1 %573 }
 0x18c   :  { %v635_v61 = vmul.f32 1.442695, %v1671_v60  ;;  %v1679_v10 = vsub.f32 %v1488_v4, %v574_v62 }
 0x18d   :  { %v572_v0 = vpop.xlane.xlu0 %571 }
 0x18e   :  { %1151 = vpow2.f32 %v635_v61  ;;  %v1675_v2 = vsub.f32 %v1492_v5, %v572_v0  ;;  %v669_v17 = vmul.f32 1.442695, %v1679_v10 }
 0x190   :  { %v667_v49 = vmul.f32 1.442695, %v1675_v2 }
 0x191   :  { %v544_v3 = vpop.xlane.xlu1 %543  ;;  %v542_v8 = vpop.xlane.xlu0 %541 }
 0x192   :  { %1153 = vpow2.f32 %v667_v49  ;;  %v1682_v11 = vsub.f32 %v1501_v20, %v544_v3  ;;  %v1685_v1 = vsub.f32 %v1505_v21, %v542_v8 }
 0x194   :  { %v639_v12 = vmul.f32 1.442695, %v1682_v11  ;;  %v637_v13 = vmul.f32 1.442695, %v1685_v1 }
 0x195   :  { %v546_v5 = vpop.xlane.xlu1 %545  ;;  %v576_v14 = vpop.xlane.xlu0 %575 }
 0x196   :  { %1155 = vpow2.f32 %v639_v12  ;;  %v1691_v18 = vsub.f32 %v1513_v25, %v546_v5  ;;  %v1694_v4 = vsub.f32 %v1517_v26, %v576_v14 }
 0x197   :  { %1157 = vpow2.f32 %v637_v13 }
 0x198   :  { %v1152_v20 = vpop.eup %1151  ;;  %v671_v21 = vmul.f32 1.442695, %v1694_v4  ;;  %1159 = vpow2.f32 %v669_v17  ;;  %v641_v28 = vmul.f32 1.442695, %v1691_v18 }
 0x199   :  { %v578_v19 = vpop.xlane.xlu1 %577  ;;  %699 = vadd.xlane.f32.xlu0 %v1152_v20  ;;  %v548_v27 = vpop.xlane.xlu0 %547 }
 0x19a   :  { %v1699_v29 = vsub.f32 %v1523_v35, %v578_v19  ;;  %v1702_v32 = vsub.f32 %v1529_v41, %v548_v27  ;;  %1161 = vpow2.f32 %v671_v21 }
 0x19b   :  { %1163 = vpow2.f32 %v641_v28 }
 0x19c   :  { %v1154_v25 = vpop.eup %1153  ;;  %v643_v26 = vmul.f32 1.442695, %v1702_v32  ;;  %v673_v36 = vmul.f32 1.442695, %v1699_v29 }
 0x19d   :  { %v550_v33 = vpop.xlane.xlu1 %549  ;;  %731 = vadd.xlane.f32.xlu0 %v1154_v25  ;;  %v580_v34 = vpop.xlane.xlu0 %579 }
 0x19e   :  { %v1707_v37 = vsub.f32 %v1537_v45, %v550_v33  ;;  %v1710_v39 = vsub.f32 %v1541_v46, %v580_v34  ;;  %1165 = vpow2.f32 %v643_v26 }
 0x19f   :  { %1167 = vpow2.f32 %v673_v36 }
 0x1a0   :  { %v1156_v35 = vpop.eup %1155  ;;  %v675_v41 = vmul.f32 1.442695, %v1710_v39  ;;  %v645_v47 = vmul.f32 1.442695, %v1707_v37 }
 0x1a1   :  { %v1158_v40 = vpop.eup %1157  ;;  %v582_v43 = vpop.xlane.xlu1 %581  ;;  %703 = vadd.xlane.f32.xlu0 %v1156_v35 }
 0x1a2   :  { %v552_v44 = vpop.xlane.xlu0 %551  ;;  %v1715_v50 = vsub.f32 %v1547_v57, %v582_v43  ;;  %701 = vadd.xlane.f32.xlu1 %v1158_v40  ;;  %1169 = vpow2.f32 %v675_v41  ;;  %v1160_v46 = vpop.eup %1159 }
 0x1a3   :  { %v1718_v45 = vsub.f32 %v1553_v63, %v552_v44  ;;  %1171 = vpow2.f32 %v645_v47 }
 0x1a4   :  { %v1162_v54 = vpop.eup %1161  ;;  %v677_v0 = vmul.f32 1.442695, %v1715_v50 }
 0x1a5   :  { %v647_v52 = vmul.f32 1.442695, %v1718_v45  ;;  %v554_v61 = vpop.xlane.xlu1 %553  ;;  %735 = vadd.xlane.f32.xlu0 %v1162_v54  ;;  %v1164_v63 = vpop.eup %1163 }
 0x1a6   :  { %v584_v62 = vpop.xlane.xlu0 %583  ;;  %v1723_v49 = vsub.f32 %v1561_v6, %v554_v61  ;;  %733 = vadd.xlane.f32.xlu1 %v1160_v46 }
 0x1a7   :  { %v1726_v57 = vsub.f32 %v1565_v7, %v584_v62  ;;  %1173 = vpow2.f32 %v647_v52 }
 0x1a8   :  { %v1166_v8 = vpop.eup %1165  ;;  %1175 = vpow2.f32 %v677_v0  ;;  %v649_v5 = vmul.f32 1.442695, %v1723_v49 }
 0x1a9   :  { %v679_v3 = vmul.f32 1.442695, %v1726_v57  ;;  %v586_v12 = vpop.xlane.xlu1 %585  ;;  %707 = vadd.xlane.f32.xlu0 %v1166_v8  ;;  %v1168_v7 = vpop.eup %1167 }
 0x1aa   :  { %v556_v13 = vpop.xlane.xlu0 %555  ;;  %v1731_v14 = vsub.f32 %v1571_v16, %v586_v12  ;;  %705 = vadd.xlane.f32.xlu1 %v1164_v63 }
 0x1ab   :  { %v1734_v6 = vsub.f32 %v1577_v24, %v556_v13  ;;  %1177 = vpow2.f32 %v679_v3 }
 0x1ac   :  { %v1170_v20 = vpop.eup %1169  ;;  %1179 = vpow2.f32 %v649_v5  ;;  %v681_v27 = vmul.f32 1.442695, %v1731_v14 }
 0x1ad   :  { %v651_v17 = vmul.f32 1.442695, %v1734_v6  ;;  %v558_v21 = vpop.xlane.xlu1 %557  ;;  %739 = vadd.xlane.f32.xlu0 %v1170_v20  ;;  %v1172_v24 = vpop.eup %1171 }
 0x1ae   :  { %v588_v19 = vpop.xlane.xlu0 %587  ;;  %v1739_v28 = vsub.f32 %v1585_v30, %v558_v21  ;;  %737 = vadd.xlane.f32.xlu1 %v1168_v7 }
 0x1af   :  { %v1742_v16 = vsub.f32 %v1589_v31, %v588_v19  ;;  %1181 = vpow2.f32 %v651_v17 }
 0x1b0   :  { %1183 = vpow2.f32 %v681_v27  ;;  %v653_v36 = vmul.f32 1.442695, %v1739_v28 }
 0x1b1   :  { %v683_v25 = vmul.f32 1.442695, %v1742_v16  ;;  %v1174_v26 = vpop.eup %1173  ;;  %v590_v33 = vpop.xlane.xlu1 %589 }
 0x1b2   :  { %v560_v34 = vpop.xlane.xlu0 %559  ;;  %v1747_v35 = vsub.f32 %v1595_v42, %v590_v33  ;;  %709 = vadd.xlane.f32.xlu1 %v1172_v24  ;;  %711 = vadd.xlane.f32.xlu0 %v1174_v26  ;;  %v1176_v31 = vpop.eup %1175 }
 0x1b3   :  { %v1750_v30 = vsub.f32 %v1601_v51, %v560_v34  ;;  %1185 = vpow2.f32 %v683_v25 }
 0x1b4   :  { %1187 = vpow2.f32 %v653_v36  ;;  %v685_v47 = vmul.f32 1.442695, %v1747_v35 }
 0x1b5   :  { %v655_v41 = vmul.f32 1.442695, %v1750_v30  ;;  %v1178_v40 = vpop.eup %1177  ;;  %v562_v43 = vpop.xlane.xlu1 %561 }
 0x1b6   :  { %v592_v44 = vpop.xlane.xlu0 %591  ;;  %v1755_v46 = vsub.f32 %v1609_v56, %v562_v43  ;;  %741 = vadd.xlane.f32.xlu1 %v1176_v31  ;;  %743 = vadd.xlane.f32.xlu0 %v1178_v40  ;;  %v1180_v51 = vpop.eup %1179 }
 0x1b7   :  { %v1758_v42 = vsub.f32 %v1613_v58, %v592_v44  ;;  %1189 = vpow2.f32 %v655_v41 }
 0x1b8   :  { %1191 = vpow2.f32 %v685_v47  ;;  %v657_v0 = vmul.f32 1.442695, %v1755_v46 }
 0x1b9   :  { %v687_v52 = vmul.f32 1.442695, %v1758_v42  ;;  %v1182_v54 = vpop.eup %1181  ;;  %v594_v61 = vpop.xlane.xlu1 %593 }
 0x1ba   :  { %v564_v62 = vpop.xlane.xlu0 %563  ;;  %v1763_v63 = vsub.f32 %v1619_v9, %v594_v61  ;;  %713 = vadd.xlane.f32.xlu1 %v1180_v51  ;;  %715 = vadd.xlane.f32.xlu0 %v1182_v54  ;;  %v1184_v58 = vpop.eup %1183 }
 0x1bb   :  { %v1766_v56 = vsub.f32 %v1625_v15, %v564_v62  ;;  %1193 = vpow2.f32 %v687_v52 }
 0x1bc   :  { %1195 = vpow2.f32 %v657_v0  ;;  %v689_v5 = vmul.f32 1.442695, %v1763_v63 }
 0x1bd   :  { %v659_v3 = vmul.f32 1.442695, %v1766_v56  ;;  %v1186_v8 = vpop.eup %1185  ;;  %v566_v12 = vpop.xlane.xlu1 %565 }
 0x1be   :  { %v596_v13 = vpop.xlane.xlu0 %595  ;;  %v1771_v7 = vsub.f32 %v1633_v22, %v566_v12  ;;  %745 = vadd.xlane.f32.xlu1 %v1184_v58  ;;  %747 = vadd.xlane.f32.xlu0 %v1186_v8  ;;  %v1188_v15 = vpop.eup %1187 }
 0x1bf   :  { %v1774_v9 = vsub.f32 %v1637_v23, %v596_v13  ;;  %1197 = vpow2.f32 %v659_v3 }
 0x1c0   :  { %1199 = vpow2.f32 %v689_v5  ;;  %v661_v27 = vmul.f32 1.442695, %v1771_v7 }
 0x1c1   :  { %v691_v17 = vmul.f32 1.442695, %v1774_v9  ;;  %v1190_v20 = vpop.eup %1189  ;;  %v598_v21 = vpop.xlane.xlu1 %597 }
 0x1c2   :  { %v568_v19 = vpop.xlane.xlu0 %567  ;;  %v1779_v24 = vsub.f32 %v1643_v38, %v598_v21  ;;  %717 = vadd.xlane.f32.xlu1 %v1188_v15  ;;  %719 = vadd.xlane.f32.xlu0 %v1190_v20  ;;  %v1192_v23 = vpop.eup %1191 }
 0x1c3   :  { %v1782_v22 = vsub.f32 %v1649_v48, %v568_v19  ;;  %1201 = vpow2.f32 %v691_v17 }
 0x1c4   :  { %1203 = vpow2.f32 %v661_v27  ;;  %v693_v36 = vmul.f32 1.442695, %v1779_v24 }
 0x1c5   :  { %v663_v25 = vmul.f32 1.442695, %v1782_v22  ;;  %v1194_v26 = vpop.eup %1193  ;;  %v570_v33 = vpop.xlane.xlu1 %569 }
 0x1c6   :  { %v600_v34 = vpop.xlane.xlu0 %599  ;;  %749 = vadd.xlane.f32.xlu1 %v1192_v23  ;;  %751 = vadd.xlane.f32.xlu0 %v1194_v26  ;;  %v1790_v31 = vsub.f32 %v1657_v53, %v570_v33  ;;  %v1196_v48 = vpop.eup %1195 }
 0x1c7   :  { %v1787_v38 = vsub.f32 %v1661_v55, %v600_v34  ;;  %1205 = vpow2.f32 %v663_v25 }
 0x1c8   :  { %1207 = vpow2.f32 %v693_v36  ;;  %v665_v44 = vmul.f32 1.442695, %v1790_v31 }
 0x1c9   :  { %v695_v41 = vmul.f32 1.442695, %v1787_v38  ;;  %v1198_v40 = vpop.eup %1197  ;;  %v602_v43 = vpop.xlane.xlu1 %601 }
 0x1ca   :  { %721 = vadd.xlane.f32.xlu1 %v1196_v48  ;;  %723 = vadd.xlane.f32.xlu0 %v1198_v40  ;;  %v1795_v47 = vsub.f32 %v1665_v59, %v602_v43  ;;  %v1200_v55 = vpop.eup %1199 }
 0x1cb   :  { %1209 = vpow2.f32 %v695_v41 }
 0x1cc   :  { %1211 = vpow2.f32 %v665_v44  ;;  %v697_v53 = vmul.f32 1.442695, %v1795_v47 }
 0x1cd   :  { %v1202_v51 = vpop.eup %1201 }
 0x1ce   :  { %753 = vadd.xlane.f32.xlu1 %v1200_v55  ;;  %755 = vadd.xlane.f32.xlu0 %v1202_v51  ;;  %v1204_v52 = vpop.eup %1203  ;;  %1213 = vpow2.f32 %v697_v53 }
 0x1d1   :  { %v1206_v54 = vpop.eup %1205 }
 0x1d2   :  { %725 = vadd.xlane.f32.xlu1 %v1204_v52  ;;  %727 = vadd.xlane.f32.xlu0 %v1206_v54  ;;  %v1208_v61 = vpop.eup %1207 }
 0x1d5   :  { %v1210_v62 = vpop.eup %1209 }
 0x1d6   :  { %757 = vadd.xlane.f32.xlu1 %v1208_v61  ;;  %759 = vadd.xlane.f32.xlu0 %v1210_v62  ;;  %v1212_v0 = vpop.eup %1211 }
 0x1d8   :  { %v1214_v59 = vpop.eup %1213 }
 0x1da   :  { %729 = vadd.xlane.f32.xlu1 %v1212_v0 }
 0x1de   :  { %761 = vadd.xlane.f32.xlu1 %v1214_v59 }
 0x226   :  { %v700_v58 = vpop.xlane.xlu0 %699 }
 0x227   :  { %1215 = vlog2.f32 %v700_v58 }
 0x22a   :  { %v732_v3 = vpop.xlane.xlu0 %731 }
 0x22b   :  { %1217 = vlog2.f32 %v732_v3 }
 0x22e   :  { %v704_v8 = vpop.xlane.xlu0 %703 }
 0x22f   :  { %v702_v12 = vpop.xlane.xlu1 %701  ;;  %1219 = vlog2.f32 %v704_v8 }
 0x230   :  { %1221 = vlog2.f32 %v702_v12 }
 0x231   :  { %v1216_v13 = vpop.eup %1215 }
 0x232   :  { %v764_v5 = vmul.f32 0.6931472, %v1216_v13  ;;  %v736_v17 = vpop.xlane.xlu0 %735 }
 0x233   :  { %v734_v15 = vpop.xlane.xlu1 %733 }
 0x234   :  { %v827_v20 = vsub.f32 %v1671_v60, %v764_v5  ;;  %1223 = vlog2.f32 %v734_v15 }
 0x235   :  { %v1218_v21 = vpop.eup %1217  ;;  %1225 = vlog2.f32 %v736_v17 }
 0x236   :  { %859 = vst [vmem:[#allocation2] sm:$0xff] %v827_v20  ;;  %v796_v19 = vmul.f32 0.6931472, %v1218_v21  ;;  %v708_v23 = vpop.xlane.xlu0 %707 }
 0x237   :  { %v706_v27 = vpop.xlane.xlu1 %705 }
 0x238   :  { %v843_v25 = vsub.f32 %v1675_v2, %v796_v19  ;;  %1227 = vlog2.f32 %v706_v27 }
 0x239   :  { %v1220_v26 = vpop.eup %1219  ;;  %1229 = vlog2.f32 %v708_v23 }
 0x23a   :  { %v1222_v33 = vpop.eup %1221  ;;  %875 = vst [vmem:[#allocation2 + $0x80] sm:$0xff] %v843_v25  ;;  %v768_v34 = vmul.f32 0.6931472, %v1220_v26  ;;  %v740_v41 = vpop.xlane.xlu0 %739 }
 0x23b   :  { %v766_v36 = vmul.f32 0.6931472, %v1222_v33  ;;  %v738_v48 = vpop.xlane.xlu1 %737 }
 0x23c   :  { %v829_v60 = vsub.f32 %v1682_v11, %v768_v34  ;;  %1231 = vlog2.f32 %v738_v48 }
 0x23d   :  { %v828_v40 = vsub.f32 %v1685_v1, %v766_v36  ;;  %1233 = vlog2.f32 %v740_v41 }
 0x23e   :  { %v1224_v43 = vpop.eup %1223  ;;  %861 = vst [vmem:[#allocation2 + $0x10] sm:$0xff] %v829_v60 }
 0x23f   :  { %v1226_v44 = vpop.eup %1225  ;;  %860 = vst [vmem:[#allocation2 + $0x8] sm:$0xff] %v828_v40  ;;  %v798_v2 = vmul.f32 0.6931472, %v1224_v43  ;;  %v710_v55 = vpop.xlane.xlu1 %709 }
 0x240   :  { %v712_v51 = vpop.xlane.xlu0 %711  ;;  %v800_v53 = vmul.f32 0.6931472, %v1226_v44  ;;  %1235 = vlog2.f32 %v710_v55 }
 0x241   :  { %v844_v52 = vsub.f32 %v1679_v10, %v798_v2  ;;  %1237 = vlog2.f32 %v712_v51 }
 0x242   :  { %v1228_v54 = vpop.eup %1227  ;;  %v845_v61 = vsub.f32 %v1694_v4, %v800_v53 }
 0x243   :  { %v1230_v11 = vpop.eup %1229  ;;  %876 = vst [vmem:[#allocation2 + $0x88] sm:$0xff] %v844_v52  ;;  %v770_v62 = vmul.f32 0.6931472, %v1228_v54  ;;  %v742_v1 = vpop.xlane.xlu1 %741 }
 0x244   :  { %v744_v0 = vpop.xlane.xlu0 %743  ;;  %877 = vst [vmem:[#allocation2 + $0x90] sm:$0xff] %v845_v61  ;;  %v772_v59 = vmul.f32 0.6931472, %v1230_v11  ;;  %1239 = vlog2.f32 %v742_v1 }
 0x245   :  { %v830_v58 = vsub.f32 %v1691_v18, %v770_v62  ;;  %1241 = vlog2.f32 %v744_v0 }
 0x246   :  { %v1232_v3 = vpop.eup %1231  ;;  %v831_v8 = vsub.f32 %v1702_v32, %v772_v59 }
 0x247   :  { %v1234_v12 = vpop.eup %1233  ;;  %862 = vst [vmem:[#allocation2 + $0x18] sm:$0xff] %v830_v58  ;;  %v802_v10 = vmul.f32 0.6931472, %v1232_v3  ;;  %v714_v13 = vpop.xlane.xlu1 %713 }
 0x248   :  { %v716_v5 = vpop.xlane.xlu0 %715  ;;  %863 = vst [vmem:[#allocation2 + $0x20] sm:$0xff] %v831_v8  ;;  %v804_v4 = vmul.f32 0.6931472, %v1234_v12  ;;  %1243 = vlog2.f32 %v714_v13 }
 0x249   :  { %v846_v15 = vsub.f32 %v1699_v29, %v802_v10  ;;  %1245 = vlog2.f32 %v716_v5 }
 0x24a   :  { %v1236_v17 = vpop.eup %1235  ;;  %v847_v20 = vsub.f32 %v1710_v39, %v804_v4 }
 0x24b   :  { %v1238_v21 = vpop.eup %1237  ;;  %878 = vst [vmem:[#allocation2 + $0x98] sm:$0xff] %v846_v15  ;;  %v774_v18 = vmul.f32 0.6931472, %v1236_v17  ;;  %v746_v19 = vpop.xlane.xlu1 %745 }
 0x24c   :  { %v748_v27 = vpop.xlane.xlu0 %747  ;;  %879 = vst [vmem:[#allocation2 + $0xa0] sm:$0xff] %v847_v20  ;;  %v776_v32 = vmul.f32 0.6931472, %v1238_v21  ;;  %1247 = vlog2.f32 %v746_v19 }
 0x24d   :  { %v832_v23 = vsub.f32 %v1707_v37, %v774_v18  ;;  %1249 = vlog2.f32 %v748_v27 }
 0x24e   :  { %v1240_v25 = vpop.eup %1239  ;;  %v833_v26 = vsub.f32 %v1718_v45, %v776_v32 }
 0x24f   :  { %v1242_v33 = vpop.eup %1241  ;;  %864 = vst [vmem:[#allocation2 + $0x28] sm:$0xff] %v832_v23  ;;  %v806_v29 = vmul.f32 0.6931472, %v1240_v25  ;;  %v718_v34 = vpop.xlane.xlu1 %717 }
 0x250   :  { %v720_v36 = vpop.xlane.xlu0 %719  ;;  %865 = vst [vmem:[#allocation2 + $0x30] sm:$0xff] %v833_v26  ;;  %v808_v39 = vmul.f32 0.6931472, %v1242_v33  ;;  %1251 = vlog2.f32 %v718_v34 }
 0x251   :  { %v848_v48 = vsub.f32 %v1715_v50, %v806_v29  ;;  %1253 = vlog2.f32 %v720_v36 }
 0x252   :  { %v1244_v41 = vpop.eup %1243  ;;  %v849_v60 = vsub.f32 %v1726_v57, %v808_v39 }
 0x253   :  { %v1246_v40 = vpop.eup %1245  ;;  %880 = vst [vmem:[#allocation2 + $0xa8] sm:$0xff] %v848_v48  ;;  %v778_v37 = vmul.f32 0.6931472, %v1244_v41  ;;  %v750_v43 = vpop.xlane.xlu1 %749 }
 0x254   :  { %v752_v44 = vpop.xlane.xlu0 %751  ;;  %881 = vst [vmem:[#allocation2 + $0xb0] sm:$0xff] %v849_v60  ;;  %v780_v45 = vmul.f32 0.6931472, %v1246_v40  ;;  %1255 = vlog2.f32 %v750_v43 }
 0x255   :  { %v834_v2 = vsub.f32 %v1723_v49, %v778_v37  ;;  %1257 = vlog2.f32 %v752_v44 }
 0x256   :  { %v1248_v55 = vpop.eup %1247  ;;  %v835_v51 = vsub.f32 %v1734_v6, %v780_v45 }
 0x257   :  { %v1250_v53 = vpop.eup %1249  ;;  %866 = vst [vmem:[#allocation2 + $0x38] sm:$0xff] %v834_v2  ;;  %v810_v50 = vmul.f32 0.6931472, %v1248_v55  ;;  %v722_v52 = vpop.xlane.xlu1 %721 }
 0x258   :  { %v724_v54 = vpop.xlane.xlu0 %723  ;;  %867 = vst [vmem:[#allocation2 + $0x40] sm:$0xff] %v835_v51  ;;  %v812_v57 = vmul.f32 0.6931472, %v1250_v53  ;;  %1259 = vlog2.f32 %v722_v52 }
 0x259   :  { %v850_v61 = vsub.f32 %v1731_v14, %v810_v50  ;;  %1261 = vlog2.f32 %v724_v54 }
 0x25a   :  { %v1252_v11 = vpop.eup %1251  ;;  %v851_v62 = vsub.f32 %v1742_v16, %v812_v57 }
 0x25b   :  { %v1254_v1 = vpop.eup %1253  ;;  %882 = vst [vmem:[#allocation2 + $0xb8] sm:$0xff] %v850_v61  ;;  %v782_v49 = vmul.f32 0.6931472, %v1252_v11  ;;  %v754_v0 = vpop.xlane.xlu1 %753 }
 0x25c   :  { %v756_v59 = vpop.xlane.xlu0 %755  ;;  %883 = vst [vmem:[#allocation2 + $0xc0] sm:$0xff] %v851_v62  ;;  %v784_v6 = vmul.f32 0.6931472, %v1254_v1  ;;  %1263 = vlog2.f32 %v754_v0 }
 0x25d   :  { %v836_v58 = vsub.f32 %v1739_v28, %v782_v49  ;;  %1265 = vlog2.f32 %v756_v59 }
 0x25e   :  { %v1256_v3 = vpop.eup %1255  ;;  %v837_v8 = vsub.f32 %v1750_v30, %v784_v6 }
 0x25f   :  { %v1258_v12 = vpop.eup %1257  ;;  %868 = vst [vmem:[#allocation2 + $0x48] sm:$0xff] %v836_v58  ;;  %v814_v14 = vmul.f32 0.6931472, %v1256_v3  ;;  %v726_v10 = vpop.xlane.xlu1 %725 }
 0x260   :  { %v728_v13 = vpop.xlane.xlu0 %727  ;;  %869 = vst [vmem:[#allocation2 + $0x50] sm:$0xff] %v837_v8  ;;  %v816_v16 = vmul.f32 0.6931472, %v1258_v12  ;;  %1267 = vlog2.f32 %v726_v10 }
 0x261   :  { %v852_v5 = vsub.f32 %v1747_v35, %v814_v14  ;;  %1269 = vlog2.f32 %v728_v13 }
 0x262   :  { %v1260_v4 = vpop.eup %1259  ;;  %v853_v15 = vsub.f32 %v1758_v42, %v816_v16 }
 0x263   :  { %v1262_v17 = vpop.eup %1261  ;;  %884 = vst [vmem:[#allocation2 + $0xc8] sm:$0xff] %v852_v5  ;;  %v786_v28 = vmul.f32 0.6931472, %v1260_v4  ;;  %v758_v20 = vpop.xlane.xlu1 %757 }
 0x264   :  { %v760_v21 = vpop.xlane.xlu0 %759  ;;  %885 = vst [vmem:[#allocation2 + $0xd0] sm:$0xff] %v853_v15  ;;  %v788_v30 = vmul.f32 0.6931472, %v1262_v17  ;;  %1271 = vlog2.f32 %v758_v20 }
 0x265   :  { %v838_v18 = vsub.f32 %v1755_v46, %v786_v28  ;;  %1273 = vlog2.f32 %v760_v21 }
 0x266   :  { %v1264_v19 = vpop.eup %1263  ;;  %v839_v27 = vsub.f32 %v1766_v56, %v788_v30 }
 0x267   :  { %v1266_v32 = vpop.eup %1265  ;;  %870 = vst [vmem:[#allocation2 + $0x58] sm:$0xff] %v838_v18  ;;  %v818_v35 = vmul.f32 0.6931472, %v1264_v19  ;;  %v730_v23 = vpop.xlane.xlu1 %729 }
 0x268   :  { %871 = vst [vmem:[#allocation2 + $0x60] sm:$0xff] %v839_v27  ;;  %v820_v42 = vmul.f32 0.6931472, %v1266_v32  ;;  %1275 = vlog2.f32 %v730_v23 }
 0x269   :  { %v854_v25 = vsub.f32 %v1763_v63, %v818_v35 }
 0x26a   :  { %v1268_v26 = vpop.eup %1267  ;;  %v855_v33 = vsub.f32 %v1774_v9, %v820_v42 }
 0x26b   :  { %v1270_v29 = vpop.eup %1269  ;;  %886 = vst [vmem:[#allocation2 + $0xd8] sm:$0xff] %v854_v25  ;;  %v790_v34 = vmul.f32 0.6931472, %v1268_v26  ;;  %v762_v46 = vpop.xlane.xlu1 %761 }
 0x26c   :  { %887 = vst [vmem:[#allocation2 + $0xe0] sm:$0xff] %v855_v33  ;;  %v792_v36 = vmul.f32 0.6931472, %v1270_v29  ;;  %1277 = vlog2.f32 %v762_v46 }
 0x26d   :  { %v840_v56 = vsub.f32 %v1771_v7, %v790_v34 }
 0x26e   :  { %v1272_v39 = vpop.eup %1271  ;;  %v841_v48 = vsub.f32 %v1782_v22, %v792_v36 }
 0x26f   :  { %v1274_v41 = vpop.eup %1273  ;;  %872 = vst [vmem:[#allocation2 + $0x68] sm:$0xff] %v840_v56  ;;  %v822_v60 = vmul.f32 0.6931472, %v1272_v39 }
 0x270   :  { %873 = vst [vmem:[#allocation2 + $0x70] sm:$0xff] %v841_v48  ;;  %v824_v63 = vmul.f32 0.6931472, %v1274_v41 }
 0x271   :  { %v856_v40 = vsub.f32 %v1779_v24, %v822_v60 }
 0x272   :  { %v1276_v9 = vpop.eup %1275  ;;  %v857_v37 = vsub.f32 %v1787_v38, %v824_v63 }
 0x273   :  { %888 = vst [vmem:[#allocation2 + $0xe8] sm:$0xff] %v856_v40  ;;  %v794_v43 = vmul.f32 0.6931472, %v1276_v9 }
 0x274   :  { %889 = vst [vmem:[#allocation2 + $0xf0] sm:$0xff] %v857_v37 }
 0x275   :  { %v842_v44 = vsub.f32 %v1790_v31, %v794_v43 }
 0x276   :  { %v1278_v45 = vpop.eup %1277 }
 0x277   :  { %874 = vst [vmem:[#allocation2 + $0x78] sm:$0xff] %v842_v44  ;;  %v826_v7 = vmul.f32 0.6931472, %v1278_v45 }
 0x279   :  { %v858_v22 = vsub.f32 %v1795_v47, %v826_v7 }
 0x27b   :  { %890 = vst [vmem:[#allocation2 + $0xf8] sm:$0xff] %v858_v22 }
 0x27c   :  { %1290 = shalt.err (!%p1287_p4)
}
 0x27d   :  { %s1291_s29 = scalar_lea.hbm %s1845_s3, 4096 }
 0x27e   :  { %p1292_p5 = scmp.ne.s32.totalorder %s1845_s3, %s1291_s29  ;;  %p1295_p6 = scmp.lt.u32.totalorder %s1291_s29, %s1845_s3 }
 0x280   :  { %p1297_p7 = pnand %p1295_p6, %p1292_p5 }
 0x282   :  { %1300 = shalt.err (!%p1297_p7)
}
 0x283   :  { %s1304_s7 = smov 128   ;;  %s1305_s8 = smov 8  }
 0x284   :  { %902 = dma.vmem_to_hbm [thread:$0]  %s897_s2, 4096, %s1845_s3, [#allocation3], %s1304_s7, %s1304_s7, %s1305_s8  }
 0x285   :  { %1301 = dma.done.wait [#allocation3], 4096  }
 0x286   :  { %1302 = vsyncadd [#allocation3], 4294963200 }
 0x287   :  { %906 = vsyncpa [#allocation3], 1 }

// kernel: gcn_forward_padded.3
= control target key start
LH: loop header
LB: loop body
LE: loop exit
PB: predicated region body
PF: predicated region fallthrough
CT: control target
= control target key end

     0   :  { %7 = vsyncpa [#allocation3], 0  ;;  %s4934_s0 = inlined_call_operand.hbm [shape: bf16[256,1536], index: 0, kind: input, shape index: {}]   ;;  %s4935_s1 = inlined_call_operand.hbm [shape: bf16[1536,128], index: 1, kind: input, shape index: {}]   ;;  %s4936_s2 = inlined_call_operand.vmem [shape: bf16[256,128], index: 2, kind: output, shape index: {}]  }
   0x1   :  { %8 = vsyncpa [#allocation5], 0  ;;  %s4649_s9 = smov [#allocation2]   ;;  %s4601_s13 = scalar_lea.hbm %s4934_s0, 24576 }
   0x2   :  { %s14_s10 = sshll.u32 %s4649_s9, 4  ;;  %p4602_p0 = scmp.ne.s32.totalorder %s4934_s0, %s4601_s13  ;;  %s15_s10 = int_to_ptr.vmem [resolvable:$true] %s14_s10 }
   0x3   :  { %p4605_p1 = scmp.lt.u32.totalorder %s4601_s13, %s4934_s0 }
   0x5   :  { %p4607_p2 = pnand %p4605_p1, %p4602_p0 }
   0x7   :  { %4610 = shalt.err (!%p4607_p2)
}
   0x8   :  { %s4611_s18 = scalar_lea.vmem %s15_s10, 24576  ;;  %p4616_p4 = scmp.lt.s32.totalorder %s15_s10, %s15_s10 }
   0x9   :  { %p4612_p3 = scmp.ne.s32.totalorder %s15_s10, %s4611_s18  ;;  %p4617_p5 = scmp.lt.s32.totalorder %s4611_s18, %s4611_s18 }
   0xb   :  { %p4618_p6 = por %p4617_p5, %p4616_p4 }
   0xd   :  { %p4619_p7 = pnand %p4618_p6, %p4612_p3 }
   0xf   :  { %4622 = shalt.err (!%p4619_p7)
}
  0x10   :  { %s4650_s19 = smov 768   ;;  %s4651_s20 = smov 48  }
  0x11   :  { %20 = dma.hbm_to_vmem [thread:$0]  %s4934_s0, 24576, %s15_s10, [#allocation3], %s4650_s19, %s4650_s19, %s4651_s20  }
  0x12   :  { %s4652_s23 = smov [#allocation4]   ;;  %s4623_s27 = scalar_lea.hbm %s4935_s1, 12288 }
  0x13   :  { %s26_s24 = sshll.u32 %s4652_s23, 4  ;;  %p4624_p8 = scmp.ne.s32.totalorder %s4935_s1, %s4623_s27  ;;  %s27_s24 = int_to_ptr.vmem [resolvable:$true] %s26_s24 }
  0x14   :  { %p4627_p9 = scmp.lt.u32.totalorder %s4623_s27, %s4935_s1 }
  0x16   :  { %p4629_p10 = pnand %p4627_p9, %p4624_p8 }
  0x18   :  { %4632 = shalt.err (!%p4629_p10)
}
  0x19   :  { %s4633_s4 = scalar_lea.vmem %s27_s24, 12288  ;;  %p4638_p12 = scmp.lt.s32.totalorder %s27_s24, %s27_s24 }
  0x1a   :  { %p4634_p11 = scmp.ne.s32.totalorder %s27_s24, %s4633_s4  ;;  %p4639_p13 = scmp.lt.s32.totalorder %s4633_s4, %s4633_s4 }
  0x1c   :  { %p4640_p0 = por %p4639_p13, %p4638_p12 }
  0x1e   :  { %p4641_p1 = pnand %p4640_p0, %p4634_p11 }
  0x20   :  { %4644 = shalt.err (!%p4641_p1)
}
  0x21   :  { %s4653_s0 = smov 64   ;;  %s4654_s5 = smov 4  }
  0x22   :  { %32 = dma.hbm_to_vmem [thread:$0]  %s4935_s1, 12288, %s27_s24, [#allocation5], %s4653_s0, %s4653_s0, %s4654_s5  }
  0x23   :  { %4645 = dma.done.wait [#allocation3], 24576  }
  0x24   :  { %4646 = vsyncadd [#allocation3], 4294942720 }
  0x25   :  { %4647 = dma.done.wait [#allocation5], 12288  }
  0x26   :  { %4648 = vsyncadd [#allocation5], 4294955008  ;;  %v4217_v0 = vld [vmem:[#allocation4 + $0x40] sm:$0xff]   ;;  %v4221_v4 = vld [vmem:[#allocation4 + $0x48] sm:$0xff]  }
  0x27   :  { %v4218_v1 = vld [vmem:[#allocation4 + $0xc0] sm:$0xff]   ;;  %3539 = vmatprep.subr.bf16.mxu0 %v4217_v0  ;;  %v4222_v5 = vld [vmem:[#allocation4 + $0xc8] sm:$0xff]   ;;  %v4225_v8 = vld [vmem:[#allocation4 + $0x50] sm:$0xff]  }
  0x28   :  { %v4219_v2 = vld [vmem:[#allocation4] sm:$0xff]   ;;  %3651 = vmatprep.subr.bf16.mxu1 %v4218_v1  ;;  %v4223_v6 = vld [vmem:[#allocation4 + $0x8] sm:$0xff]   ;;  %v4226_v9 = vld [vmem:[#allocation4 + $0xd0] sm:$0xff]  }
  0x29   :  { %v4220_v3 = vld [vmem:[#allocation4 + $0x80] sm:$0xff]   ;;  %3540 = vmatpush3.bf16.msra.mxu0 %v4219_v2  ;;  %v4224_v7 = vld [vmem:[#allocation4 + $0x88] sm:$0xff]   ;;  %v4227_v10 = vld [vmem:[#allocation4 + $0x10] sm:$0xff]  }
  0x2a   :  { %3652 = vmatpush3.bf16.msra.mxu1 %v4220_v3  ;;  %3541 = vmatprep.subr.bf16.mxu0 %v4221_v4  ;;  %v4228_v11 = vld [vmem:[#allocation4 + $0x90] sm:$0xff]   ;;  %v4229_v12 = vld [vmem:[#allocation4 + $0x58] sm:$0xff]   ;;  %v4233_v16 = vld [vmem:[#allocation4 + $0x60] sm:$0xff]  }
  0x2b   :  { %3653 = vmatprep.subr.bf16.mxu1 %v4222_v5  ;;  %v4230_v13 = vld [vmem:[#allocation4 + $0xd8] sm:$0xff]   ;;  %v4234_v17 = vld [vmem:[#allocation4 + $0xe0] sm:$0xff]   ;;  %v4237_v20 = vld [vmem:[#allocation4 + $0x68] sm:$0xff]  }
  0x2c   :  { %v4231_v14 = vld [vmem:[#allocation4 + $0x18] sm:$0xff]   ;;  %v4235_v18 = vld [vmem:[#allocation4 + $0x20] sm:$0xff]   ;;  %v4238_v21 = vld [vmem:[#allocation4 + $0xe8] sm:$0xff]  }
  0x2d   :  { %3542 = vmatpush3.bf16.msra.mxu0 %v4223_v6  ;;  %v4232_v15 = vld [vmem:[#allocation4 + $0x98] sm:$0xff]   ;;  %v4236_v19 = vld [vmem:[#allocation4 + $0xa0] sm:$0xff]   ;;  %v4239_v22 = vld [vmem:[#allocation4 + $0x28] sm:$0xff]  }
  0x2e   :  { %3654 = vmatpush3.bf16.msra.mxu1 %v4224_v7  ;;  %3543 = vmatprep.subr.bf16.mxu0 %v4225_v8  ;;  %v4240_v23 = vld [vmem:[#allocation4 + $0xa8] sm:$0xff]   ;;  %v4241_v24 = vld [vmem:[#allocation4 + $0x70] sm:$0xff]   ;;  %v4245_v28 = vld [vmem:[#allocation4 + $0x78] sm:$0xff]  }
  0x2f   :  { %3655 = vmatprep.subr.bf16.mxu1 %v4226_v9  ;;  %v4242_v25 = vld [vmem:[#allocation4 + $0xf0] sm:$0xff]   ;;  %v4246_v29 = vld [vmem:[#allocation4 + $0xf8] sm:$0xff]   ;;  %v4255_v36 = vld [vmem:[#allocation4 + $0x140] sm:$0xff]  }
  0x30   :  { %v4243_v26 = vld [vmem:[#allocation4 + $0x30] sm:$0xff]   ;;  %v4247_v30 = vld [vmem:[#allocation4 + $0x38] sm:$0xff]   ;;  %v4256_v37 = vld [vmem:[#allocation4 + $0x100] sm:$0xff]  }
  0x31   :  { %3544 = vmatpush3.bf16.msra.mxu0 %v4227_v10  ;;  %v4244_v27 = vld [vmem:[#allocation4 + $0xb0] sm:$0xff]   ;;  %v4248_v31 = vld [vmem:[#allocation4 + $0xb8] sm:$0xff]   ;;  %v4257_v38 = vld [vmem:[#allocation4 + $0x1c0] sm:$0xff]  }
  0x32   :  { %3656 = vmatpush3.bf16.msra.mxu1 %v4228_v11  ;;  %3545 = vmatprep.subr.bf16.mxu0 %v4229_v12  ;;  %v4249_v32 = vld [vmem:[#allocation2] ss:$48 sps:$4 sm:$0xff]   ;;  %v4251_v33 = vld [vmem:[#allocation2 + $0x4] ss:$48 sps:$4 sm:$0xff]   ;;  %v4252_v34 = vld [vmem:[#allocation2 + $0x8] ss:$48 sps:$4 sm:$0xff]  }
  0x33   :  { %3657 = vmatprep.subr.bf16.mxu1 %v4230_v13  ;;  %v4254_v35 = vld [vmem:[#allocation2 + $0xc] ss:$48 sps:$4 sm:$0xff]   ;;  %1992 = vmatprep.mubr.bf16.mxu0 %v4251_v33  ;;  %v4258_v39 = vld [vmem:[#allocation4 + $0x180] sm:$0xff]   ;;  %v4264_v43 = vld [vmem:[#allocation2 + $0x68] ss:$48 sps:$4 sm:$0xff]  }
  0x34   :  { %2153 = vmatprep.mubr.bf16.mxu1 %v4254_v35  ;;  %v4259_v40 = vld [vmem:[#allocation2 + $0x64] ss:$48 sps:$4 sm:$0xff]   ;;  %v4261_v41 = vld [vmem:[#allocation2 + $0x6c] ss:$48 sps:$4 sm:$0xff]   ;;  %v4263_v42 = vld [vmem:[#allocation2 + $0x60] ss:$48 sps:$4 sm:$0xff]  }
  0x35   :  { %3546 = vmatpush3.bf16.msra.mxu0 %v4231_v14  ;;  %v4265_v44 = vld [vmem:[#allocation2 + $0xc4] ss:$48 sps:$4 sm:$0xff]   ;;  %v4267_v45 = vld [vmem:[#allocation2 + $0xcc] ss:$48 sps:$4 sm:$0xff]   ;;  %v4269_v48 = vld [vmem:[#allocation2 + $0xc0] ss:$48 sps:$4 sm:$0xff]  }
  0x36   :  { %3658 = vmatpush3.bf16.msra.mxu1 %v4232_v15  ;;  %3547 = vmatprep.subr.bf16.mxu0 %v4233_v16  ;;  %v4271_v46 = vld [vmem:[#allocation4 + $0x148] sm:$0xff]   ;;  %v4275_v52 = vld [vmem:[#allocation2 + $0x124] ss:$48 sps:$4 sm:$0xff]   ;;  %v4279_v54 = vld [vmem:[#allocation2 + $0x120] ss:$48 sps:$4 sm:$0xff]  }
  0x37   :  { %3659 = vmatprep.subr.bf16.mxu1 %v4234_v17  ;;  %v4272_v47 = vld [vmem:[#allocation4 + $0x108] sm:$0xff]   ;;  %v4287_v55 = vld [vmem:[#allocation4 + $0x150] sm:$0xff]   ;;  %v4303_v1 = vld [vmem:[#allocation4 + $0x158] sm:$0xff]  }
  0x38   :  { %v4273_v49 = vld [vmem:[#allocation4 + $0x1c8] sm:$0xff]   ;;  %v4281_v57 = vld [vmem:[#allocation2 + $0x184] ss:$48 sps:$4 sm:$0xff]   ;;  %v4285_v62 = vld [vmem:[#allocation2 + $0x180] ss:$48 sps:$4 sm:$0xff]  }
  0x39   :  { %3548 = vmatpush3.bf16.msra.mxu0 %v4235_v18  ;;  %v4274_v50 = vld [vmem:[#allocation4 + $0x188] sm:$0xff]   ;;  %v4288_v58 = vld [vmem:[#allocation4 + $0x110] sm:$0xff]   ;;  %v4304_v3 = vld [vmem:[#allocation4 + $0x118] sm:$0xff]  }
  0x3a   :  { %3660 = vmatpush3.bf16.msra.mxu1 %v4236_v19  ;;  %3549 = vmatprep.subr.bf16.mxu0 %v4237_v20  ;;  %v4270_v51 = vld [vmem:[#allocation2 + $0xc8] ss:$48 sps:$4 sm:$0xff]   ;;  %v4277_v53 = vld [vmem:[#allocation2 + $0x12c] ss:$48 sps:$4 sm:$0xff]   ;;  %v4289_v59 = vld [vmem:[#allocation4 + $0x1d0] sm:$0xff]  }
  0x3b   :  { %3661 = vmatprep.subr.bf16.mxu1 %v4238_v21  ;;  %v4280_v56 = vld [vmem:[#allocation2 + $0x128] ss:$48 sps:$4 sm:$0xff]   ;;  %v4290_v60 = vld [vmem:[#allocation4 + $0x190] sm:$0xff]   ;;  %v4283_v61 = vld [vmem:[#allocation2 + $0x18c] ss:$48 sps:$4 sm:$0xff]  }
  0x3c   :  { %v4286_v63 = vld [vmem:[#allocation2 + $0x188] ss:$48 sps:$4 sm:$0xff]   ;;  %v4291_v0 = vld [vmem:[#allocation2 + $0x1e4] ss:$48 sps:$4 sm:$0xff]   ;;  %v4293_v2 = vld [vmem:[#allocation2 + $0x1ec] ss:$48 sps:$4 sm:$0xff]  }
  0x3d   :  { %3550 = vmatpush3.bf16.msra.mxu0 %v4239_v22  ;;  %v4305_v4 = vld [vmem:[#allocation4 + $0x1d8] sm:$0xff]   ;;  %v4295_v6 = vld [vmem:[#allocation2 + $0x1e0] ss:$48 sps:$4 sm:$0xff]   ;;  %v4297_v8 = vld [vmem:[#allocation2 + $0x244] ss:$48 sps:$4 sm:$0xff]  }
  0x3e   :  { %3662 = vmatpush3.bf16.msra.mxu1 %v4240_v23  ;;  %3551 = vmatprep.subr.bf16.mxu0 %v4241_v24  ;;  %v4306_v5 = vld [vmem:[#allocation4 + $0x198] sm:$0xff]   ;;  %v4319_v10 = vld [vmem:[#allocation4 + $0x160] sm:$0xff]   ;;  %v4335_v18 = vld [vmem:[#allocation4 + $0x168] sm:$0xff]  }
  0x3f   :  { %3663 = vmatprep.subr.bf16.mxu1 %v4242_v25  ;;  %v4296_v7 = vld [vmem:[#allocation2 + $0x1e8] ss:$48 sps:$4 sm:$0xff]   ;;  %v4299_v9 = vld [vmem:[#allocation2 + $0x24c] ss:$48 sps:$4 sm:$0xff]   ;;  %v4320_v11 = vld [vmem:[#allocation4 + $0x120] sm:$0xff]  }
  0x40   :  { %v4321_v12 = vld [vmem:[#allocation4 + $0x1e0] sm:$0xff]   ;;  %v4302_v15 = vld [vmem:[#allocation2 + $0x248] ss:$48 sps:$4 sm:$0xff]   ;;  %v4309_v17 = vld [vmem:[#allocation2 + $0x2ac] ss:$48 sps:$4 sm:$0xff]  }
  0x41   :  { %3552 = vmatpush3.bf16.msra.mxu0 %v4243_v26  ;;  %v4322_v13 = vld [vmem:[#allocation4 + $0x1a0] sm:$0xff]   ;;  %v4336_v19 = vld [vmem:[#allocation4 + $0x128] sm:$0xff]   ;;  %v4351_v26 = vld [vmem:[#allocation4 + $0x170] sm:$0xff]  }
  0x42   :  { %3664 = vmatpush3.bf16.msra.mxu1 %v4244_v27  ;;  %3553 = vmatprep.subr.bf16.mxu0 %v4245_v28  ;;  %v4301_v14 = vld [vmem:[#allocation2 + $0x240] ss:$48 sps:$4 sm:$0xff]   ;;  %v4307_v16 = vld [vmem:[#allocation2 + $0x2a4] ss:$48 sps:$4 sm:$0xff]   ;;  %v4337_v20 = vld [vmem:[#allocation4 + $0x1e8] sm:$0xff]  }
  0x43   :  { %3665 = vmatprep.subr.bf16.mxu1 %v4246_v29  ;;  %v4338_v21 = vld [vmem:[#allocation4 + $0x1a8] sm:$0xff]   ;;  %v4311_v22 = vld [vmem:[#allocation2 + $0x2a0] ss:$48 sps:$4 sm:$0xff]   ;;  %v4313_v24 = vld [vmem:[#allocation2 + $0x304] ss:$48 sps:$4 sm:$0xff]  }
  0x44   :  { %v4312_v23 = vld [vmem:[#allocation2 + $0x2a8] ss:$48 sps:$4 sm:$0xff]   ;;  %v4315_v25 = vld [vmem:[#allocation2 + $0x30c] ss:$48 sps:$4 sm:$0xff]   ;;  %v4352_v27 = vld [vmem:[#allocation4 + $0x130] sm:$0xff]  }
  0x45   :  { %3554 = vmatpush3.bf16.msra.mxu0 %v4247_v30  ;;  %v4353_v28 = vld [vmem:[#allocation4 + $0x1f0] sm:$0xff]   ;;  %v4325_v33 = vld [vmem:[#allocation2 + $0x36c] ss:$48 sps:$4 sm:$0xff]  }
  0x46   :  { %3666 = vmatpush3.bf16.msra.mxu1 %v4248_v31  ;;  %3763 = vmatprep.subr.bf16.mxu0 %v4255_v36  ;;  %v4354_v29 = vld [vmem:[#allocation4 + $0x1b0] sm:$0xff]   ;;  %v4318_v31 = vld [vmem:[#allocation2 + $0x308] ss:$48 sps:$4 sm:$0xff]  }
  0x47   :  { %3875 = vmatprep.subr.bf16.mxu1 %v4257_v38  ;;  %v4317_v30 = vld [vmem:[#allocation2 + $0x300] ss:$48 sps:$4 sm:$0xff]   ;;  %v4368_v35 = vld [vmem:[#allocation4 + $0x138] sm:$0xff]  }
  0x48   :  { %1993 = vmatmul.mubr.bf16.vlgmr.msra.gmra.mrb[0].mxu0 %v4249_v32  ;;  %v4323_v32 = vld [vmem:[#allocation2 + $0x364] ss:$48 sps:$4 sm:$0xff]   ;;  %v4327_v36 = vld [vmem:[#allocation2 + $0x360] ss:$48 sps:$4 sm:$0xff]   ;;  %v4370_v38 = vld [vmem:[#allocation4 + $0x1b8] sm:$0xff]  }
  0x49   :  { %2154 = vmatmul.mubr.bf16.vlgmr.msra.gmra.mrb[0].mxu1 %v4252_v34  ;;  %3764 = vmatpush3.bf16.msra.mxu0 %v4256_v37  ;;  %v4367_v34 = vld [vmem:[#allocation4 + $0x178] sm:$0xff]  }
  0x4a   :  { %3876 = vmatpush3.bf16.msra.mxu1 %v4258_v39  ;;  %2000 = vmatprep.mubr.bf16.mxu0 %v4259_v40  ;;  %v4369_v37 = vld [vmem:[#allocation4 + $0x1f8] sm:$0xff]   ;;  %v4329_v40 = vld [vmem:[#allocation2 + $0x3c4] ss:$48 sps:$4 sm:$0xff]  }
  0x4b   :  { %2161 = vmatprep.mubr.bf16.mxu1 %v4261_v41  ;;  %3765 = vmatprep.subr.bf16.mxu0 %v4271_v46  ;;  %v4328_v39 = vld [vmem:[#allocation2 + $0x368] ss:$48 sps:$4 sm:$0xff]   ;;  %v4331_v41 = vld [vmem:[#allocation2 + $0x3cc] ss:$48 sps:$4 sm:$0xff]   ;;  %v4339_v46 = vld [vmem:[#allocation2 + $0x424] ss:$48 sps:$4 sm:$0xff]  }
  0x4c   :  { %3877 = vmatprep.subr.bf16.mxu1 %v4273_v49  ;;  %v4344_v49 = vld [vmem:[#allocation2 + $0x428] ss:$48 sps:$4 sm:$0xff]  }
  0x4d   :  { %3766 = vmatpush3.bf16.msra.mxu0 %v4272_v47  ;;  %v4341_v47 = vld [vmem:[#allocation2 + $0x42c] ss:$48 sps:$4 sm:$0xff]  }
  0x4e   :  { %3878 = vmatpush3.bf16.msra.mxu1 %v4274_v50  ;;  %3767 = vmatprep.subr.bf16.mxu0 %v4287_v55  ;;  %v4345_v50 = vld [vmem:[#allocation2 + $0x484] ss:$48 sps:$4 sm:$0xff]   ;;  %v4357_v55 = vld [vmem:[#allocation2 + $0x4ec] ss:$48 sps:$4 sm:$0xff]  }
  0x4f   :  { %3879 = vmatprep.subr.bf16.mxu1 %v4289_v59  ;;  %v4363_v59 = vld [vmem:[#allocation2 + $0x54c] ss:$48 sps:$4 sm:$0xff]  }
  0x50   :  { %2001 = vmatmul.mubr.bf16.gmra.mrb[4].mxu0 %v4263_v42  ;;  %v4333_v42 = vld [vmem:[#allocation2 + $0x3c0] ss:$48 sps:$4 sm:$0xff]  }
  0x51   :  { %2162 = vmatmul.mubr.bf16.gmra.mrb[4].mxu1 %v4264_v43  ;;  %2008 = vmatprep.mubr.bf16.mxu0 %v4265_v44  ;;  %v4383_v43 = vld [vmem:[#allocation4 + $0x240] sm:$0xff]   ;;  %v4334_v44 = vld [vmem:[#allocation2 + $0x3c8] ss:$48 sps:$4 sm:$0xff]  }
  0x52   :  { %2169 = vmatprep.mubr.bf16.mxu1 %v4267_v45  ;;  %3768 = vmatpush3.bf16.msra.mxu0 %v4288_v58  ;;  %v4385_v45 = vld [vmem:[#allocation4 + $0x2c0] sm:$0xff]  }
  0x53   :  { %3880 = vmatpush3.bf16.msra.mxu1 %v4290_v60  ;;  %3769 = vmatprep.subr.bf16.mxu0 %v4303_v1  ;;  %v4361_v58 = vld [vmem:[#allocation2 + $0x544] ss:$48 sps:$4 sm:$0xff]   ;;  %v4365_v60 = vld [vmem:[#allocation2 + $0x540] ss:$48 sps:$4 sm:$0xff]   ;;  %v4376_v1 = vld [vmem:[#allocation2 + $0x5a8] ss:$48 sps:$4 sm:$0xff]  }
  0x54   :  { %3881 = vmatprep.subr.bf16.mxu1 %v4305_v4  ;;  %v4377_v4 = vld [vmem:[#allocation2 + $0x10] ss:$48 sps:$4 sm:$0xff]  }
  0x56   :  { %3770 = vmatpush3.bf16.msra.mxu0 %v4304_v3  ;;  %v4382_v3 = vld [vmem:[#allocation2 + $0x1c] ss:$48 sps:$4 sm:$0xff]  }
  0x57   :  { %3882 = vmatpush3.bf16.msra.mxu1 %v4306_v5  ;;  %3771 = vmatprep.subr.bf16.mxu0 %v4319_v10  ;;  %v4380_v5 = vld [vmem:[#allocation2 + $0x18] ss:$48 sps:$4 sm:$0xff]  }
  0x58   :  { %2009 = vmatmul.mubr.bf16.gmra.mrb[8].mxu0 %v4269_v48  ;;  %3883 = vmatprep.subr.bf16.mxu1 %v4321_v12  ;;  %v4343_v48 = vld [vmem:[#allocation2 + $0x420] ss:$48 sps:$4 sm:$0xff]   ;;  %v4399_v10 = vld [vmem:[#allocation4 + $0x248] sm:$0xff]  }
  0x59   :  { %2170 = vmatmul.mubr.bf16.gmra.mrb[8].mxu1 %v4270_v51  ;;  %2016 = vmatprep.mubr.bf16.mxu0 %v4275_v52  ;;  %v4347_v51 = vld [vmem:[#allocation2 + $0x48c] ss:$48 sps:$4 sm:$0xff]   ;;  %v4349_v52 = vld [vmem:[#allocation2 + $0x480] ss:$48 sps:$4 sm:$0xff]  }
  0x5a   :  { %2177 = vmatprep.mubr.bf16.mxu1 %v4277_v53  ;;  %3772 = vmatpush3.bf16.msra.mxu0 %v4320_v11  ;;  %v4350_v53 = vld [vmem:[#allocation2 + $0x488] ss:$48 sps:$4 sm:$0xff]  }
  0x5b   :  { %3884 = vmatpush3.bf16.msra.mxu1 %v4322_v13  ;;  %3773 = vmatprep.subr.bf16.mxu0 %v4335_v18  ;;  %v4400_v11 = vld [vmem:[#allocation4 + $0x208] sm:$0xff]   ;;  %v4393_v18 = vld [vmem:[#allocation2 + $0xd4] ss:$48 sps:$4 sm:$0xff]  }
  0x5c   :  { %3885 = vmatprep.subr.bf16.mxu1 %v4337_v20  ;;  %v4401_v12 = vld [vmem:[#allocation4 + $0x2c8] sm:$0xff]   ;;  %v4416_v20 = vld [vmem:[#allocation4 + $0x210] sm:$0xff]  }
  0x5d   :  { %v4402_v13 = vld [vmem:[#allocation4 + $0x288] sm:$0xff]  }
  0x5e   :  { %3774 = vmatpush3.bf16.msra.mxu0 %v4336_v19  ;;  %v4395_v19 = vld [vmem:[#allocation2 + $0xdc] ss:$48 sps:$4 sm:$0xff]  }
  0x5f   :  { %3886 = vmatpush3.bf16.msra.mxu1 %v4338_v21  ;;  %3775 = vmatprep.subr.bf16.mxu0 %v4351_v26  ;;  %v4418_v21 = vld [vmem:[#allocation4 + $0x290] sm:$0xff]   ;;  %v4434_v26 = vld [vmem:[#allocation4 + $0x298] sm:$0xff]  }
  0x60   :  { %2017 = vmatmul.mubr.bf16.gmra.mrb[12].mxu0 %v4279_v54  ;;  %3887 = vmatprep.subr.bf16.mxu1 %v4353_v28  ;;  %v4355_v54 = vld [vmem:[#allocation2 + $0x4e4] ss:$48 sps:$4 sm:$0xff]  }
  0x61   :  { %2178 = vmatmul.mubr.bf16.gmra.mrb[12].mxu1 %v4280_v56  ;;  %2024 = vmatprep.mubr.bf16.mxu0 %v4281_v57  ;;  %v4359_v56 = vld [vmem:[#allocation2 + $0x4e0] ss:$48 sps:$4 sm:$0xff]   ;;  %v4360_v57 = vld [vmem:[#allocation2 + $0x4e8] ss:$48 sps:$4 sm:$0xff]   ;;  %v4403_v28 = vld [vmem:[#allocation2 + $0x134] ss:$48 sps:$4 sm:$0xff]  }
  0x62   :  { %2185 = vmatprep.mubr.bf16.mxu1 %v4283_v61  ;;  %3776 = vmatpush3.bf16.msra.mxu0 %v4352_v27  ;;  %v4366_v61 = vld [vmem:[#allocation2 + $0x548] ss:$48 sps:$4 sm:$0xff]  }
  0x63   :  { %3888 = vmatpush3.bf16.msra.mxu1 %v4354_v29  ;;  %3777 = vmatprep.subr.bf16.mxu0 %v4367_v34  ;;  %v4398_v27 = vld [vmem:[#allocation2 + $0xd8] ss:$48 sps:$4 sm:$0xff]   ;;  %v4447_v29 = vld [vmem:[#allocation4 + $0x260] sm:$0xff]  }
  0x64   :  { %3889 = vmatprep.subr.bf16.mxu1 %v4369_v37  ;;  %v4463_v34 = vld [vmem:[#allocation4 + $0x268] sm:$0xff]  }
  0x65   :  { %v4464_v37 = vld [vmem:[#allocation4 + $0x228] sm:$0xff]  }
  0x66   :  { %3778 = vmatpush3.bf16.msra.mxu0 %v4368_v35  ;;  %v4465_v35 = vld [vmem:[#allocation4 + $0x2e8] sm:$0xff]  }
  0x67   :  { %3890 = vmatpush3.bf16.msra.mxu1 %v4370_v38  ;;  %3987 = vmatprep.subr.bf16.mxu0 %v4383_v43  ;;  %v4408_v38 = vld [vmem:[#allocation2 + $0x138] ss:$48 sps:$4 sm:$0xff]   ;;  %v4411_v43 = vld [vmem:[#allocation2 + $0x19c] ss:$48 sps:$4 sm:$0xff]  }
  0x68   :  { %2025 = vmatmul.mubr.bf16.gmra.mrb[16].mxu0 %v4285_v62  ;;  %4099 = vmatprep.subr.bf16.mxu1 %v4385_v45  ;;  %v4371_v62 = vld [vmem:[#allocation2 + $0x5a4] ss:$48 sps:$4 sm:$0xff]  }
  0x69   :  { %2186 = vmatmul.mubr.bf16.gmra.mrb[16].mxu1 %v4286_v63  ;;  %2032 = vmatprep.mubr.bf16.mxu0 %v4291_v0  ;;  %v4373_v63 = vld [vmem:[#allocation2 + $0x5ac] ss:$48 sps:$4 sm:$0xff]   ;;  %v4375_v0 = vld [vmem:[#allocation2 + $0x5a0] ss:$48 sps:$4 sm:$0xff]  }
  0x6a   :  { %2193 = vmatprep.mubr.bf16.mxu1 %v4293_v2  ;;  %v4379_v2 = vld [vmem:[#allocation2 + $0x14] ss:$48 sps:$4 sm:$0xff]  }
  0x6b   :  { %v4482_v45 = vld [vmem:[#allocation4 + $0x2b0] sm:$0xff]  }
  0x70   :  { %2033 = vmatmul.mubr.bf16.gmra.mrb[20].mxu0 %v4295_v6  ;;  %v4384_v6 = vld [vmem:[#allocation4 + $0x200] sm:$0xff]  }
  0x71   :  { %2194 = vmatmul.mubr.bf16.gmra.mrb[20].mxu1 %v4296_v7  ;;  %2040 = vmatprep.mubr.bf16.mxu0 %v4297_v8  ;;  %v4386_v7 = vld [vmem:[#allocation4 + $0x280] sm:$0xff]  }
  0x72   :  { %2201 = vmatprep.mubr.bf16.mxu1 %v4299_v9  ;;  %v4387_v8 = vld [vmem:[#allocation2 + $0x74] ss:$48 sps:$4 sm:$0xff]   ;;  %v4389_v9 = vld [vmem:[#allocation2 + $0x7c] ss:$48 sps:$4 sm:$0xff]  }
  0x78   :  { %2041 = vmatmul.mubr.bf16.gmra.mrb[24].mxu0 %v4301_v14  ;;  %v4391_v14 = vld [vmem:[#allocation2 + $0x70] ss:$48 sps:$4 sm:$0xff]  }
  0x79   :  { %2202 = vmatmul.mubr.bf16.gmra.mrb[24].mxu1 %v4302_v15  ;;  %2048 = vmatprep.mubr.bf16.mxu0 %v4307_v16  ;;  %v4415_v15 = vld [vmem:[#allocation4 + $0x250] sm:$0xff]   ;;  %v4392_v16 = vld [vmem:[#allocation2 + $0x78] ss:$48 sps:$4 sm:$0xff]  }
  0x7a   :  { %2209 = vmatprep.mubr.bf16.mxu1 %v4309_v17  ;;  %v4417_v17 = vld [vmem:[#allocation4 + $0x2d0] sm:$0xff]  }
  0x80   :  { %2049 = vmatmul.mubr.bf16.gmra.mrb[28].mxu0 %v4311_v22  ;;  %v4431_v22 = vld [vmem:[#allocation4 + $0x258] sm:$0xff]  }
  0x81   :  { %2210 = vmatmul.mubr.bf16.gmra.mrb[28].mxu1 %v4312_v23  ;;  %2056 = vmatprep.mubr.bf16.mxu0 %v4313_v24  ;;  %v4433_v23 = vld [vmem:[#allocation4 + $0x2d8] sm:$0xff]   ;;  %v4397_v24 = vld [vmem:[#allocation2 + $0xd0] ss:$48 sps:$4 sm:$0xff]  }
  0x82   :  { %2217 = vmatprep.mubr.bf16.mxu1 %v4315_v25  ;;  %v4432_v25 = vld [vmem:[#allocation4 + $0x218] sm:$0xff]  }
  0x88   :  { %2057 = vmatmul.mubr.bf16.gmra.mrb[32].mxu0 %v4317_v30  ;;  %v4405_v30 = vld [vmem:[#allocation2 + $0x13c] ss:$48 sps:$4 sm:$0xff]  }
  0x89   :  { %2218 = vmatmul.mubr.bf16.gmra.mrb[32].mxu1 %v4318_v31  ;;  %2064 = vmatprep.mubr.bf16.mxu0 %v4323_v32  ;;  %v4449_v31 = vld [vmem:[#allocation4 + $0x2e0] sm:$0xff]  }
  0x8a   :  { %2225 = vmatprep.mubr.bf16.mxu1 %v4325_v33  ;;  %v4448_v32 = vld [vmem:[#allocation4 + $0x220] sm:$0xff]  }
  0x8b   :  { %v4450_v33 = vld [vmem:[#allocation4 + $0x2a0] sm:$0xff]  }
  0x90   :  { %2065 = vmatmul.mubr.bf16.gmra.mrb[36].mxu0 %v4327_v36  ;;  %v4407_v36 = vld [vmem:[#allocation2 + $0x130] ss:$48 sps:$4 sm:$0xff]  }
  0x91   :  { %2226 = vmatmul.mubr.bf16.gmra.mrb[36].mxu1 %v4328_v39  ;;  %2072 = vmatprep.mubr.bf16.mxu0 %v4329_v40  ;;  %v4409_v39 = vld [vmem:[#allocation2 + $0x194] ss:$48 sps:$4 sm:$0xff]   ;;  %v4466_v40 = vld [vmem:[#allocation4 + $0x2a8] sm:$0xff]  }
  0x92   :  { %2233 = vmatprep.mubr.bf16.mxu1 %v4331_v41  ;;  %v4479_v41 = vld [vmem:[#allocation4 + $0x270] sm:$0xff]  }
  0x98   :  { %2073 = vmatmul.mubr.bf16.gmra.mrb[40].mxu0 %v4333_v42  ;;  %v4481_v42 = vld [vmem:[#allocation4 + $0x2f0] sm:$0xff]  }
  0x99   :  { %2234 = vmatmul.mubr.bf16.gmra.mrb[40].mxu1 %v4334_v44  ;;  %2080 = vmatprep.mubr.bf16.mxu0 %v4339_v46  ;;  %v4480_v44 = vld [vmem:[#allocation4 + $0x230] sm:$0xff]   ;;  %v4495_v46 = vld [vmem:[#allocation4 + $0x278] sm:$0xff]  }
  0x9a   :  { %2241 = vmatprep.mubr.bf16.mxu1 %v4341_v47  ;;  %v4497_v47 = vld [vmem:[#allocation4 + $0x2f8] sm:$0xff]  }
  0xa0   :  { %2081 = vmatmul.mubr.bf16.gmra.mrb[44].mxu0 %v4343_v48  ;;  %v4413_v48 = vld [vmem:[#allocation2 + $0x190] ss:$48 sps:$4 sm:$0xff]  }
  0xa1   :  { %2242 = vmatmul.mubr.bf16.gmra.mrb[44].mxu1 %v4344_v49  ;;  %2088 = vmatprep.mubr.bf16.mxu0 %v4345_v50  ;;  %v4496_v49 = vld [vmem:[#allocation4 + $0x238] sm:$0xff]  }
  0xa2   :  { %2249 = vmatprep.mubr.bf16.mxu1 %v4347_v51  ;;  %v4414_v50 = vld [vmem:[#allocation2 + $0x198] ss:$48 sps:$4 sm:$0xff]   ;;  %v4419_v51 = vld [vmem:[#allocation2 + $0x1f4] ss:$48 sps:$4 sm:$0xff]  }
  0xa8   :  { %2089 = vmatmul.mubr.bf16.gmra.mrb[48].mxu0 %v4349_v52  ;;  %v4498_v52 = vld [vmem:[#allocation4 + $0x2b8] sm:$0xff]  }
  0xa9   :  { %2250 = vmatmul.mubr.bf16.gmra.mrb[48].mxu1 %v4350_v53  ;;  %2096 = vmatprep.mubr.bf16.mxu0 %v4355_v54  ;;  %v4421_v53 = vld [vmem:[#allocation2 + $0x1fc] ss:$48 sps:$4 sm:$0xff]   ;;  %v4423_v54 = vld [vmem:[#allocation2 + $0x1f0] ss:$48 sps:$4 sm:$0xff]  }
  0xaa   :  { %2257 = vmatprep.mubr.bf16.mxu1 %v4357_v55  ;;  %v4424_v55 = vld [vmem:[#allocation2 + $0x1f8] ss:$48 sps:$4 sm:$0xff]  }
  0xb0   :  { %2097 = vmatmul.mubr.bf16.gmra.mrb[52].mxu0 %v4359_v56  ;;  %v4425_v56 = vld [vmem:[#allocation2 + $0x254] ss:$48 sps:$4 sm:$0xff]  }
  0xb1   :  { %2258 = vmatmul.mubr.bf16.gmra.mrb[52].mxu1 %v4360_v57  ;;  %2104 = vmatprep.mubr.bf16.mxu0 %v4361_v58  ;;  %v4427_v57 = vld [vmem:[#allocation2 + $0x25c] ss:$48 sps:$4 sm:$0xff]   ;;  %v4429_v58 = vld [vmem:[#allocation2 + $0x250] ss:$48 sps:$4 sm:$0xff]  }
  0xb2   :  { %2265 = vmatprep.mubr.bf16.mxu1 %v4363_v59  ;;  %v4430_v59 = vld [vmem:[#allocation2 + $0x258] ss:$48 sps:$4 sm:$0xff]  }
  0xb8   :  { %2105 = vmatmul.mubr.bf16.gmra.mrb[56].mxu0 %v4365_v60  ;;  %v4435_v60 = vld [vmem:[#allocation2 + $0x2b4] ss:$48 sps:$4 sm:$0xff]  }
  0xb9   :  { %2266 = vmatmul.mubr.bf16.gmra.mrb[56].mxu1 %v4366_v61  ;;  %2112 = vmatprep.mubr.bf16.mxu0 %v4371_v62  ;;  %v4437_v61 = vld [vmem:[#allocation2 + $0x2bc] ss:$48 sps:$4 sm:$0xff]   ;;  %v4439_v62 = vld [vmem:[#allocation2 + $0x2b0] ss:$48 sps:$4 sm:$0xff]  }
  0xba   :  { %2273 = vmatprep.mubr.bf16.mxu1 %v4373_v63  ;;  %v4440_v63 = vld [vmem:[#allocation2 + $0x2b8] ss:$48 sps:$4 sm:$0xff]  }
  0xc0   :  { %2113 = vmatmul.mubr.bf16.gmra.mrb[60].mxu0 %v4375_v0  ;;  %v4441_v0 = vld [vmem:[#allocation2 + $0x314] ss:$48 sps:$4 sm:$0xff]  }
  0xc1   :  { %2274 = vmatmul.mubr.bf16.gmra.mrb[60].mxu1 %v4376_v1  ;;  %2314 = vmatprep.mubr.bf16.mxu0 %v4379_v2  ;;  %v4443_v1 = vld [vmem:[#allocation2 + $0x31c] ss:$48 sps:$4 sm:$0xff]   ;;  %v4445_v2 = vld [vmem:[#allocation2 + $0x310] ss:$48 sps:$4 sm:$0xff]  }
  0xc2   :  { %2475 = vmatprep.mubr.bf16.mxu1 %v4382_v3  ;;  %v4446_v3 = vld [vmem:[#allocation2 + $0x318] ss:$48 sps:$4 sm:$0xff]  }
  0xc8   :  { %2315 = vmatmul.mubr.bf16.vlgmr.msra.gmra.mrb[64].mxu0 %v4377_v4  ;;  %v4451_v4 = vld [vmem:[#allocation2 + $0x374] ss:$48 sps:$4 sm:$0xff]  }
  0xc9   :  { %2476 = vmatmul.mubr.bf16.vlgmr.msra.gmra.mrb[64].mxu1 %v4380_v5  ;;  %3988 = vmatpush3.bf16.msra.mxu0 %v4384_v6  ;;  %v4453_v5 = vld [vmem:[#allocation2 + $0x37c] ss:$48 sps:$4 sm:$0xff]   ;;  %v4455_v6 = vld [vmem:[#allocation2 + $0x370] ss:$48 sps:$4 sm:$0xff]  }
  0xca   :  { %4100 = vmatpush3.bf16.msra.mxu1 %v4386_v7  ;;  %2322 = vmatprep.mubr.bf16.mxu0 %v4387_v8  ;;  %v4456_v7 = vld [vmem:[#allocation2 + $0x378] ss:$48 sps:$4 sm:$0xff]   ;;  %v4457_v8 = vld [vmem:[#allocation2 + $0x3d4] ss:$48 sps:$4 sm:$0xff]  }
  0xcb   :  { %2483 = vmatprep.mubr.bf16.mxu1 %v4389_v9  ;;  %3989 = vmatprep.subr.bf16.mxu0 %v4399_v10  ;;  %v4459_v9 = vld [vmem:[#allocation2 + $0x3dc] ss:$48 sps:$4 sm:$0xff]   ;;  %v4461_v10 = vld [vmem:[#allocation2 + $0x3d0] ss:$48 sps:$4 sm:$0xff]  }
  0xcc   :  { %4101 = vmatprep.subr.bf16.mxu1 %v4401_v12  ;;  %v4467_v12 = vld [vmem:[#allocation2 + $0x434] ss:$48 sps:$4 sm:$0xff]  }
  0xcd   :  { %3990 = vmatpush3.bf16.msra.mxu0 %v4400_v11  ;;  %v4462_v11 = vld [vmem:[#allocation2 + $0x3d8] ss:$48 sps:$4 sm:$0xff]  }
  0xce   :  { %4102 = vmatpush3.bf16.msra.mxu1 %v4402_v13  ;;  %3991 = vmatprep.subr.bf16.mxu0 %v4415_v15  ;;  %v4469_v13 = vld [vmem:[#allocation2 + $0x43c] ss:$48 sps:$4 sm:$0xff]  }
  0xcf   :  { %4103 = vmatprep.subr.bf16.mxu1 %v4417_v17  ;;  %v4471_v17 = vld [vmem:[#allocation2 + $0x430] ss:$48 sps:$4 sm:$0xff]  }
  0xd0   :  { %2323 = vmatmul.mubr.bf16.gmra.mrb[68].mxu0 %v4391_v14 }
  0xd1   :  { %2484 = vmatmul.mubr.bf16.gmra.mrb[68].mxu1 %v4392_v16  ;;  %2330 = vmatprep.mubr.bf16.mxu0 %v4393_v18 }
  0xd2   :  { %2491 = vmatprep.mubr.bf16.mxu1 %v4395_v19  ;;  %3992 = vmatpush3.bf16.msra.mxu0 %v4416_v20 }
  0xd3   :  { %4104 = vmatpush3.bf16.msra.mxu1 %v4418_v21  ;;  %3993 = vmatprep.subr.bf16.mxu0 %v4431_v22  ;;  %v4472_v21 = vld [vmem:[#allocation2 + $0x438] ss:$48 sps:$4 sm:$0xff]   ;;  %v4473_v22 = vld [vmem:[#allocation2 + $0x494] ss:$48 sps:$4 sm:$0xff]  }
  0xd4   :  { %4105 = vmatprep.subr.bf16.mxu1 %v4433_v23 }
  0xd6   :  { %3994 = vmatpush3.bf16.msra.mxu0 %v4432_v25 }
  0xd7   :  { %4106 = vmatpush3.bf16.msra.mxu1 %v4434_v26  ;;  %3995 = vmatprep.subr.bf16.mxu0 %v4447_v29  ;;  %v4475_v26 = vld [vmem:[#allocation2 + $0x49c] ss:$48 sps:$4 sm:$0xff]  }
  0xd8   :  { %2331 = vmatmul.mubr.bf16.gmra.mrb[72].mxu0 %v4397_v24  ;;  %4107 = vmatprep.subr.bf16.mxu1 %v4449_v31 }
  0xd9   :  { %2492 = vmatmul.mubr.bf16.gmra.mrb[72].mxu1 %v4398_v27  ;;  %2338 = vmatprep.mubr.bf16.mxu0 %v4403_v28 }
  0xda   :  { %2499 = vmatprep.mubr.bf16.mxu1 %v4405_v30  ;;  %3996 = vmatpush3.bf16.msra.mxu0 %v4448_v32 }
  0xdb   :  { %4108 = vmatpush3.bf16.msra.mxu1 %v4450_v33  ;;  %3997 = vmatprep.subr.bf16.mxu0 %v4463_v34 }
  0xdc   :  { %4109 = vmatprep.subr.bf16.mxu1 %v4465_v35  ;;  %v4477_v35 = vld [vmem:[#allocation2 + $0x490] ss:$48 sps:$4 sm:$0xff]  }
  0xde   :  { %3998 = vmatpush3.bf16.msra.mxu0 %v4464_v37 }
  0xdf   :  { %4110 = vmatpush3.bf16.msra.mxu1 %v4466_v40  ;;  %3999 = vmatprep.subr.bf16.mxu0 %v4479_v41  ;;  %v4483_v40 = vld [vmem:[#allocation2 + $0x4f4] ss:$48 sps:$4 sm:$0xff]  }
  0xe0   :  { %2339 = vmatmul.mubr.bf16.gmra.mrb[76].mxu0 %v4407_v36  ;;  %4111 = vmatprep.subr.bf16.mxu1 %v4481_v42 }
  0xe1   :  { %2500 = vmatmul.mubr.bf16.gmra.mrb[76].mxu1 %v4408_v38  ;;  %2346 = vmatprep.mubr.bf16.mxu0 %v4409_v39  ;;  %v4478_v39 = vld [vmem:[#allocation2 + $0x498] ss:$48 sps:$4 sm:$0xff]  }
  0xe2   :  { %2507 = vmatprep.mubr.bf16.mxu1 %v4411_v43  ;;  %4000 = vmatpush3.bf16.msra.mxu0 %v4480_v44  ;;  %v4485_v44 = vld [vmem:[#allocation2 + $0x4fc] ss:$48 sps:$4 sm:$0xff]  }
  0xe3   :  { %4112 = vmatpush3.bf16.msra.mxu1 %v4482_v45  ;;  %4001 = vmatprep.subr.bf16.mxu0 %v4495_v46 }
  0xe4   :  { %4113 = vmatprep.subr.bf16.mxu1 %v4497_v47 }
  0xe6   :  { %4002 = vmatpush3.bf16.msra.mxu0 %v4496_v49 }
  0xe7   :  { %4114 = vmatpush3.bf16.msra.mxu1 %v4498_v52 }
  0xe8   :  { %2347 = vmatmul.mubr.bf16.gmra.mrb[80].mxu0 %v4413_v48 }
  0xe9   :  { %2508 = vmatmul.mubr.bf16.gmra.mrb[80].mxu1 %v4414_v50  ;;  %2354 = vmatprep.mubr.bf16.mxu0 %v4419_v51 }
  0xea   :  { %2515 = vmatprep.mubr.bf16.mxu1 %v4421_v53  ;;  %v4487_v53 = vld [vmem:[#allocation2 + $0x4f0] ss:$48 sps:$4 sm:$0xff]  }
  0xf0   :  { %2355 = vmatmul.mubr.bf16.gmra.mrb[84].mxu0 %v4423_v54 }
  0xf1   :  { %2516 = vmatmul.mubr.bf16.gmra.mrb[84].mxu1 %v4424_v55  ;;  %2362 = vmatprep.mubr.bf16.mxu0 %v4425_v56 }
  0xf2   :  { %2523 = vmatprep.mubr.bf16.mxu1 %v4427_v57  ;;  %v4488_v57 = vld [vmem:[#allocation2 + $0x4f8] ss:$48 sps:$4 sm:$0xff]  }
  0xf8   :  { %2363 = vmatmul.mubr.bf16.gmra.mrb[88].mxu0 %v4429_v58  ;;  %v4489_v58 = vld [vmem:[#allocation2 + $0x554] ss:$48 sps:$4 sm:$0xff]  }
  0xf9   :  { %2524 = vmatmul.mubr.bf16.gmra.mrb[88].mxu1 %v4430_v59  ;;  %2370 = vmatprep.mubr.bf16.mxu0 %v4435_v60 }
  0xfa   :  { %2531 = vmatprep.mubr.bf16.mxu1 %v4437_v61 }
 0x100   :  { %2371 = vmatmul.mubr.bf16.gmra.mrb[92].mxu0 %v4439_v62  ;;  %v4491_v62 = vld [vmem:[#allocation2 + $0x55c] ss:$48 sps:$4 sm:$0xff]  }
 0x101   :  { %2532 = vmatmul.mubr.bf16.gmra.mrb[92].mxu1 %v4440_v63  ;;  %2378 = vmatprep.mubr.bf16.mxu0 %v4441_v0 }
 0x102   :  { %2539 = vmatprep.mubr.bf16.mxu1 %v4443_v1 }
 0x108   :  { %2379 = vmatmul.mubr.bf16.gmra.mrb[96].mxu0 %v4445_v2 }
 0x109   :  { %2540 = vmatmul.mubr.bf16.gmra.mrb[96].mxu1 %v4446_v3  ;;  %2386 = vmatprep.mubr.bf16.mxu0 %v4451_v4 }
 0x10a   :  { %2547 = vmatprep.mubr.bf16.mxu1 %v4453_v5 }
 0x110   :  { %2387 = vmatmul.mubr.bf16.gmra.mrb[100].mxu0 %v4455_v6 }
 0x111   :  { %2548 = vmatmul.mubr.bf16.gmra.mrb[100].mxu1 %v4456_v7  ;;  %2394 = vmatprep.mubr.bf16.mxu0 %v4457_v8  ;;  %v4493_v7 = vld [vmem:[#allocation2 + $0x550] ss:$48 sps:$4 sm:$0xff]  }
 0x112   :  { %2555 = vmatprep.mubr.bf16.mxu1 %v4459_v9 }
 0x118   :  { %2395 = vmatmul.mubr.bf16.gmra.mrb[104].mxu0 %v4461_v10 }
 0x119   :  { %2556 = vmatmul.mubr.bf16.gmra.mrb[104].mxu1 %v4462_v11  ;;  %2402 = vmatprep.mubr.bf16.mxu0 %v4467_v12  ;;  %v4494_v11 = vld [vmem:[#allocation2 + $0x558] ss:$48 sps:$4 sm:$0xff]   ;;  %v4499_v12 = vld [vmem:[#allocation2 + $0x5b4] ss:$48 sps:$4 sm:$0xff]  }
 0x11a   :  { %2563 = vmatprep.mubr.bf16.mxu1 %v4469_v13 }
 0x11b   :  { %v3555_v14 = vpop.f32.mrb[0].mxu0 }
 0x11c   :  { %v3667_v15 = vpop.f32.mrb[0].mxu1  ;;  %v3556_v16 = vpop.f32.mrb[1].mxu0 }
 0x11d   :  { %v3557_v18 = vadd.f32 %v3556_v16, %v3555_v14  ;;  %v3668_v19 = vpop.f32.mrb[1].mxu1  ;;  %v3558_v20 = vpop.f32.mrb[2].mxu0  ;;  %v4501_v16 = vld [vmem:[#allocation2 + $0x5bc] ss:$48 sps:$4 sm:$0xff]  }
 0x11e   :  { %v3669_v23 = vadd.f32 %v3668_v19, %v3667_v15  ;;  %v3670_v24 = vpop.f32.mrb[2].mxu1  ;;  %v3559_v25 = vpop.f32.mrb[3].mxu0 }
 0x11f   :  { %v3560_v27 = vadd.f32 %v3559_v25, %v3558_v20  ;;  %v3671_v28 = vpop.f32.mrb[3].mxu1  ;;  %v4503_v25 = vld [vmem:[#allocation2 + $0x5b0] ss:$48 sps:$4 sm:$0xff]  }
 0x120   :  { %v4694_v29 = vadd.f32 %v3669_v23, %v3557_v18  ;;  %v3672_v30 = vadd.f32 %v3671_v28, %v3670_v24  ;;  %2403 = vmatmul.mubr.bf16.gmra.mrb[108].mxu0 %v4471_v17 }
 0x121   :  { %2564 = vmatmul.mubr.bf16.gmra.mrb[108].mxu1 %v4472_v21  ;;  %2410 = vmatprep.mubr.bf16.mxu0 %v4473_v22 }
 0x122   :  { %v4696_v31 = vadd.f32 %v3672_v30, %v3560_v27  ;;  %2571 = vmatprep.mubr.bf16.mxu1 %v4475_v26  ;;  %v4504_v30 = vld [vmem:[#allocation2 + $0x5b8] ss:$48 sps:$4 sm:$0xff]  }
 0x123   :  { %v3561_v32 = vpop.f32.mrb[4].mxu0 }
 0x124   :  { %v3673_v33 = vpop.f32.mrb[4].mxu1  ;;  %v3562_v34 = vpop.f32.mrb[5].mxu0 }
 0x125   :  { %v3563_v36 = vadd.f32 %v3562_v34, %v3561_v32  ;;  %v3674_v37 = vpop.f32.mrb[5].mxu1  ;;  %v3564_v38 = vpop.f32.mrb[6].mxu0  ;;  %v4507_v32 = vld [vmem:[#allocation2 + $0x24] ss:$48 sps:$4 sm:$0xff]  }
 0x126   :  { %v3675_v41 = vadd.f32 %v3674_v37, %v3673_v33  ;;  %v3676_v42 = vpop.f32.mrb[6].mxu1  ;;  %v3565_v43 = vpop.f32.mrb[7].mxu0 }
 0x127   :  { %v3566_v45 = vadd.f32 %v3565_v43, %v3564_v38  ;;  %v3677_v46 = vpop.f32.mrb[7].mxu1 }
 0x128   :  { %v4698_v47 = vadd.f32 %v3675_v41, %v3563_v36  ;;  %v3678_v48 = vadd.f32 %v3677_v46, %v3676_v42  ;;  %2411 = vmatmul.mubr.bf16.gmra.mrb[112].mxu0 %v4477_v35  ;;  %v4510_v36 = vld [vmem:[#allocation2 + $0x2c] ss:$48 sps:$4 sm:$0xff]  }
 0x129   :  { %2572 = vmatmul.mubr.bf16.gmra.mrb[112].mxu1 %v4478_v39  ;;  %2418 = vmatprep.mubr.bf16.mxu0 %v4483_v40 }
 0x12a   :  { %v4700_v49 = vadd.f32 %v3678_v48, %v3566_v45  ;;  %2579 = vmatprep.mubr.bf16.mxu1 %v4485_v44  ;;  %v4505_v45 = vld [vmem:[#allocation2 + $0x20] ss:$48 sps:$4 sm:$0xff]  }
 0x12b   :  { %v3567_v50 = vpop.f32.mrb[8].mxu0 }
 0x12c   :  { %v3679_v51 = vpop.f32.mrb[8].mxu1  ;;  %v3568_v52 = vpop.f32.mrb[9].mxu0 }
 0x12d   :  { %v3569_v54 = vadd.f32 %v3568_v52, %v3567_v50  ;;  %v3680_v55 = vpop.f32.mrb[9].mxu1  ;;  %v3570_v56 = vpop.f32.mrb[10].mxu0  ;;  %v4511_v52 = vld [vmem:[#allocation2 + $0x84] ss:$48 sps:$4 sm:$0xff]  }
 0x12e   :  { %v3681_v59 = vadd.f32 %v3680_v55, %v3679_v51  ;;  %v3682_v60 = vpop.f32.mrb[10].mxu1  ;;  %v3571_v61 = vpop.f32.mrb[11].mxu0  ;;  %v4508_v51 = vld [vmem:[#allocation2 + $0x28] ss:$48 sps:$4 sm:$0xff]  }
 0x12f   :  { %v3572_v63 = vadd.f32 %v3571_v61, %v3570_v56  ;;  %v3683_v0 = vpop.f32.mrb[11].mxu1  ;;  %v4513_v56 = vld [vmem:[#allocation2 + $0x8c] ss:$48 sps:$4 sm:$0xff]  }
 0x130   :  { %v4702_v1 = vadd.f32 %v3681_v59, %v3569_v54  ;;  %v3684_v2 = vadd.f32 %v3683_v0, %v3682_v60  ;;  %2419 = vmatmul.mubr.bf16.gmra.mrb[116].mxu0 %v4487_v53 }
 0x131   :  { %2580 = vmatmul.mubr.bf16.gmra.mrb[116].mxu1 %v4488_v57  ;;  %2426 = vmatprep.mubr.bf16.mxu0 %v4489_v58 }
 0x132   :  { %v4704_v3 = vadd.f32 %v3684_v2, %v3572_v63  ;;  %2587 = vmatprep.mubr.bf16.mxu1 %v4491_v62  ;;  %v4515_v2 = vld [vmem:[#allocation2 + $0x80] ss:$48 sps:$4 sm:$0xff]  }
 0x133   :  { %v3573_v4 = vpop.f32.mrb[12].mxu0 }
 0x134   :  { %v3685_v5 = vpop.f32.mrb[12].mxu1  ;;  %v3574_v6 = vpop.f32.mrb[13].mxu0 }
 0x135   :  { %v3575_v8 = vadd.f32 %v3574_v6, %v3573_v4  ;;  %v3686_v9 = vpop.f32.mrb[13].mxu1  ;;  %v3576_v10 = vpop.f32.mrb[14].mxu0 }
 0x136   :  { %v3687_v13 = vadd.f32 %v3686_v9, %v3685_v5  ;;  %v3688_v14 = vpop.f32.mrb[14].mxu1  ;;  %v3577_v15 = vpop.f32.mrb[15].mxu0 }
 0x137   :  { %v3578_v17 = vadd.f32 %v3577_v15, %v3576_v10  ;;  %v3689_v18 = vpop.f32.mrb[15].mxu1 }
 0x138   :  { %v4706_v19 = vadd.f32 %v3687_v13, %v3575_v8  ;;  %v3690_v20 = vadd.f32 %v3689_v18, %v3688_v14  ;;  %2427 = vmatmul.mubr.bf16.gmra.mrb[120].mxu0 %v4493_v7  ;;  %v4516_v7 = vld [vmem:[#allocation2 + $0x88] ss:$48 sps:$4 sm:$0xff]   ;;  %v4517_v8 = vld [vmem:[#allocation2 + $0xe4] ss:$48 sps:$4 sm:$0xff]  }
 0x139   :  { %2588 = vmatmul.mubr.bf16.gmra.mrb[120].mxu1 %v4494_v11  ;;  %2434 = vmatprep.mubr.bf16.mxu0 %v4499_v12  ;;  %v4519_v12 = vld [vmem:[#allocation2 + $0xec] ss:$48 sps:$4 sm:$0xff]  }
 0x13a   :  { %v4708_v21 = vadd.f32 %v3690_v20, %v3578_v17  ;;  %2595 = vmatprep.mubr.bf16.mxu1 %v4501_v16 }
 0x13b   :  { %v3579_v22 = vpop.f32.mrb[16].mxu0 }
 0x13c   :  { %v3691_v23 = vpop.f32.mrb[16].mxu1  ;;  %v3580_v24 = vpop.f32.mrb[17].mxu0 }
 0x13d   :  { %v3581_v26 = vadd.f32 %v3580_v24, %v3579_v22  ;;  %v3692_v27 = vpop.f32.mrb[17].mxu1  ;;  %v3582_v28 = vpop.f32.mrb[18].mxu0 }
 0x13e   :  { %v3693_v33 = vadd.f32 %v3692_v27, %v3691_v23  ;;  %v3694_v34 = vpop.f32.mrb[18].mxu1  ;;  %v3583_v35 = vpop.f32.mrb[19].mxu0  ;;  %v4521_v23 = vld [vmem:[#allocation2 + $0xe0] ss:$48 sps:$4 sm:$0xff]   ;;  %v4522_v27 = vld [vmem:[#allocation2 + $0xe8] ss:$48 sps:$4 sm:$0xff]  }
 0x13f   :  { %v3584_v37 = vadd.f32 %v3583_v35, %v3582_v28  ;;  %v3695_v38 = vpop.f32.mrb[19].mxu1  ;;  %v4523_v28 = vld [vmem:[#allocation2 + $0x144] ss:$48 sps:$4 sm:$0xff]  }
 0x140   :  { %v4710_v39 = vadd.f32 %v3693_v33, %v3581_v26  ;;  %v3696_v40 = vadd.f32 %v3695_v38, %v3694_v34  ;;  %2435 = vmatmul.mubr.bf16.gmra.mrb[124].mxu0 %v4503_v25  ;;  %v4525_v34 = vld [vmem:[#allocation2 + $0x14c] ss:$48 sps:$4 sm:$0xff]  }
 0x141   :  { %2596 = vmatmul.mubr.bf16.gmra.mrb[124].mxu1 %v4504_v30  ;;  %2636 = vmatprep.mubr.bf16.mxu0 %v4507_v32 }
 0x142   :  { %v4712_v41 = vadd.f32 %v3696_v40, %v3584_v37  ;;  %2797 = vmatprep.mubr.bf16.mxu1 %v4510_v36 }
 0x143   :  { %v3585_v42 = vpop.f32.mrb[20].mxu0 }
 0x144   :  { %v3697_v43 = vpop.f32.mrb[20].mxu1  ;;  %v3586_v44 = vpop.f32.mrb[21].mxu0 }
 0x145   :  { %v3587_v46 = vadd.f32 %v3586_v44, %v3585_v42  ;;  %v3698_v48 = vpop.f32.mrb[21].mxu1  ;;  %v3588_v50 = vpop.f32.mrb[22].mxu0 }
 0x146   :  { %v3699_v53 = vadd.f32 %v3698_v48, %v3697_v43  ;;  %v3700_v54 = vpop.f32.mrb[22].mxu1  ;;  %v3589_v55 = vpop.f32.mrb[23].mxu0 }
 0x147   :  { %v3590_v57 = vadd.f32 %v3589_v55, %v3588_v50  ;;  %v3701_v58 = vpop.f32.mrb[23].mxu1 }
 0x148   :  { %v4714_v59 = vadd.f32 %v3699_v53, %v3587_v46  ;;  %v3702_v60 = vadd.f32 %v3701_v58, %v3700_v54  ;;  %2637 = vmatmul.mubr.bf16.vlgmr.msra.gmra.mrb[128].mxu0 %v4505_v45  ;;  %v4527_v45 = vld [vmem:[#allocation2 + $0x140] ss:$48 sps:$4 sm:$0xff]  }
 0x149   :  { %2798 = vmatmul.mubr.bf16.vlgmr.msra.gmra.mrb[128].mxu1 %v4508_v51  ;;  %2644 = vmatprep.mubr.bf16.mxu0 %v4511_v52  ;;  %v4528_v51 = vld [vmem:[#allocation2 + $0x148] ss:$48 sps:$4 sm:$0xff]   ;;  %v4529_v52 = vld [vmem:[#allocation2 + $0x1a4] ss:$48 sps:$4 sm:$0xff]  }
 0x14a   :  { %v4716_v61 = vadd.f32 %v3702_v60, %v3590_v57  ;;  %2805 = vmatprep.mubr.bf16.mxu1 %v4513_v56  ;;  %v4531_v56 = vld [vmem:[#allocation2 + $0x1ac] ss:$48 sps:$4 sm:$0xff]  }
 0x14b   :  { %v3591_v62 = vpop.f32.mrb[24].mxu0 }
 0x14c   :  { %v3703_v63 = vpop.f32.mrb[24].mxu1  ;;  %v3592_v0 = vpop.f32.mrb[25].mxu0 }
 0x14d   :  { %v3593_v4 = vadd.f32 %v3592_v0, %v3591_v62  ;;  %v3704_v5 = vpop.f32.mrb[25].mxu1  ;;  %v3594_v6 = vpop.f32.mrb[26].mxu0 }
 0x14e   :  { %v3705_v9 = vadd.f32 %v3704_v5, %v3703_v63  ;;  %v3706_v10 = vpop.f32.mrb[26].mxu1  ;;  %v3595_v11 = vpop.f32.mrb[27].mxu0  ;;  %v4533_v5 = vld [vmem:[#allocation2 + $0x1a0] ss:$48 sps:$4 sm:$0xff]  }
 0x14f   :  { %v3596_v13 = vadd.f32 %v3595_v11, %v3594_v6  ;;  %v3707_v14 = vpop.f32.mrb[27].mxu1 }
 0x150   :  { %v4718_v15 = vadd.f32 %v3705_v9, %v3593_v4  ;;  %v3708_v16 = vadd.f32 %v3707_v14, %v3706_v10  ;;  %2645 = vmatmul.mubr.bf16.gmra.mrb[132].mxu0 %v4515_v2  ;;  %v4534_v9 = vld [vmem:[#allocation2 + $0x1a8] ss:$48 sps:$4 sm:$0xff]   ;;  %v4535_v10 = vld [vmem:[#allocation2 + $0x204] ss:$48 sps:$4 sm:$0xff]   ;;  %v4537_v14 = vld [vmem:[#allocation2 + $0x20c] ss:$48 sps:$4 sm:$0xff]  }
 0x151   :  { %2806 = vmatmul.mubr.bf16.gmra.mrb[132].mxu1 %v4516_v7  ;;  %2652 = vmatprep.mubr.bf16.mxu0 %v4517_v8 }
 0x152   :  { %v4720_v17 = vadd.f32 %v3708_v16, %v3596_v13  ;;  %2813 = vmatprep.mubr.bf16.mxu1 %v4519_v12 }
 0x153   :  { %v3597_v18 = vpop.f32.mrb[28].mxu0 }
 0x154   :  { %v3709_v20 = vpop.f32.mrb[28].mxu1  ;;  %v3598_v22 = vpop.f32.mrb[29].mxu0 }
 0x155   :  { %v3599_v24 = vadd.f32 %v3598_v22, %v3597_v18  ;;  %v3710_v25 = vpop.f32.mrb[29].mxu1  ;;  %v3600_v26 = vpop.f32.mrb[30].mxu0 }
 0x156   :  { %v3711_v30 = vadd.f32 %v3710_v25, %v3709_v20  ;;  %v3712_v32 = vpop.f32.mrb[30].mxu1  ;;  %v3601_v33 = vpop.f32.mrb[31].mxu0 }
 0x157   :  { %v3602_v35 = vadd.f32 %v3601_v33, %v3600_v26  ;;  %v3713_v36 = vpop.f32.mrb[31].mxu1  ;;  %v4540_v33 = vld [vmem:[#allocation2 + $0x208] ss:$48 sps:$4 sm:$0xff]  }
 0x158   :  { %v4722_v37 = vadd.f32 %v3711_v30, %v3599_v24  ;;  %v3714_v38 = vadd.f32 %v3713_v36, %v3712_v32  ;;  %2653 = vmatmul.mubr.bf16.gmra.mrb[136].mxu0 %v4521_v23 }
 0x159   :  { %2814 = vmatmul.mubr.bf16.gmra.mrb[136].mxu1 %v4522_v27  ;;  %2660 = vmatprep.mubr.bf16.mxu0 %v4523_v28  ;;  %v4539_v27 = vld [vmem:[#allocation2 + $0x200] ss:$48 sps:$4 sm:$0xff]  }
 0x15a   :  { %v4724_v40 = vadd.f32 %v3714_v38, %v3602_v35  ;;  %2821 = vmatprep.mubr.bf16.mxu1 %v4525_v34  ;;  %v4541_v34 = vld [vmem:[#allocation2 + $0x264] ss:$48 sps:$4 sm:$0xff]  }
 0x15b   :  { %v3603_v42 = vpop.f32.mrb[32].mxu0 }
 0x15c   :  { %v3715_v43 = vpop.f32.mrb[32].mxu1  ;;  %v3604_v44 = vpop.f32.mrb[33].mxu0 }
 0x15d   :  { %v3605_v46 = vadd.f32 %v3604_v44, %v3603_v42  ;;  %v3716_v48 = vpop.f32.mrb[33].mxu1  ;;  %v3606_v50 = vpop.f32.mrb[34].mxu0  ;;  %v4543_v42 = vld [vmem:[#allocation2 + $0x26c] ss:$48 sps:$4 sm:$0xff]  }
 0x15e   :  { %v3717_v53 = vadd.f32 %v3716_v48, %v3715_v43  ;;  %v3718_v54 = vpop.f32.mrb[34].mxu1  ;;  %v3607_v55 = vpop.f32.mrb[35].mxu0 }
 0x15f   :  { %v3608_v57 = vadd.f32 %v3607_v55, %v3606_v50  ;;  %v3719_v58 = vpop.f32.mrb[35].mxu1 }
 0x160   :  { %v4726_v60 = vadd.f32 %v3717_v53, %v3605_v46  ;;  %v3720_v62 = vadd.f32 %v3719_v58, %v3718_v54  ;;  %2661 = vmatmul.mubr.bf16.gmra.mrb[140].mxu0 %v4527_v45  ;;  %v4545_v53 = vld [vmem:[#allocation2 + $0x260] ss:$48 sps:$4 sm:$0xff]   ;;  %v4547_v58 = vld [vmem:[#allocation2 + $0x2c4] ss:$48 sps:$4 sm:$0xff]  }
 0x161   :  { %2822 = vmatmul.mubr.bf16.gmra.mrb[140].mxu1 %v4528_v51  ;;  %2668 = vmatprep.mubr.bf16.mxu0 %v4529_v52 }
 0x162   :  { %v4728_v63 = vadd.f32 %v3720_v62, %v3608_v57  ;;  %2829 = vmatprep.mubr.bf16.mxu1 %v4531_v56  ;;  %v4546_v57 = vld [vmem:[#allocation2 + $0x268] ss:$48 sps:$4 sm:$0xff]  }
 0x163   :  { %v3609_v0 = vpop.f32.mrb[36].mxu0 }
 0x164   :  { %v3721_v2 = vpop.f32.mrb[36].mxu1  ;;  %v3610_v4 = vpop.f32.mrb[37].mxu0 }
 0x165   :  { %v3611_v6 = vadd.f32 %v3610_v4, %v3609_v0  ;;  %v3722_v7 = vpop.f32.mrb[37].mxu1  ;;  %v3612_v8 = vpop.f32.mrb[38].mxu0  ;;  %v4549_v4 = vld [vmem:[#allocation2 + $0x2cc] ss:$48 sps:$4 sm:$0xff]  }
 0x166   :  { %v3723_v11 = vadd.f32 %v3722_v7, %v3721_v2  ;;  %v3724_v12 = vpop.f32.mrb[38].mxu1  ;;  %v3613_v13 = vpop.f32.mrb[39].mxu0 }
 0x167   :  { %v3614_v16 = vadd.f32 %v3613_v13, %v3612_v8  ;;  %v3725_v18 = vpop.f32.mrb[39].mxu1  ;;  %v4551_v13 = vld [vmem:[#allocation2 + $0x2c0] ss:$48 sps:$4 sm:$0xff]  }
 0x168   :  { %v4730_v20 = vadd.f32 %v3723_v11, %v3611_v6  ;;  %v3726_v22 = vadd.f32 %v3725_v18, %v3724_v12  ;;  %2669 = vmatmul.mubr.bf16.gmra.mrb[144].mxu0 %v4533_v5 }
 0x169   :  { %2830 = vmatmul.mubr.bf16.gmra.mrb[144].mxu1 %v4534_v9  ;;  %2676 = vmatprep.mubr.bf16.mxu0 %v4535_v10 }
 0x16a   :  { %v4732_v23 = vadd.f32 %v3726_v22, %v3614_v16  ;;  %2837 = vmatprep.mubr.bf16.mxu1 %v4537_v14  ;;  %v4552_v22 = vld [vmem:[#allocation2 + $0x2c8] ss:$48 sps:$4 sm:$0xff]  }
 0x16b   :  { %v3615_v24 = vpop.f32.mrb[40].mxu0 }
 0x16c   :  { %v3727_v25 = vpop.f32.mrb[40].mxu1  ;;  %v3616_v26 = vpop.f32.mrb[41].mxu0 }
 0x16d   :  { %v3617_v28 = vadd.f32 %v3616_v26, %v3615_v24  ;;  %v3728_v30 = vpop.f32.mrb[41].mxu1  ;;  %v3618_v32 = vpop.f32.mrb[42].mxu0  ;;  %v4553_v24 = vld [vmem:[#allocation2 + $0x324] ss:$48 sps:$4 sm:$0xff]  }
 0x16e   :  { %v3729_v35 = vadd.f32 %v3728_v30, %v3727_v25  ;;  %v3730_v36 = vpop.f32.mrb[42].mxu1  ;;  %v3619_v38 = vpop.f32.mrb[43].mxu0 }
 0x16f   :  { %v3620_v43 = vadd.f32 %v3619_v38, %v3618_v32  ;;  %v3731_v44 = vpop.f32.mrb[43].mxu1 }
 0x170   :  { %v4734_v45 = vadd.f32 %v3729_v35, %v3617_v28  ;;  %v3732_v46 = vadd.f32 %v3731_v44, %v3730_v36  ;;  %2677 = vmatmul.mubr.bf16.gmra.mrb[148].mxu0 %v4539_v27  ;;  %v4555_v28 = vld [vmem:[#allocation2 + $0x32c] ss:$48 sps:$4 sm:$0xff]  }
 0x171   :  { %2838 = vmatmul.mubr.bf16.gmra.mrb[148].mxu1 %v4540_v33  ;;  %2684 = vmatprep.mubr.bf16.mxu0 %v4541_v34 }
 0x172   :  { %v4736_v48 = vadd.f32 %v3732_v46, %v3620_v43  ;;  %2845 = vmatprep.mubr.bf16.mxu1 %v4543_v42  ;;  %v4557_v43 = vld [vmem:[#allocation2 + $0x320] ss:$48 sps:$4 sm:$0xff]  }
 0x173   :  { %v3621_v50 = vpop.f32.mrb[44].mxu0 }
 0x174   :  { %v3733_v51 = vpop.f32.mrb[44].mxu1  ;;  %v3622_v52 = vpop.f32.mrb[45].mxu0 }
 0x175   :  { %v3623_v54 = vadd.f32 %v3622_v52, %v3621_v50  ;;  %v3734_v55 = vpop.f32.mrb[45].mxu1  ;;  %v3624_v56 = vpop.f32.mrb[46].mxu0  ;;  %v4559_v52 = vld [vmem:[#allocation2 + $0x384] ss:$48 sps:$4 sm:$0xff]  }
 0x176   :  { %v3735_v62 = vadd.f32 %v3734_v55, %v3733_v51  ;;  %v3736_v0 = vpop.f32.mrb[46].mxu1  ;;  %v3625_v2 = vpop.f32.mrb[47].mxu0  ;;  %v4558_v51 = vld [vmem:[#allocation2 + $0x328] ss:$48 sps:$4 sm:$0xff]  }
 0x177   :  { %v3626_v5 = vadd.f32 %v3625_v2, %v3624_v56  ;;  %v3737_v6 = vpop.f32.mrb[47].mxu1  ;;  %v4561_v56 = vld [vmem:[#allocation2 + $0x38c] ss:$48 sps:$4 sm:$0xff]  }
 0x178   :  { %v4738_v7 = vadd.f32 %v3735_v62, %v3623_v54  ;;  %v3738_v8 = vadd.f32 %v3737_v6, %v3736_v0  ;;  %2685 = vmatmul.mubr.bf16.gmra.mrb[152].mxu0 %v4545_v53 }
 0x179   :  { %2846 = vmatmul.mubr.bf16.gmra.mrb[152].mxu1 %v4546_v57  ;;  %2692 = vmatprep.mubr.bf16.mxu0 %v4547_v58 }
 0x17a   :  { %v4740_v9 = vadd.f32 %v3738_v8, %v3626_v5  ;;  %2853 = vmatprep.mubr.bf16.mxu1 %v4549_v4  ;;  %v4563_v8 = vld [vmem:[#allocation2 + $0x380] ss:$48 sps:$4 sm:$0xff]  }
 0x17b   :  { %v3627_v10 = vpop.f32.mrb[48].mxu0 }
 0x17c   :  { %v3739_v11 = vpop.f32.mrb[48].mxu1  ;;  %v3628_v12 = vpop.f32.mrb[49].mxu0 }
 0x17d   :  { %v3629_v14 = vadd.f32 %v3628_v12, %v3627_v10  ;;  %v3740_v16 = vpop.f32.mrb[49].mxu1  ;;  %v3630_v18 = vpop.f32.mrb[50].mxu0 }
 0x17e   :  { %v3741_v25 = vadd.f32 %v3740_v16, %v3739_v11  ;;  %v3742_v26 = vpop.f32.mrb[50].mxu1  ;;  %v3631_v27 = vpop.f32.mrb[51].mxu0 }
 0x17f   :  { %v3632_v30 = vadd.f32 %v3631_v27, %v3630_v18  ;;  %v3743_v32 = vpop.f32.mrb[51].mxu1 }
 0x180   :  { %v4742_v33 = vadd.f32 %v3741_v25, %v3629_v14  ;;  %v3744_v34 = vadd.f32 %v3743_v32, %v3742_v26  ;;  %2693 = vmatmul.mubr.bf16.gmra.mrb[156].mxu0 %v4551_v13  ;;  %v4564_v13 = vld [vmem:[#allocation2 + $0x388] ss:$48 sps:$4 sm:$0xff]   ;;  %v4565_v14 = vld [vmem:[#allocation2 + $0x3e4] ss:$48 sps:$4 sm:$0xff]  }
 0x181   :  { %2854 = vmatmul.mubr.bf16.gmra.mrb[156].mxu1 %v4552_v22  ;;  %2700 = vmatprep.mubr.bf16.mxu0 %v4553_v24  ;;  %v4567_v24 = vld [vmem:[#allocation2 + $0x3ec] ss:$48 sps:$4 sm:$0xff]  }
 0x182   :  { %v4744_v35 = vadd.f32 %v3744_v34, %v3632_v30  ;;  %2861 = vmatprep.mubr.bf16.mxu1 %v4555_v28 }
 0x183   :  { %v3633_v36 = vpop.f32.mrb[52].mxu0 }
 0x184   :  { %v3745_v38 = vpop.f32.mrb[52].mxu1  ;;  %v3634_v42 = vpop.f32.mrb[53].mxu0 }
 0x185   :  { %v3635_v44 = vadd.f32 %v3634_v42, %v3633_v36  ;;  %v3746_v46 = vpop.f32.mrb[53].mxu1  ;;  %v3636_v50 = vpop.f32.mrb[54].mxu0 }
 0x186   :  { %v3747_v53 = vadd.f32 %v3746_v46, %v3745_v38  ;;  %v3748_v54 = vpop.f32.mrb[54].mxu1  ;;  %v3637_v55 = vpop.f32.mrb[55].mxu0  ;;  %v4569_v38 = vld [vmem:[#allocation2 + $0x3e0] ss:$48 sps:$4 sm:$0xff]   ;;  %v4570_v46 = vld [vmem:[#allocation2 + $0x3e8] ss:$48 sps:$4 sm:$0xff]  }
 0x187   :  { %v3638_v57 = vadd.f32 %v3637_v55, %v3636_v50  ;;  %v3749_v58 = vpop.f32.mrb[55].mxu1  ;;  %v4571_v50 = vld [vmem:[#allocation2 + $0x444] ss:$48 sps:$4 sm:$0xff]  }
 0x188   :  { %v4746_v62 = vadd.f32 %v3747_v53, %v3635_v44  ;;  %v3750_v0 = vadd.f32 %v3749_v58, %v3748_v54  ;;  %2701 = vmatmul.mubr.bf16.gmra.mrb[160].mxu0 %v4557_v43  ;;  %v4573_v54 = vld [vmem:[#allocation2 + $0x44c] ss:$48 sps:$4 sm:$0xff]  }
 0x189   :  { %2862 = vmatmul.mubr.bf16.gmra.mrb[160].mxu1 %v4558_v51  ;;  %2708 = vmatprep.mubr.bf16.mxu0 %v4559_v52 }
 0x18a   :  { %v4748_v2 = vadd.f32 %v3750_v0, %v3638_v57  ;;  %2869 = vmatprep.mubr.bf16.mxu1 %v4561_v56 }
 0x18b   :  { %v3639_v4 = vpop.f32.mrb[56].mxu0 }
 0x18c   :  { %v3751_v5 = vpop.f32.mrb[56].mxu1  ;;  %v3640_v6 = vpop.f32.mrb[57].mxu0 }
 0x18d   :  { %v3641_v10 = vadd.f32 %v3640_v6, %v3639_v4  ;;  %v3752_v11 = vpop.f32.mrb[57].mxu1  ;;  %v3642_v12 = vpop.f32.mrb[58].mxu0 }
 0x18e   :  { %v3753_v16 = vadd.f32 %v3752_v11, %v3751_v5  ;;  %v3754_v18 = vpop.f32.mrb[58].mxu1  ;;  %v3643_v22 = vpop.f32.mrb[59].mxu0 }
 0x18f   :  { %v3644_v25 = vadd.f32 %v3643_v22, %v3642_v12  ;;  %v3755_v26 = vpop.f32.mrb[59].mxu1 }
 0x190   :  { %v4750_v27 = vadd.f32 %v3753_v16, %v3641_v10  ;;  %v3756_v28 = vadd.f32 %v3755_v26, %v3754_v18  ;;  %2709 = vmatmul.mubr.bf16.gmra.mrb[164].mxu0 %v4563_v8  ;;  %v4575_v8 = vld [vmem:[#allocation2 + $0x440] ss:$48 sps:$4 sm:$0xff]  }
 0x191   :  { %2870 = vmatmul.mubr.bf16.gmra.mrb[164].mxu1 %v4564_v13  ;;  %2716 = vmatprep.mubr.bf16.mxu0 %v4565_v14  ;;  %v4576_v13 = vld [vmem:[#allocation2 + $0x448] ss:$48 sps:$4 sm:$0xff]   ;;  %v4577_v14 = vld [vmem:[#allocation2 + $0x4a4] ss:$48 sps:$4 sm:$0xff]  }
 0x192   :  { %v4752_v30 = vadd.f32 %v3756_v28, %v3644_v25  ;;  %2877 = vmatprep.mubr.bf16.mxu1 %v4567_v24  ;;  %v4579_v24 = vld [vmem:[#allocation2 + $0x4ac] ss:$48 sps:$4 sm:$0xff]  }
 0x193   :  { %v3645_v32 = vpop.f32.mrb[60].mxu0 }
 0x194   :  { %v3757_v34 = vpop.f32.mrb[60].mxu1  ;;  %v3646_v36 = vpop.f32.mrb[61].mxu0 }
 0x195   :  { %v3647_v42 = vadd.f32 %v3646_v36, %v3645_v32  ;;  %v3758_v43 = vpop.f32.mrb[61].mxu1  ;;  %v3648_v44 = vpop.f32.mrb[62].mxu0 }
 0x196   :  { %v3759_v51 = vadd.f32 %v3758_v43, %v3757_v34  ;;  %v3760_v52 = vpop.f32.mrb[62].mxu1  ;;  %v3649_v53 = vpop.f32.mrb[63].mxu0 }
 0x197   :  { %v3650_v55 = vadd.f32 %v3649_v53, %v3648_v44  ;;  %v3761_v56 = vpop.f32.mrb[63].mxu1  ;;  %v4583_v53 = vld [vmem:[#allocation2 + $0x504] ss:$48 sps:$4 sm:$0xff]  }
 0x198   :  { %v4754_v57 = vadd.f32 %v3759_v51, %v3647_v42  ;;  %v3762_v58 = vadd.f32 %v3761_v56, %v3760_v52  ;;  %2717 = vmatmul.mubr.bf16.gmra.mrb[168].mxu0 %v4569_v38  ;;  %v4582_v52 = vld [vmem:[#allocation2 + $0x4a8] ss:$48 sps:$4 sm:$0xff]  }
 0x199   :  { %2878 = vmatmul.mubr.bf16.gmra.mrb[168].mxu1 %v4570_v46  ;;  %2724 = vmatprep.mubr.bf16.mxu0 %v4571_v50  ;;  %v4581_v46 = vld [vmem:[#allocation2 + $0x4a0] ss:$48 sps:$4 sm:$0xff]  }
 0x19a   :  { %v4756_v0 = vadd.f32 %v3762_v58, %v3650_v55  ;;  %2885 = vmatprep.mubr.bf16.mxu1 %v4573_v54  ;;  %v4585_v58 = vld [vmem:[#allocation2 + $0x50c] ss:$48 sps:$4 sm:$0xff]  }
 0x19b   :  { %v3779_v4 = vpop.f32.mrb[64].mxu0 }
 0x19c   :  { %v3891_v5 = vpop.f32.mrb[64].mxu1  ;;  %v3780_v6 = vpop.f32.mrb[65].mxu0 }
 0x19d   :  { %v3781_v10 = vadd.f32 %v3780_v6, %v3779_v4  ;;  %v3892_v11 = vpop.f32.mrb[65].mxu1  ;;  %v3782_v12 = vpop.f32.mrb[66].mxu0 }
 0x19e   :  { %v3893_v16 = vadd.f32 %v3892_v11, %v3891_v5  ;;  %v3894_v18 = vpop.f32.mrb[66].mxu1  ;;  %v3783_v22 = vpop.f32.mrb[67].mxu0 }
 0x19f   :  { %v2317_v25 = vadd.f32 %v3781_v10, %v4694_v29  ;;  %v3784_v26 = vadd.f32 %v3783_v22, %v3782_v12  ;;  %v3895_v28 = vpop.f32.mrb[67].mxu1 }
 0x1a0   :  { %v3896_v32 = vadd.f32 %v3895_v28, %v3894_v18  ;;  %2725 = vmatmul.mubr.bf16.gmra.mrb[172].mxu0 %v4575_v8 }
 0x1a1   :  { %v4759_v34 = vadd.f32 %v3893_v16, %v2317_v25  ;;  %v2320_v36 = vadd.f32 %v3784_v26, %v4696_v31  ;;  %2886 = vmatmul.mubr.bf16.gmra.mrb[172].mxu1 %v4576_v13  ;;  %2732 = vmatprep.mubr.bf16.mxu0 %v4577_v14  ;;  %v4587_v16 = vld [vmem:[#allocation2 + $0x500] ss:$48 sps:$4 sm:$0xff]   ;;  %v4589_v25 = vld [vmem:[#allocation2 + $0x564] ss:$48 sps:$4 sm:$0xff]  }
 0x1a2   :  { %2893 = vmatprep.mubr.bf16.mxu1 %v4579_v24  ;;  %v4588_v24 = vld [vmem:[#allocation2 + $0x508] ss:$48 sps:$4 sm:$0xff]  }
 0x1a3   :  { %v4762_v38 = vadd.f32 %v3896_v32, %v2320_v36  ;;  %v3785_v42 = vpop.f32.mrb[68].mxu0  ;;  %v4591_v36 = vld [vmem:[#allocation2 + $0x56c] ss:$48 sps:$4 sm:$0xff]  }
 0x1a4   :  { %v3897_v43 = vpop.f32.mrb[68].mxu1  ;;  %v3786_v44 = vpop.f32.mrb[69].mxu0 }
 0x1a5   :  { %v3787_v50 = vadd.f32 %v3786_v44, %v3785_v42  ;;  %v3898_v51 = vpop.f32.mrb[69].mxu1  ;;  %v3788_v29 = vpop.f32.mrb[70].mxu0 }
 0x1a6   :  { %v3899_v54 = vadd.f32 %v3898_v51, %v3897_v43  ;;  %v3900_v55 = vpop.f32.mrb[70].mxu1  ;;  %v3789_v56 = vpop.f32.mrb[71].mxu0 }
 0x1a7   :  { %v2325_v31 = vadd.f32 %v3787_v50, %v4698_v47  ;;  %v3790_v4 = vadd.f32 %v3789_v56, %v3788_v29  ;;  %v3901_v5 = vpop.f32.mrb[71].mxu1 }
 0x1a8   :  { %v3902_v6 = vadd.f32 %v3901_v5, %v3900_v55  ;;  %2733 = vmatmul.mubr.bf16.gmra.mrb[176].mxu0 %v4581_v46 }
 0x1a9   :  { %v4765_v8 = vadd.f32 %v3899_v54, %v2325_v31  ;;  %v2328_v10 = vadd.f32 %v3790_v4, %v4700_v49  ;;  %2894 = vmatmul.mubr.bf16.gmra.mrb[176].mxu1 %v4582_v52  ;;  %2740 = vmatprep.mubr.bf16.mxu0 %v4583_v53  ;;  %v4593_v54 = vld [vmem:[#allocation2 + $0x560] ss:$48 sps:$4 sm:$0xff]   ;;  %v4595_v31 = vld [vmem:[#allocation2 + $0x5c4] ss:$48 sps:$4 sm:$0xff]  }
 0x1aa   :  { %2901 = vmatprep.mubr.bf16.mxu1 %v4585_v58  ;;  %v4594_v58 = vld [vmem:[#allocation2 + $0x568] ss:$48 sps:$4 sm:$0xff]  }
 0x1ab   :  { %v4768_v11 = vadd.f32 %v3902_v6, %v2328_v10  ;;  %v3791_v12 = vpop.f32.mrb[72].mxu0  ;;  %v4597_v10 = vld [vmem:[#allocation2 + $0x5cc] ss:$48 sps:$4 sm:$0xff]  }
 0x1ac   :  { %v3903_v13 = vpop.f32.mrb[72].mxu1  ;;  %v3792_v14 = vpop.f32.mrb[73].mxu0 }
 0x1ad   :  { %v3793_v18 = vadd.f32 %v3792_v14, %v3791_v12  ;;  %v3904_v22 = vpop.f32.mrb[73].mxu1  ;;  %v3794_v47 = vpop.f32.mrb[74].mxu0 }
 0x1ae   :  { %v3905_v26 = vadd.f32 %v3904_v22, %v3903_v13  ;;  %v3906_v28 = vpop.f32.mrb[74].mxu1  ;;  %v3795_v32 = vpop.f32.mrb[75].mxu0 }
 0x1af   :  { %v2333_v49 = vadd.f32 %v3793_v18, %v4702_v1  ;;  %v3796_v42 = vadd.f32 %v3795_v32, %v3794_v47  ;;  %v3907_v43 = vpop.f32.mrb[75].mxu1 }
 0x1b0   :  { %v3908_v44 = vadd.f32 %v3907_v43, %v3906_v28  ;;  %2741 = vmatmul.mubr.bf16.gmra.mrb[180].mxu0 %v4587_v16 }
 0x1b1   :  { %v4771_v46 = vadd.f32 %v3905_v26, %v2333_v49  ;;  %v2336_v50 = vadd.f32 %v3796_v42, %v4704_v3  ;;  %2902 = vmatmul.mubr.bf16.gmra.mrb[180].mxu1 %v4588_v24  ;;  %2748 = vmatprep.mubr.bf16.mxu0 %v4589_v25  ;;  %v4599_v26 = vld [vmem:[#allocation2 + $0x5c0] ss:$48 sps:$4 sm:$0xff]  }
 0x1b2   :  { %2909 = vmatprep.mubr.bf16.mxu1 %v4591_v36  ;;  %v4600_v36 = vld [vmem:[#allocation2 + $0x5c8] ss:$48 sps:$4 sm:$0xff]  }
 0x1b3   :  { %v4774_v51 = vadd.f32 %v3908_v44, %v2336_v50  ;;  %v3797_v29 = vpop.f32.mrb[76].mxu0 }
 0x1b4   :  { %v3909_v52 = vpop.f32.mrb[76].mxu1  ;;  %v3798_v53 = vpop.f32.mrb[77].mxu0 }
 0x1b5   :  { %v3799_v55 = vadd.f32 %v3798_v53, %v3797_v29  ;;  %v3910_v56 = vpop.f32.mrb[77].mxu1  ;;  %v3800_v1 = vpop.f32.mrb[78].mxu0 }
 0x1b6   :  { %v3911_v4 = vadd.f32 %v3910_v56, %v3909_v52  ;;  %v3912_v5 = vpop.f32.mrb[78].mxu1  ;;  %v3801_v6 = vpop.f32.mrb[79].mxu0 }
 0x1b7   :  { %v2341_v3 = vadd.f32 %v3799_v55, %v4706_v19  ;;  %v3802_v12 = vadd.f32 %v3801_v6, %v3800_v1  ;;  %v3913_v13 = vpop.f32.mrb[79].mxu1 }
 0x1b8   :  { %v3914_v14 = vadd.f32 %v3913_v13, %v3912_v5  ;;  %2749 = vmatmul.mubr.bf16.gmra.mrb[184].mxu0 %v4593_v54 }
 0x1b9   :  { %v4777_v16 = vadd.f32 %v3911_v4, %v2341_v3  ;;  %v2344_v18 = vadd.f32 %v3802_v12, %v4708_v21  ;;  %2910 = vmatmul.mubr.bf16.gmra.mrb[184].mxu1 %v4594_v58  ;;  %2756 = vmatprep.mubr.bf16.mxu0 %v4595_v31 }
 0x1ba   :  { %2917 = vmatprep.mubr.bf16.mxu1 %v4597_v10 }
 0x1bb   :  { %v4780_v22 = vadd.f32 %v3914_v14, %v2344_v18  ;;  %v3803_v47 = vpop.f32.mrb[80].mxu0 }
 0x1bc   :  { %v3915_v24 = vpop.f32.mrb[80].mxu1  ;;  %v3804_v25 = vpop.f32.mrb[81].mxu0 }
 0x1bd   :  { %v3805_v28 = vadd.f32 %v3804_v25, %v3803_v47  ;;  %v3916_v32 = vpop.f32.mrb[81].mxu1  ;;  %v3806_v19 = vpop.f32.mrb[82].mxu0 }
 0x1be   :  { %v3917_v49 = vadd.f32 %v3916_v32, %v3915_v24  ;;  %v3918_v42 = vpop.f32.mrb[82].mxu1  ;;  %v3807_v43 = vpop.f32.mrb[83].mxu0 }
 0x1bf   :  { %v2349_v44 = vadd.f32 %v3805_v28, %v4710_v39  ;;  %v3808_v50 = vadd.f32 %v3807_v43, %v3806_v19  ;;  %v3919_v21 = vpop.f32.mrb[83].mxu1 }
 0x1c0   :  { %v3920_v29 = vadd.f32 %v3919_v21, %v3918_v42  ;;  %2757 = vmatmul.mubr.bf16.gmra.mrb[188].mxu0 %v4599_v26 }
 0x1c1   :  { %v4783_v52 = vadd.f32 %v3917_v49, %v2349_v44  ;;  %v2352_v53 = vadd.f32 %v3808_v50, %v4712_v41  ;;  %2918 = vmatmul.mubr.bf16.gmra.mrb[188].mxu1 %v4600_v36 }
 0x1c3   :  { %v4786_v54 = vadd.f32 %v3920_v29, %v2352_v53  ;;  %v3809_v55 = vpop.f32.mrb[84].mxu0 }
 0x1c4   :  { %v3921_v56 = vpop.f32.mrb[84].mxu1  ;;  %v3810_v1 = vpop.f32.mrb[85].mxu0 }
 0x1c5   :  { %v3811_v58 = vadd.f32 %v3810_v1, %v3809_v55  ;;  %v3922_v31 = vpop.f32.mrb[85].mxu1  ;;  %v3812_v4 = vpop.f32.mrb[86].mxu0 }
 0x1c6   :  { %v3923_v5 = vadd.f32 %v3922_v31, %v3921_v56  ;;  %v3924_v6 = vpop.f32.mrb[86].mxu1  ;;  %v3813_v39 = vpop.f32.mrb[87].mxu0 }
 0x1c7   :  { %v2357_v10 = vadd.f32 %v3811_v58, %v4714_v59  ;;  %v3814_v3 = vadd.f32 %v3813_v39, %v3812_v4  ;;  %v3925_v12 = vpop.f32.mrb[87].mxu1 }
 0x1c8   :  { %v3926_v13 = vadd.f32 %v3925_v12, %v3924_v6 }
 0x1c9   :  { %v4789_v14 = vadd.f32 %v3923_v5, %v2357_v10  ;;  %v2360_v41 = vadd.f32 %v3814_v3, %v4716_v61 }
 0x1cb   :  { %v4792_v18 = vadd.f32 %v3926_v13, %v2360_v41  ;;  %v3815_v47 = vpop.f32.mrb[88].mxu0 }
 0x1cc   :  { %v3927_v24 = vpop.f32.mrb[88].mxu1  ;;  %v3816_v25 = vpop.f32.mrb[89].mxu0 }
 0x1cd   :  { %v3817_v26 = vadd.f32 %v3816_v25, %v3815_v47  ;;  %v3928_v28 = vpop.f32.mrb[89].mxu1  ;;  %v3818_v32 = vpop.f32.mrb[90].mxu0 }
 0x1ce   :  { %v3929_v19 = vadd.f32 %v3928_v28, %v3927_v24  ;;  %v3930_v36 = vpop.f32.mrb[90].mxu1  ;;  %v3819_v49 = vpop.f32.mrb[91].mxu0 }
 0x1cf   :  { %v2365_v59 = vadd.f32 %v3817_v26, %v4718_v15  ;;  %v3820_v42 = vadd.f32 %v3819_v49, %v3818_v32  ;;  %v3931_v43 = vpop.f32.mrb[91].mxu1 }
 0x1d0   :  { %v3932_v44 = vadd.f32 %v3931_v43, %v3930_v36 }
 0x1d1   :  { %v4795_v50 = vadd.f32 %v3929_v19, %v2365_v59  ;;  %v2368_v61 = vadd.f32 %v3820_v42, %v4720_v17 }
 0x1d3   :  { %v4798_v21 = vadd.f32 %v3932_v44, %v2368_v61  ;;  %v3821_v29 = vpop.f32.mrb[92].mxu0 }
 0x1d4   :  { %v3933_v53 = vpop.f32.mrb[92].mxu1  ;;  %v3822_v55 = vpop.f32.mrb[93].mxu0 }
 0x1d5   :  { %v3823_v56 = vadd.f32 %v3822_v55, %v3821_v29  ;;  %v3934_v1 = vpop.f32.mrb[93].mxu1  ;;  %v3824_v58 = vpop.f32.mrb[94].mxu0 }
 0x1d6   :  { %v3935_v31 = vadd.f32 %v3934_v1, %v3933_v53  ;;  %v3936_v4 = vpop.f32.mrb[94].mxu1  ;;  %v3825_v5 = vpop.f32.mrb[95].mxu0 }
 0x1d7   :  { %v2373_v15 = vadd.f32 %v3823_v56, %v4722_v37  ;;  %v3826_v6 = vadd.f32 %v3825_v5, %v3824_v58  ;;  %v3937_v39 = vpop.f32.mrb[95].mxu1 }
 0x1d8   :  { %v3938_v10 = vadd.f32 %v3937_v39, %v3936_v4 }
 0x1d9   :  { %v4801_v3 = vadd.f32 %v3935_v31, %v2373_v15  ;;  %v2376_v17 = vadd.f32 %v3826_v6, %v4724_v40 }
 0x1db   :  { %v4804_v12 = vadd.f32 %v3938_v10, %v2376_v17  ;;  %v3827_v13 = vpop.f32.mrb[96].mxu0 }
 0x1dc   :  { %v3939_v41 = vpop.f32.mrb[96].mxu1  ;;  %v3828_v47 = vpop.f32.mrb[97].mxu0 }
 0x1dd   :  { %v3829_v24 = vadd.f32 %v3828_v47, %v3827_v13  ;;  %v3940_v25 = vpop.f32.mrb[97].mxu1  ;;  %v3830_v26 = vpop.f32.mrb[98].mxu0 }
 0x1de   :  { %v3941_v28 = vadd.f32 %v3940_v25, %v3939_v41  ;;  %v3942_v32 = vpop.f32.mrb[98].mxu1  ;;  %v3831_v19 = vpop.f32.mrb[99].mxu0 }
 0x1df   :  { %v2381_v37 = vadd.f32 %v3829_v24, %v4726_v60  ;;  %v3832_v36 = vadd.f32 %v3831_v19, %v3830_v26  ;;  %v3943_v49 = vpop.f32.mrb[99].mxu1 }
 0x1e0   :  { %v3944_v59 = vadd.f32 %v3943_v49, %v3942_v32 }
 0x1e1   :  { %v4807_v42 = vadd.f32 %v3941_v28, %v2381_v37  ;;  %v2384_v40 = vadd.f32 %v3832_v36, %v4728_v63 }
 0x1e3   :  { %v4810_v43 = vadd.f32 %v3944_v59, %v2384_v40  ;;  %v3833_v44 = vpop.f32.mrb[100].mxu0 }
 0x1e4   :  { %v3945_v61 = vpop.f32.mrb[100].mxu1  ;;  %v3834_v29 = vpop.f32.mrb[101].mxu0 }
 0x1e5   :  { %v3835_v53 = vadd.f32 %v3834_v29, %v3833_v44  ;;  %v3946_v55 = vpop.f32.mrb[101].mxu1  ;;  %v3836_v56 = vpop.f32.mrb[102].mxu0 }
 0x1e6   :  { %v3947_v1 = vadd.f32 %v3946_v55, %v3945_v61  ;;  %v3948_v58 = vpop.f32.mrb[102].mxu1  ;;  %v3837_v31 = vpop.f32.mrb[103].mxu0 }
 0x1e7   :  { %v2389_v60 = vadd.f32 %v3835_v53, %v4730_v20  ;;  %v3838_v4 = vadd.f32 %v3837_v31, %v3836_v56  ;;  %v3949_v5 = vpop.f32.mrb[103].mxu1 }
 0x1e8   :  { %v3950_v15 = vadd.f32 %v3949_v5, %v3948_v58 }
 0x1e9   :  { %v4813_v6 = vadd.f32 %v3947_v1, %v2389_v60  ;;  %v2392_v63 = vadd.f32 %v3838_v4, %v4732_v23 }
 0x1eb   :  { %v4816_v39 = vadd.f32 %v3950_v15, %v2392_v63  ;;  %v3839_v10 = vpop.f32.mrb[104].mxu0 }
 0x1ec   :  { %v3951_v17 = vpop.f32.mrb[104].mxu1  ;;  %v3840_v13 = vpop.f32.mrb[105].mxu0 }
 0x1ed   :  { %v3841_v41 = vadd.f32 %v3840_v13, %v3839_v10  ;;  %v3952_v47 = vpop.f32.mrb[105].mxu1  ;;  %v3842_v24 = vpop.f32.mrb[106].mxu0 }
 0x1ee   :  { %v3953_v25 = vadd.f32 %v3952_v47, %v3951_v17  ;;  %v3954_v26 = vpop.f32.mrb[106].mxu1  ;;  %v3843_v28 = vpop.f32.mrb[107].mxu0 }
 0x1ef   :  { %v2397_v20 = vadd.f32 %v3841_v41, %v4734_v45  ;;  %v3844_v32 = vadd.f32 %v3843_v28, %v3842_v24  ;;  %v3955_v19 = vpop.f32.mrb[107].mxu1 }
 0x1f0   :  { %v3956_v37 = vadd.f32 %v3955_v19, %v3954_v26 }
 0x1f1   :  { %v4819_v36 = vadd.f32 %v3953_v25, %v2397_v20  ;;  %v2400_v23 = vadd.f32 %v3844_v32, %v4736_v48 }
 0x1f3   :  { %v4822_v49 = vadd.f32 %v3956_v37, %v2400_v23  ;;  %v3845_v59 = vpop.f32.mrb[108].mxu0 }
 0x1f4   :  { %v3957_v40 = vpop.f32.mrb[108].mxu1  ;;  %v3846_v44 = vpop.f32.mrb[109].mxu0 }
 0x1f5   :  { %v3847_v61 = vadd.f32 %v3846_v44, %v3845_v59  ;;  %v3958_v29 = vpop.f32.mrb[109].mxu1  ;;  %v3848_v53 = vpop.f32.mrb[110].mxu0 }
 0x1f6   :  { %v3959_v55 = vadd.f32 %v3958_v29, %v3957_v40  ;;  %v3960_v56 = vpop.f32.mrb[110].mxu1  ;;  %v3849_v1 = vpop.f32.mrb[111].mxu0 }
 0x1f7   :  { %v2405_v45 = vadd.f32 %v3847_v61, %v4738_v7  ;;  %v3850_v58 = vadd.f32 %v3849_v1, %v3848_v53  ;;  %v3961_v31 = vpop.f32.mrb[111].mxu1 }
 0x1f8   :  { %v3962_v60 = vadd.f32 %v3961_v31, %v3960_v56 }
 0x1f9   :  { %v4825_v4 = vadd.f32 %v3959_v55, %v2405_v45  ;;  %v2408_v48 = vadd.f32 %v3850_v58, %v4740_v9 }
 0x1fb   :  { %v4828_v5 = vadd.f32 %v3962_v60, %v2408_v48  ;;  %v3851_v15 = vpop.f32.mrb[112].mxu0 }
 0x1fc   :  { %v3963_v63 = vpop.f32.mrb[112].mxu1  ;;  %v3852_v10 = vpop.f32.mrb[113].mxu0 }
 0x1fd   :  { %v3853_v17 = vadd.f32 %v3852_v10, %v3851_v15  ;;  %v3964_v13 = vpop.f32.mrb[113].mxu1  ;;  %v3854_v41 = vpop.f32.mrb[114].mxu0 }
 0x1fe   :  { %v3965_v47 = vadd.f32 %v3964_v13, %v3963_v63  ;;  %v3966_v24 = vpop.f32.mrb[114].mxu1  ;;  %v3855_v25 = vpop.f32.mrb[115].mxu0 }
 0x1ff   :  { %v2413_v7 = vadd.f32 %v3853_v17, %v4742_v33  ;;  %v3856_v26 = vadd.f32 %v3855_v25, %v3854_v41  ;;  %v3967_v28 = vpop.f32.mrb[115].mxu1 }
 0x200   :  { %v3968_v20 = vadd.f32 %v3967_v28, %v3966_v24 }
 0x201   :  { %v4831_v32 = vadd.f32 %v3965_v47, %v2413_v7  ;;  %v2416_v9 = vadd.f32 %v3856_v26, %v4744_v35 }
 0x203   :  { %v4834_v19 = vadd.f32 %v3968_v20, %v2416_v9  ;;  %v3857_v37 = vpop.f32.mrb[116].mxu0 }
 0x204   :  { %v3969_v23 = vpop.f32.mrb[116].mxu1  ;;  %v3858_v59 = vpop.f32.mrb[117].mxu0 }
 0x205   :  { %v3859_v40 = vadd.f32 %v3858_v59, %v3857_v37  ;;  %v3970_v44 = vpop.f32.mrb[117].mxu1  ;;  %v3860_v61 = vpop.f32.mrb[118].mxu0 }
 0x206   :  { %v3971_v29 = vadd.f32 %v3970_v44, %v3969_v23  ;;  %v3972_v53 = vpop.f32.mrb[118].mxu1  ;;  %v3861_v55 = vpop.f32.mrb[119].mxu0 }
 0x207   :  { %v2421_v33 = vadd.f32 %v3859_v40, %v4746_v62  ;;  %v3862_v56 = vadd.f32 %v3861_v55, %v3860_v61  ;;  %v3973_v1 = vpop.f32.mrb[119].mxu1 }
 0x208   :  { %v3974_v45 = vadd.f32 %v3973_v1, %v3972_v53 }
 0x209   :  { %v4837_v58 = vadd.f32 %v3971_v29, %v2421_v33  ;;  %v2424_v35 = vadd.f32 %v3862_v56, %v4748_v2 }
 0x20b   :  { %v4840_v31 = vadd.f32 %v3974_v45, %v2424_v35  ;;  %v3863_v60 = vpop.f32.mrb[120].mxu0 }
 0x20c   :  { %v3975_v48 = vpop.f32.mrb[120].mxu1  ;;  %v3864_v15 = vpop.f32.mrb[121].mxu0 }
 0x20d   :  { %v3865_v63 = vadd.f32 %v3864_v15, %v3863_v60  ;;  %v3976_v10 = vpop.f32.mrb[121].mxu1  ;;  %v3866_v17 = vpop.f32.mrb[122].mxu0 }
 0x20e   :  { %v3977_v13 = vadd.f32 %v3976_v10, %v3975_v48  ;;  %v3978_v41 = vpop.f32.mrb[122].mxu1  ;;  %v3867_v47 = vpop.f32.mrb[123].mxu0 }
 0x20f   :  { %v2429_v62 = vadd.f32 %v3865_v63, %v4750_v27  ;;  %v3868_v24 = vadd.f32 %v3867_v47, %v3866_v17  ;;  %v3979_v25 = vpop.f32.mrb[123].mxu1 }
 0x210   :  { %v3980_v7 = vadd.f32 %v3979_v25, %v3978_v41 }
 0x211   :  { %v4843_v26 = vadd.f32 %v3977_v13, %v2429_v62  ;;  %v2432_v2 = vadd.f32 %v3868_v24, %v4752_v30 }
 0x213   :  { %v4846_v28 = vadd.f32 %v3980_v7, %v2432_v2  ;;  %v3869_v20 = vpop.f32.mrb[124].mxu0 }
 0x214   :  { %v3981_v9 = vpop.f32.mrb[124].mxu1  ;;  %v3870_v37 = vpop.f32.mrb[125].mxu0 }
 0x215   :  { %v3871_v23 = vadd.f32 %v3870_v37, %v3869_v20  ;;  %v3982_v59 = vpop.f32.mrb[125].mxu1  ;;  %v3872_v40 = vpop.f32.mrb[126].mxu0 }
 0x216   :  { %v3983_v44 = vadd.f32 %v3982_v59, %v3981_v9  ;;  %v3984_v61 = vpop.f32.mrb[126].mxu1  ;;  %v3873_v29 = vpop.f32.mrb[127].mxu0 }
 0x217   :  { %v2437_v27 = vadd.f32 %v3871_v23, %v4754_v57  ;;  %v3874_v53 = vadd.f32 %v3873_v29, %v3872_v40  ;;  %v3985_v55 = vpop.f32.mrb[127].mxu1 }
 0x218   :  { %v3986_v33 = vadd.f32 %v3985_v55, %v3984_v61 }
 0x219   :  { %v4849_v56 = vadd.f32 %v3983_v44, %v2437_v27  ;;  %v2440_v30 = vadd.f32 %v3874_v53, %v4756_v0 }
 0x21b   :  { %v4852_v1 = vadd.f32 %v3986_v33, %v2440_v30  ;;  %v4003_v45 = vpop.f32.mrb[128].mxu0 }
 0x21c   :  { %v4115_v35 = vpop.f32.mrb[128].mxu1  ;;  %v4004_v60 = vpop.f32.mrb[129].mxu0 }
 0x21d   :  { %v4005_v48 = vadd.f32 %v4004_v60, %v4003_v45  ;;  %v4116_v15 = vpop.f32.mrb[129].mxu1  ;;  %v4006_v63 = vpop.f32.mrb[130].mxu0 }
 0x21e   :  { %v4117_v10 = vadd.f32 %v4116_v15, %v4115_v35  ;;  %v4118_v17 = vpop.f32.mrb[130].mxu1  ;;  %v4007_v13 = vpop.f32.mrb[131].mxu0 }
 0x21f   :  { %v2639_v57 = vadd.f32 %v4005_v48, %v4759_v34  ;;  %v4008_v41 = vadd.f32 %v4007_v13, %v4006_v63  ;;  %v4119_v47 = vpop.f32.mrb[131].mxu1 }
 0x220   :  { %v4120_v62 = vadd.f32 %v4119_v47, %v4118_v17 }
 0x221   :  { %v2800_v24 = vadd.f32 %v4117_v10, %v2639_v57  ;;  %v2642_v25 = vadd.f32 %v4008_v41, %v4762_v38 }
 0x223   :  { %v2803_v0 = vadd.f32 %v4120_v62, %v2642_v25  ;;  %v4009_v7 = vpop.f32.mrb[132].mxu0 }
 0x224   :  { %v4121_v2 = vpop.f32.mrb[132].mxu1  ;;  %v4010_v20 = vpop.f32.mrb[133].mxu0 }
 0x225   :  { %v3447_v9 = vpack.c.bf16 %v2803_v0, %v2800_v24  ;;  %v4011_v37 = vadd.f32 %v4010_v20, %v4009_v7  ;;  %v4122_v23 = vpop.f32.mrb[133].mxu1  ;;  %v4012_v59 = vpop.f32.mrb[134].mxu0 }
 0x226   :  { %v4123_v40 = vadd.f32 %v4122_v23, %v4121_v2  ;;  %v4124_v44 = vpop.f32.mrb[134].mxu1  ;;  %v4013_v61 = vpop.f32.mrb[135].mxu0 }
 0x227   :  { %3448 = vst [vmem:[%s4936_s2] sm:$0xff] %v3447_v9   ;;  %v2647_v34 = vadd.f32 %v4011_v37, %v4765_v8  ;;  %v4014_v29 = vadd.f32 %v4013_v61, %v4012_v59  ;;  %v4125_v27 = vpop.f32.mrb[135].mxu1 }
 0x228   :  { %v4126_v38 = vadd.f32 %v4125_v27, %v4124_v44 }
 0x229   :  { %v2808_v53 = vadd.f32 %v4123_v40, %v2647_v34  ;;  %v2650_v55 = vadd.f32 %v4014_v29, %v4768_v11 }
 0x22b   :  { %v2811_v33 = vadd.f32 %v4126_v38, %v2650_v55  ;;  %v4015_v30 = vpop.f32.mrb[136].mxu0 }
 0x22c   :  { %v4127_v45 = vpop.f32.mrb[136].mxu1  ;;  %v4016_v35 = vpop.f32.mrb[137].mxu0 }
 0x22d   :  { %v3452_v60 = vpack.c.bf16 %v2811_v33, %v2808_v53  ;;  %v4017_v48 = vadd.f32 %v4016_v35, %v4015_v30  ;;  %v4128_v15 = vpop.f32.mrb[137].mxu1  ;;  %v4018_v63 = vpop.f32.mrb[138].mxu0 }
 0x22e   :  { %v4129_v10 = vadd.f32 %v4128_v15, %v4127_v45  ;;  %v4130_v17 = vpop.f32.mrb[138].mxu1  ;;  %v4019_v13 = vpop.f32.mrb[139].mxu0 }
 0x22f   :  { %3524 = vst [vmem:[%s4936_s2 + $0x8] sm:$0xff] %v3452_v60   ;;  %v2655_v8 = vadd.f32 %v4017_v48, %v4771_v46  ;;  %v4020_v57 = vadd.f32 %v4019_v13, %v4018_v63  ;;  %v4131_v41 = vpop.f32.mrb[139].mxu1 }
 0x230   :  { %v4132_v11 = vadd.f32 %v4131_v41, %v4130_v17 }
 0x231   :  { %v2816_v47 = vadd.f32 %v4129_v10, %v2655_v8  ;;  %v2658_v62 = vadd.f32 %v4020_v57, %v4774_v51 }
 0x233   :  { %v2819_v24 = vadd.f32 %v4132_v11, %v2658_v62  ;;  %v4021_v25 = vpop.f32.mrb[140].mxu0 }
 0x234   :  { %v4133_v0 = vpop.f32.mrb[140].mxu1  ;;  %v4022_v7 = vpop.f32.mrb[141].mxu0 }
 0x235   :  { %v3457_v2 = vpack.c.bf16 %v2819_v24, %v2816_v47  ;;  %v4023_v20 = vadd.f32 %v4022_v7, %v4021_v25  ;;  %v4134_v9 = vpop.f32.mrb[141].mxu1  ;;  %v4024_v37 = vpop.f32.mrb[142].mxu0 }
 0x236   :  { %v4135_v23 = vadd.f32 %v4134_v9, %v4133_v0  ;;  %v4136_v59 = vpop.f32.mrb[142].mxu1  ;;  %v4025_v40 = vpop.f32.mrb[143].mxu0 }
 0x237   :  { %3525 = vst [vmem:[%s4936_s2 + $0x10] sm:$0xff] %v3457_v2   ;;  %v2663_v46 = vadd.f32 %v4023_v20, %v4777_v16  ;;  %v4026_v44 = vadd.f32 %v4025_v40, %v4024_v37  ;;  %v4137_v61 = vpop.f32.mrb[143].mxu1 }
 0x238   :  { %v4138_v51 = vadd.f32 %v4137_v61, %v4136_v59 }
 0x239   :  { %v2824_v34 = vadd.f32 %v4135_v23, %v2663_v46  ;;  %v2666_v29 = vadd.f32 %v4026_v44, %v4780_v22 }
 0x23b   :  { %v2827_v27 = vadd.f32 %v4138_v51, %v2666_v29  ;;  %v4027_v38 = vpop.f32.mrb[144].mxu0 }
 0x23c   :  { %v4139_v53 = vpop.f32.mrb[144].mxu1  ;;  %v4028_v55 = vpop.f32.mrb[145].mxu0 }
 0x23d   :  { %v3462_v33 = vpack.c.bf16 %v2827_v27, %v2824_v34  ;;  %v4029_v30 = vadd.f32 %v4028_v55, %v4027_v38  ;;  %v4140_v45 = vpop.f32.mrb[145].mxu1  ;;  %v4030_v35 = vpop.f32.mrb[146].mxu0 }
 0x23e   :  { %v4141_v60 = vadd.f32 %v4140_v45, %v4139_v53  ;;  %v4142_v48 = vpop.f32.mrb[146].mxu1  ;;  %v4031_v15 = vpop.f32.mrb[147].mxu0 }
 0x23f   :  { %3526 = vst [vmem:[%s4936_s2 + $0x18] sm:$0xff] %v3462_v33   ;;  %v2671_v16 = vadd.f32 %v4029_v30, %v4783_v52  ;;  %v4032_v63 = vadd.f32 %v4031_v15, %v4030_v35  ;;  %v4143_v10 = vpop.f32.mrb[147].mxu1 }
 0x240   :  { %v4144_v22 = vadd.f32 %v4143_v10, %v4142_v48 }
 0x241   :  { %v2832_v17 = vadd.f32 %v4141_v60, %v2671_v16  ;;  %v2674_v13 = vadd.f32 %v4032_v63, %v4786_v54 }
 0x243   :  { %v2835_v8 = vadd.f32 %v4144_v22, %v2674_v13  ;;  %v4033_v57 = vpop.f32.mrb[148].mxu0 }
 0x244   :  { %v4145_v41 = vpop.f32.mrb[148].mxu1  ;;  %v4034_v11 = vpop.f32.mrb[149].mxu0 }
 0x245   :  { %v3467_v47 = vpack.c.bf16 %v2835_v8, %v2832_v17  ;;  %v4035_v62 = vadd.f32 %v4034_v11, %v4033_v57  ;;  %v4146_v24 = vpop.f32.mrb[149].mxu1  ;;  %v4036_v25 = vpop.f32.mrb[150].mxu0 }
 0x246   :  { %v4147_v0 = vadd.f32 %v4146_v24, %v4145_v41  ;;  %v4148_v7 = vpop.f32.mrb[150].mxu1  ;;  %v4037_v2 = vpop.f32.mrb[151].mxu0 }
 0x247   :  { %3527 = vst [vmem:[%s4936_s2 + $0x20] sm:$0xff] %v3467_v47   ;;  %v2679_v52 = vadd.f32 %v4035_v62, %v4789_v14  ;;  %v4038_v20 = vadd.f32 %v4037_v2, %v4036_v25  ;;  %v4149_v9 = vpop.f32.mrb[151].mxu1 }
 0x248   :  { %v4150_v54 = vadd.f32 %v4149_v9, %v4148_v7 }
 0x249   :  { %v2840_v37 = vadd.f32 %v4147_v0, %v2679_v52  ;;  %v2682_v23 = vadd.f32 %v4038_v20, %v4792_v18 }
 0x24b   :  { %v2843_v59 = vadd.f32 %v4150_v54, %v2682_v23  ;;  %v4039_v40 = vpop.f32.mrb[152].mxu0 }
 0x24c   :  { %v4151_v46 = vpop.f32.mrb[152].mxu1  ;;  %v4040_v44 = vpop.f32.mrb[153].mxu0 }
 0x24d   :  { %v3472_v61 = vpack.c.bf16 %v2843_v59, %v2840_v37  ;;  %v4041_v51 = vadd.f32 %v4040_v44, %v4039_v40  ;;  %v4152_v34 = vpop.f32.mrb[153].mxu1  ;;  %v4042_v29 = vpop.f32.mrb[154].mxu0 }
 0x24e   :  { %v4153_v27 = vadd.f32 %v4152_v34, %v4151_v46  ;;  %v4154_v38 = vpop.f32.mrb[154].mxu1  ;;  %v4043_v53 = vpop.f32.mrb[155].mxu0 }
 0x24f   :  { %3528 = vst [vmem:[%s4936_s2 + $0x28] sm:$0xff] %v3472_v61   ;;  %v2687_v14 = vadd.f32 %v4041_v51, %v4795_v50  ;;  %v4044_v55 = vadd.f32 %v4043_v53, %v4042_v29  ;;  %v4155_v33 = vpop.f32.mrb[155].mxu1 }
 0x250   :  { %v4156_v18 = vadd.f32 %v4155_v33, %v4154_v38 }
 0x251   :  { %v2848_v30 = vadd.f32 %v4153_v27, %v2687_v14  ;;  %v2690_v45 = vadd.f32 %v4044_v55, %v4798_v21 }
 0x253   :  { %v2851_v35 = vadd.f32 %v4156_v18, %v2690_v45  ;;  %v4045_v60 = vpop.f32.mrb[156].mxu0 }
 0x254   :  { %v4157_v48 = vpop.f32.mrb[156].mxu1  ;;  %v4046_v15 = vpop.f32.mrb[157].mxu0 }
 0x255   :  { %v3477_v16 = vpack.c.bf16 %v2851_v35, %v2848_v30  ;;  %v4047_v63 = vadd.f32 %v4046_v15, %v4045_v60  ;;  %v4158_v10 = vpop.f32.mrb[157].mxu1  ;;  %v4048_v22 = vpop.f32.mrb[158].mxu0 }
 0x256   :  { %v4159_v17 = vadd.f32 %v4158_v10, %v4157_v48  ;;  %v4160_v13 = vpop.f32.mrb[158].mxu1  ;;  %v4049_v8 = vpop.f32.mrb[159].mxu0 }
 0x257   :  { %3529 = vst [vmem:[%s4936_s2 + $0x30] sm:$0xff] %v3477_v16   ;;  %v2695_v50 = vadd.f32 %v4047_v63, %v4801_v3  ;;  %v4050_v57 = vadd.f32 %v4049_v8, %v4048_v22  ;;  %v4161_v41 = vpop.f32.mrb[159].mxu1 }
 0x258   :  { %v4162_v21 = vadd.f32 %v4161_v41, %v4160_v13 }
 0x259   :  { %v2856_v11 = vadd.f32 %v4159_v17, %v2695_v50  ;;  %v2698_v47 = vadd.f32 %v4050_v57, %v4804_v12 }
 0x25b   :  { %v2859_v62 = vadd.f32 %v4162_v21, %v2698_v47  ;;  %v4051_v24 = vpop.f32.mrb[160].mxu0 }
 0x25c   :  { %v4163_v25 = vpop.f32.mrb[160].mxu1  ;;  %v4052_v0 = vpop.f32.mrb[161].mxu0 }
 0x25d   :  { %v3482_v7 = vpack.c.bf16 %v2859_v62, %v2856_v11  ;;  %v4053_v2 = vadd.f32 %v4052_v0, %v4051_v24  ;;  %v4164_v52 = vpop.f32.mrb[161].mxu1  ;;  %v4054_v20 = vpop.f32.mrb[162].mxu0 }
 0x25e   :  { %v4165_v9 = vadd.f32 %v4164_v52, %v4163_v25  ;;  %v4166_v54 = vpop.f32.mrb[162].mxu1  ;;  %v4055_v37 = vpop.f32.mrb[163].mxu0 }
 0x25f   :  { %3530 = vst [vmem:[%s4936_s2 + $0x38] sm:$0xff] %v3482_v7   ;;  %v2703_v3 = vadd.f32 %v4053_v2, %v4807_v42  ;;  %v4056_v23 = vadd.f32 %v4055_v37, %v4054_v20  ;;  %v4167_v59 = vpop.f32.mrb[163].mxu1 }
 0x260   :  { %v4168_v12 = vadd.f32 %v4167_v59, %v4166_v54 }
 0x261   :  { %v2864_v40 = vadd.f32 %v4165_v9, %v2703_v3  ;;  %v2706_v46 = vadd.f32 %v4056_v23, %v4810_v43 }
 0x263   :  { %v2867_v44 = vadd.f32 %v4168_v12, %v2706_v46  ;;  %v4057_v61 = vpop.f32.mrb[164].mxu0 }
 0x264   :  { %v4169_v51 = vpop.f32.mrb[164].mxu1  ;;  %v4058_v34 = vpop.f32.mrb[165].mxu0 }
 0x265   :  { %v3487_v29 = vpack.c.bf16 %v2867_v44, %v2864_v40  ;;  %v4059_v27 = vadd.f32 %v4058_v34, %v4057_v61  ;;  %v4170_v38 = vpop.f32.mrb[165].mxu1  ;;  %v4060_v53 = vpop.f32.mrb[166].mxu0 }
 0x266   :  { %v4171_v14 = vadd.f32 %v4170_v38, %v4169_v51  ;;  %v4172_v55 = vpop.f32.mrb[166].mxu1  ;;  %v4061_v33 = vpop.f32.mrb[167].mxu0 }
 0x267   :  { %3531 = vst [vmem:[%s4936_s2 + $0x40] sm:$0xff] %v3487_v29   ;;  %v2711_v42 = vadd.f32 %v4059_v27, %v4813_v6  ;;  %v4062_v18 = vadd.f32 %v4061_v33, %v4060_v53  ;;  %v4173_v30 = vpop.f32.mrb[167].mxu1 }
 0x268   :  { %v4174_v43 = vadd.f32 %v4173_v30, %v4172_v55 }
 0x269   :  { %v2872_v45 = vadd.f32 %v4171_v14, %v2711_v42  ;;  %v2714_v35 = vadd.f32 %v4062_v18, %v4816_v39 }
 0x26b   :  { %v2875_v60 = vadd.f32 %v4174_v43, %v2714_v35  ;;  %v4063_v48 = vpop.f32.mrb[168].mxu0 }
 0x26c   :  { %v4175_v15 = vpop.f32.mrb[168].mxu1  ;;  %v4064_v16 = vpop.f32.mrb[169].mxu0 }
 0x26d   :  { %v3492_v63 = vpack.c.bf16 %v2875_v60, %v2872_v45  ;;  %v4065_v10 = vadd.f32 %v4064_v16, %v4063_v48  ;;  %v4176_v22 = vpop.f32.mrb[169].mxu1  ;;  %v4066_v17 = vpop.f32.mrb[170].mxu0 }
 0x26e   :  { %v4177_v13 = vadd.f32 %v4176_v22, %v4175_v15  ;;  %v4178_v8 = vpop.f32.mrb[170].mxu1  ;;  %v4067_v50 = vpop.f32.mrb[171].mxu0 }
 0x26f   :  { %3532 = vst [vmem:[%s4936_s2 + $0x48] sm:$0xff] %v3492_v63   ;;  %v2719_v6 = vadd.f32 %v4065_v10, %v4819_v36  ;;  %v4068_v57 = vadd.f32 %v4067_v50, %v4066_v17  ;;  %v4179_v41 = vpop.f32.mrb[171].mxu1 }
 0x270   :  { %v4180_v39 = vadd.f32 %v4179_v41, %v4178_v8 }
 0x271   :  { %v2880_v21 = vadd.f32 %v4177_v13, %v2719_v6  ;;  %v2722_v11 = vadd.f32 %v4068_v57, %v4822_v49 }
 0x273   :  { %v2883_v47 = vadd.f32 %v4180_v39, %v2722_v11  ;;  %v4069_v62 = vpop.f32.mrb[172].mxu0 }
 0x274   :  { %v4181_v24 = vpop.f32.mrb[172].mxu1  ;;  %v4070_v25 = vpop.f32.mrb[173].mxu0 }
 0x275   :  { %v3497_v0 = vpack.c.bf16 %v2883_v47, %v2880_v21  ;;  %v4071_v7 = vadd.f32 %v4070_v25, %v4069_v62  ;;  %v4182_v2 = vpop.f32.mrb[173].mxu1  ;;  %v4072_v52 = vpop.f32.mrb[174].mxu0 }
 0x276   :  { %v4183_v20 = vadd.f32 %v4182_v2, %v4181_v24  ;;  %v4184_v9 = vpop.f32.mrb[174].mxu1  ;;  %v4073_v54 = vpop.f32.mrb[175].mxu0 }
 0x277   :  { %3533 = vst [vmem:[%s4936_s2 + $0x50] sm:$0xff] %v3497_v0   ;;  %v2727_v36 = vadd.f32 %v4071_v7, %v4825_v4  ;;  %v4074_v37 = vadd.f32 %v4073_v54, %v4072_v52  ;;  %v4185_v3 = vpop.f32.mrb[175].mxu1 }
 0x278   :  { %v4186_v49 = vadd.f32 %v4185_v3, %v4184_v9 }
 0x279   :  { %v2888_v23 = vadd.f32 %v4183_v20, %v2727_v36  ;;  %v2730_v59 = vadd.f32 %v4074_v37, %v4828_v5 }
 0x27b   :  { %v2891_v12 = vadd.f32 %v4186_v49, %v2730_v59  ;;  %v4075_v40 = vpop.f32.mrb[176].mxu0 }
 0x27c   :  { %v4187_v46 = vpop.f32.mrb[176].mxu1  ;;  %v4076_v44 = vpop.f32.mrb[177].mxu0 }
 0x27d   :  { %v3502_v61 = vpack.c.bf16 %v2891_v12, %v2888_v23  ;;  %v4077_v51 = vadd.f32 %v4076_v44, %v4075_v40  ;;  %v4188_v34 = vpop.f32.mrb[177].mxu1  ;;  %v4078_v29 = vpop.f32.mrb[178].mxu0 }
 0x27e   :  { %v4189_v27 = vadd.f32 %v4188_v34, %v4187_v46  ;;  %v4190_v38 = vpop.f32.mrb[178].mxu1  ;;  %v4079_v53 = vpop.f32.mrb[179].mxu0 }
 0x27f   :  { %3534 = vst [vmem:[%s4936_s2 + $0x58] sm:$0xff] %v3502_v61   ;;  %v2735_v4 = vadd.f32 %v4077_v51, %v4831_v32  ;;  %v4080_v14 = vadd.f32 %v4079_v53, %v4078_v29  ;;  %v4191_v55 = vpop.f32.mrb[179].mxu1 }
 0x280   :  { %v4192_v5 = vadd.f32 %v4191_v55, %v4190_v38 }
 0x281   :  { %v2896_v33 = vadd.f32 %v4189_v27, %v2735_v4  ;;  %v2738_v42 = vadd.f32 %v4080_v14, %v4834_v19 }
 0x283   :  { %v2899_v18 = vadd.f32 %v4192_v5, %v2738_v42  ;;  %v4081_v30 = vpop.f32.mrb[180].mxu0 }
 0x284   :  { %v4193_v43 = vpop.f32.mrb[180].mxu1  ;;  %v4082_v45 = vpop.f32.mrb[181].mxu0 }
 0x285   :  { %v3507_v35 = vpack.c.bf16 %v2899_v18, %v2896_v33  ;;  %v4083_v60 = vadd.f32 %v4082_v45, %v4081_v30  ;;  %v4194_v48 = vpop.f32.mrb[181].mxu1  ;;  %v4084_v15 = vpop.f32.mrb[182].mxu0 }
 0x286   :  { %v4195_v16 = vadd.f32 %v4194_v48, %v4193_v43  ;;  %v4196_v63 = vpop.f32.mrb[182].mxu1  ;;  %v4085_v10 = vpop.f32.mrb[183].mxu0 }
 0x287   :  { %3535 = vst [vmem:[%s4936_s2 + $0x60] sm:$0xff] %v3507_v35   ;;  %v2743_v32 = vadd.f32 %v4083_v60, %v4837_v58  ;;  %v4086_v22 = vadd.f32 %v4085_v10, %v4084_v15  ;;  %v4197_v17 = vpop.f32.mrb[183].mxu1 }
 0x288   :  { %v4198_v19 = vadd.f32 %v4197_v17, %v4196_v63 }
 0x289   :  { %v2904_v13 = vadd.f32 %v4195_v16, %v2743_v32  ;;  %v2746_v8 = vadd.f32 %v4086_v22, %v4840_v31 }
 0x28b   :  { %v2907_v50 = vadd.f32 %v4198_v19, %v2746_v8  ;;  %v4087_v6 = vpop.f32.mrb[184].mxu0 }
 0x28c   :  { %v4199_v57 = vpop.f32.mrb[184].mxu1  ;;  %v4088_v41 = vpop.f32.mrb[185].mxu0 }
 0x28d   :  { %v3512_v39 = vpack.c.bf16 %v2907_v50, %v2904_v13  ;;  %v4089_v21 = vadd.f32 %v4088_v41, %v4087_v6  ;;  %v4200_v11 = vpop.f32.mrb[185].mxu1  ;;  %v4090_v47 = vpop.f32.mrb[186].mxu0 }
 0x28e   :  { %v4201_v62 = vadd.f32 %v4200_v11, %v4199_v57  ;;  %v4202_v24 = vpop.f32.mrb[186].mxu1  ;;  %v4091_v25 = vpop.f32.mrb[187].mxu0 }
 0x28f   :  { %3536 = vst [vmem:[%s4936_s2 + $0x68] sm:$0xff] %v3512_v39   ;;  %v2751_v58 = vadd.f32 %v4089_v21, %v4843_v26  ;;  %v4092_v0 = vadd.f32 %v4091_v25, %v4090_v47  ;;  %v4203_v7 = vpop.f32.mrb[187].mxu1 }
 0x290   :  { %v4204_v31 = vadd.f32 %v4203_v7, %v4202_v24 }
 0x291   :  { %v2912_v2 = vadd.f32 %v4201_v62, %v2751_v58  ;;  %v2754_v52 = vadd.f32 %v4092_v0, %v4846_v28 }
 0x293   :  { %v2915_v20 = vadd.f32 %v4204_v31, %v2754_v52  ;;  %v4093_v9 = vpop.f32.mrb[188].mxu0 }
 0x294   :  { %v4205_v54 = vpop.f32.mrb[188].mxu1  ;;  %v4094_v36 = vpop.f32.mrb[189].mxu0 }
 0x295   :  { %v3517_v37 = vpack.c.bf16 %v2915_v20, %v2912_v2  ;;  %v4095_v3 = vadd.f32 %v4094_v36, %v4093_v9  ;;  %v4206_v49 = vpop.f32.mrb[189].mxu1  ;;  %v4096_v23 = vpop.f32.mrb[190].mxu0 }
 0x296   :  { %v4207_v59 = vadd.f32 %v4206_v49, %v4205_v54  ;;  %v4208_v12 = vpop.f32.mrb[190].mxu1  ;;  %v4097_v40 = vpop.f32.mrb[191].mxu0 }
 0x297   :  { %3537 = vst [vmem:[%s4936_s2 + $0x70] sm:$0xff] %v3517_v37   ;;  %v2759_v26 = vadd.f32 %v4095_v3, %v4849_v56  ;;  %v4098_v46 = vadd.f32 %v4097_v40, %v4096_v23  ;;  %v4209_v44 = vpop.f32.mrb[191].mxu1 }
 0x298   :  { %v4210_v28 = vadd.f32 %v4209_v44, %v4208_v12 }
 0x299   :  { %v2920_v61 = vadd.f32 %v4207_v59, %v2759_v26  ;;  %v2762_v51 = vadd.f32 %v4098_v46, %v4852_v1 }
 0x29b   :  { %v2923_v34 = vadd.f32 %v4210_v28, %v2762_v51 }
 0x29d   :  { %v3522_v29 = vpack.c.bf16 %v2923_v34, %v2920_v61 }
 0x29f   :  { %3538 = vst [vmem:[%s4936_s2 + $0x78] sm:$0xff] %v3522_v29  }
 0x2a0   :  { %3090 = vsyncpa [#allocation3], 1 }
 0x2a1   :  { %3091 = vsyncpa [#allocation5], 1 }

</bundles_post_ra>
